<compile_context>
chip_gen: v7x
topology: tpu7x:2x2x1
jax: 0.10.0
libtpu: 0.0.40
codegen_flags: <defaults>
</compile_context>

<pallas_src>
import functools

import numpy as np
import jax
import jax.numpy as jnp
from jax import lax
from jax.experimental import pallas as pl
from jax.experimental.pallas import tpu as pltpu


_PAD_MODE = {"zeros": "constant", "constant": "constant", "reflect": "reflect",
             "replicate": "edge", "circular": "wrap"}


def _round_up(x, m):
    return (x + m - 1) // m * m


def _fold_bn(blk):
    """Fold eval-mode BatchNorm3d into the conv weight/bias (exact)."""
    scale = blk["bn_gamma"] * lax.rsqrt(blk["bn_var"] + blk["bn_eps"])
    w = blk["w"] * scale[:, None, None, None, None]
    b = (blk["b"] - blk["bn_mean"]) * scale + blk["bn_beta"]
    return w, b


def _src_index(i, size, torch_mode):
    """Map a padded-coordinate index back to a source index (or None = zero)."""
    if 0 <= i < size:
        return i
    if torch_mode == "replicate":
        return min(max(i, 0), size - 1)
    if torch_mode in ("zeros", "constant"):
        return None
    if torch_mode == "reflect":
        period = 2 * (size - 1)
        if period <= 0:
            return 0
        j = abs(i) % period
        return j if j < size else period - j
    if torch_mode == "circular":
        return i % size
    raise ValueError(torch_mode)


def _extract_patches_3d(xp, kernel, stride, out_dims):
    """xp: (N, Tp, Hp, Wp, Cin) padded.  Returns (N, To, Ho, Wo, K),
    K = kT*kH*kW*Cin ordered (dt, dh, dw, cin).  Wrapper-side glue (layer 0)."""
    kT, kH, kW = kernel
    sT, sH, sW = stride
    To, Ho, Wo = out_dims
    taps = []
    for dt in range(kT):
        for dh in range(kH):
            for dw in range(kW):
                taps.append(xp[:, dt:dt + sT * To:sT,
                                  dh:dh + sH * Ho:sH,
                                  dw:dw + sW * Wo:sW, :])
    return jnp.concatenate(taps, axis=-1)


# ----------------------------------------------------------------------------
# The single fused kernel.  One grid step = one batch sample.
# ----------------------------------------------------------------------------
def _encoder_kernel(*refs, n_later, fc_spatial, compute_dtype):
    f32 = jnp.float32
    out_ref = refs[-1]
    patches_ref, w0_ref, b0_ref = refs[0], refs[1], refs[2]
    pos = 3

    # ---- Layer 0: one big-K matmul (im2col patches), bias + ReLU fused ----
    x = patches_ref[0]                                           # (M0p, K0)
    y_f32 = jnp.dot(x, w0_ref[...], preferred_element_type=f32) + b0_ref[...]
    y_f32 = jnp.maximum(y_f32, 0.0)
    y = y_f32.astype(compute_dtype)                              # (M0p, 128)

    # ---- Later DownBlock3d layers: in-kernel tap reduction.  Stride and
    #      replicate padding are encoded in constant 0/1 selection matrices.
    for _ in range(n_later):
        s_ref, w_ref, b_ref = refs[pos], refs[pos + 1], refs[pos + 2]
        pos += 3
        n_taps = s_ref.shape[0]
        acc = jnp.zeros((s_ref.shape[1], w_ref.shape[2]), f32)
        for t in range(n_taps):
            g = jnp.dot(s_ref[t], y,
                        preferred_element_type=f32).astype(compute_dtype)
            acc = acc + jnp.dot(g, w_ref[t], preferred_element_type=f32)
        y_f32 = jnp.maximum(acc + b_ref[...], 0.0)
        y = y_f32.astype(compute_dtype)

    # ---- Fused fc1|fc2 head; (C,T,H,W) flatten order folded into wfc ----
    wfc_ref, bfc_ref = refs[pos], refs[pos + 1]
    accf = bfc_ref[...]                                          # (1, Op) f32
    for s in range(fc_spatial):
        accf = accf + jnp.dot(y_f32[s:s + 1, :], wfc_ref[s],
                              preferred_element_type=f32)
    out_ref[0] = jnp.broadcast_to(accf, out_ref.shape[1:]).astype(out_ref.dtype)


# ----------------------------------------------------------------------------
# Forward: builds the trace-time constants and issues ONE pallas_call.
# ----------------------------------------------------------------------------
def dense_motion_encoder_forward(video, params, compute_dtype=jnp.float32):
    """video: (N, C, T, H, W) (PyTorch NCDHW).  Returns {'mu','logvar'}."""
    blocks = params["down_blocks"]
    mode = params["padding_mode"]
    N, Cin, T, H, W = video.shape
    cdt = compute_dtype
    f32 = jnp.float32

    # -------- layer 0: wrapper-side replicate pad + im2col -> big-K matmul ---
    blk0 = blocks[0]
    w0f, b0f = _fold_bn(blk0)
    C0 = int(w0f.shape[0])
    kT, kH, kW = (int(d) for d in blk0["w"].shape[2:])
    sT, sH, sW = blk0["stride"]
    pT, pH, pW = blk0["padding"]

    x = jnp.transpose(video, (0, 2, 3, 4, 1)).astype(cdt)        # N,T,H,W,C
    xp = jnp.pad(x, ((0, 0), (pT, pT), (pH, pH), (pW, pW), (0, 0)),
                 mode=_PAD_MODE[mode])
    To = (T + 2 * pT - kT) // sT + 1
    Ho = (H + 2 * pH - kH) // sH + 1
    Wo = (W + 2 * pW - kW) // sW + 1
    K0 = kT * kH * kW * Cin
    M0 = To * Ho * Wo
    M0p = _round_up(M0, 8)
    patches = _extract_patches_3d(xp, (kT, kH, kW), (sT, sH, sW), (To, Ho, Wo))
    patches = patches.reshape(N, M0, K0)
    if M0p != M0:
        patches = jnp.pad(patches, ((0, 0), (0, M0p - M0), (0, 0)))

    C0p = _round_up(C0, 128)
    w0_2d = jnp.transpose(w0f, (2, 3, 4, 1, 0)).reshape(K0, C0)
    w0_2d = jnp.pad(w0_2d, ((0, 0), (0, C0p - C0)))
    b0_2d = jnp.pad(b0f, (0, C0p - C0)).reshape(1, C0p)

    inputs = [patches.astype(cdt), w0_2d.astype(cdt), b0_2d.astype(f32)]
    in_specs = [
        pl.BlockSpec((1, M0p, K0), lambda n: (n, 0, 0)),
        pl.BlockSpec((K0, C0p), lambda n: (0, 0)),
        pl.BlockSpec((1, C0p), lambda n: (0, 0)),
    ]

    prevC, prevCp = C0, C0p
    prev_dims = (To, Ho, Wo)
    prev_Mp = M0p

    # -------- later layers: constant selection + per-tap weight stacks -------
    for blk in blocks[1:]:
        wf, bf = _fold_bn(blk)
        Co = int(wf.shape[0])
        kT, kH, kW = (int(d) for d in blk["w"].shape[2:])
        sT, sH, sW = blk["stride"]
        pT, pH, pW = blk["padding"]
        Ti, Hi, Wi = prev_dims
        To = (Ti + 2 * pT - kT) // sT + 1
        Ho = (Hi + 2 * pH - kH) // sH + 1
        Wo = (Wi + 2 * pW - kW) // sW + 1
        Mo = To * Ho * Wo
        Mop = _round_up(Mo, 8)
        Cop = _round_up(Co, 128)
        n_taps = kT * kH * kW

        # 0/1 selection matrices: stride + padding mode (replicate = clamp,
        # zeros = dropped row, reflect = mirror) baked in at trace time.
        S = np.zeros((n_taps, Mop, prev_Mp), np.float32)
        tap = 0
        for dt in range(kT):
            for dh in range(kH):
                for dw in range(kW):
                    for to in range(To):
                        ti = _src_index(to * sT + dt - pT, Ti, mode)
                        for ho in range(Ho):
                            hi = _src_index(ho * sH + dh - pH, Hi, mode)
                            for wo in range(Wo):
                                wi = _src_index(wo * sW + dw - pW, Wi, mode)
                                if ti is None or hi is None or wi is None:
                                    continue
                                S[tap, (to * Ho + ho) * Wo + wo,
                                  (ti * Hi + hi) * Wi + wi] = 1.0
                    tap += 1

        wt = jnp.transpose(wf, (2, 3, 4, 1, 0)).reshape(n_taps, prevC, Co)
        wt = jnp.pad(wt, ((0, 0), (0, prevCp - prevC), (0, Cop - Co)))
        bt = jnp.pad(bf, (0, Cop - Co)).reshape(1, Cop)

        inputs += [jnp.asarray(S).astype(cdt), wt.astype(cdt), bt.astype(f32)]
        in_specs += [
            pl.BlockSpec((n_taps, Mop, prev_Mp), lambda n: (0, 0, 0)),
            pl.BlockSpec((n_taps, prevCp, Cop), lambda n: (0, 0, 0)),
            pl.BlockSpec((1, Cop), lambda n: (0, 0)),
        ]
        prevC, prevCp = Co, Cop
        prev_dims = (To, Ho, Wo)
        prev_Mp = Mop

    # -------- fused fc1/fc2 head (flatten order folded into the weights) -----
    S_last = prev_dims[0] * prev_dims[1] * prev_dims[2]
    C_L, C_Lp = prevC, prevCp
    fc_w = jnp.concatenate([params["fc1_w"], params["fc2_w"]], axis=0)
    fc_b = jnp.concatenate([params["fc1_b"], params["fc2_b"]], axis=0)
    O = int(fc_w.shape[0])
    Op = _round_up(O, 128)
    # PyTorch out.view(B,-1) flattens (C,T,H,W): feature index = c*S_last + s.
    wfc = fc_w.reshape(O, C_L, S_last)
    wfc = jnp.transpose(wfc, (2, 1, 0))                        # (s, c, O)
    wfc = jnp.pad(wfc, ((0, 0), (0, C_Lp - C_L), (0, Op - O)))
    bfc = jnp.pad(fc_b, (0, Op - O)).reshape(1, Op)

    inputs += [wfc.astype(f32), bfc.astype(f32)]
    in_specs += [
        pl.BlockSpec((S_last, C_Lp, Op), lambda n: (0, 0, 0)),
        pl.BlockSpec((1, Op), lambda n: (0, 0)),
    ]

    OUT_ROWS = 8
    kernel = functools.partial(_encoder_kernel, n_later=len(blocks) - 1,
                               fc_spatial=S_last, compute_dtype=cdt)
    out = pl.pallas_call(
        kernel,
        out_shape=jax.ShapeDtypeStruct((N, OUT_ROWS, Op), f32),
        grid_spec=pltpu.PrefetchScalarGridSpec(
            num_scalar_prefetch=0,
            grid=(N,),
            in_specs=in_specs,
            out_specs=pl.BlockSpec((1, OUT_ROWS, Op), lambda n: (n, 0, 0)),
        ),
        compiler_params=pltpu.CompilerParams(
            dimension_semantics=("parallel",)),
    )(*inputs)

    outc = params["fc1_w"].shape[0]
    row = out[:, 0, :]
    return {"mu": row[:, :outc], "logvar": row[:, outc:2 * outc]}


# ----------------------------------------------------------------------------
# Pure-JAX reference (mirrors the PyTorch module) for correctness checking.
# ----------------------------------------------------------------------------
def _ref_forward(video, params):
    x = video.astype(jnp.float32)
    mode = _PAD_MODE[params["padding_mode"]]
    for blk in params["down_blocks"]:
        pT, pH, pW = blk["padding"]
        xp = jnp.pad(x, ((0, 0), (0, 0), (pT, pT), (pH, pH), (pW, pW)), mode=mode)
        y = lax.conv_general_dilated(
            xp, blk["w"], window_strides=blk["stride"], padding="VALID",
            dimension_numbers=("NCDHW", "OIDHW", "NCDHW"))
        y = y + blk["b"][None, :, None, None, None]
        scale = blk["bn_gamma"] / jnp.sqrt(blk["bn_var"] + blk["bn_eps"])
        y = ((y - blk["bn_mean"][None, :, None, None, None])
             * scale[None, :, None, None, None]
             + blk["bn_beta"][None, :, None, None, None])
        x = jnp.maximum(y, 0.0)
    temp = x.reshape(x.shape[0], -1)
    return {"mu": temp @ params["fc1_w"].T + params["fc1_b"],
            "logvar": temp @ params["fc2_w"].T + params["fc2_b"]}


def init_params(key, *, input_channel, output_channel, block_expansion,
                max_expansion, kernels, strides, paddings, padding_mode,
                fc_in_features):
    n = len(kernels)
    keys = jax.random.split(key, 6 * n + 4)
    blocks = []
    inplanes = input_channel
    for i in range(n):
        outplanes = min(max_expansion, block_expansion * 2 ** i)
        kT, kH, kW = kernels[i]
        k = keys[6 * i:6 * i + 6]
        blocks.append(dict(
            w=0.1 * jax.random.normal(k[0], (outplanes, inplanes, kT, kH, kW),
                                      jnp.float32),
            b=0.1 * jax.random.normal(k[1], (outplanes,), jnp.float32),
            stride=tuple(strides[i]), padding=tuple(paddings[i]),
            bn_gamma=1.0 + 0.1 * jax.random.normal(k[2], (outplanes,), jnp.float32),
            bn_beta=0.1 * jax.random.normal(k[3], (outplanes,), jnp.float32),
            bn_mean=0.1 * jax.random.normal(k[4], (outplanes,), jnp.float32),
            bn_var=jax.random.uniform(k[5], (outplanes,), jnp.float32, 0.5, 1.5),
            bn_eps=jnp.float32(1e-5)))
        inplanes = outplanes
    fc1_w = 0.1 * jax.random.normal(keys[-4], (output_channel, fc_in_features), jnp.float32)
    fc1_b = 0.1 * jax.random.normal(keys[-3], (output_channel,), jnp.float32)
    fc2_w = 0.1 * jax.random.normal(keys[-2], (output_channel, fc_in_features), jnp.float32)
    fc2_b = 0.1 * jax.random.normal(keys[-1], (output_channel,), jnp.float32)
    return dict(down_blocks=blocks, fc1_w=fc1_w, fc1_b=fc1_b,
                fc2_w=fc2_w, fc2_b=fc2_b, padding_mode=padding_mode)


if __name__ == "__main__":
    key = jax.random.PRNGKey(0)
    kx, kp = jax.random.split(key)

    # Small config: input_size=(16,16), num_down_blocks=2 -> 4x4 appearance map;
    # block_expansion=8, max_expansion=64; each block: kernel 3, stride 2,
    # padding 1, padding_mode='replicate'.
    N, Cin, T, H, W = 2, 4, 4, 16, 16
    output_channel = 32
    block_expansion, max_expansion = 8, 64
    kernels = [(3, 3, 3), (3, 3, 3)]
    strides = [(2, 2, 2), (2, 2, 2)]
    paddings = [(1, 1, 1), (1, 1, 1)]
    padding_mode = "replicate"

    # fc in_features from conv arithmetic (== t_app * h_app * w_app * outplanes).
    t, h, w = T, H, W
    outplanes = Cin
    for i in range(len(kernels)):
        (kT, kH, kW), (sT, sH, sW), (pT, pH, pW) = kernels[i], strides[i], paddings[i]
        t = (t + 2 * pT - kT) // sT + 1
        h = (h + 2 * pH - kH) // sH + 1
        w = (w + 2 * pW - kW) // sW + 1
        outplanes = min(max_expansion, block_expansion * 2 ** i)
    fc_in_features = outplanes * t * h * w            # 16 * 1 * 4 * 4 = 256

    params = init_params(kp, input_channel=Cin, output_channel=output_channel,
                         block_expansion=block_expansion,
                         max_expansion=max_expansion, kernels=kernels,
                         strides=strides, paddings=paddings,
                         padding_mode=padding_mode,
                         fc_in_features=fc_in_features)
    video = jax.random.normal(kx, (N, Cin, T, H, W), jnp.float32)

    ref = _ref_forward(video, params)

    # f32 path (exact check against the pure-JAX reference).
    out = dense_motion_encoder_forward(video, params, compute_dtype=jnp.float32)
    mu = jax.block_until_ready(out["mu"])
    logvar = jax.block_until_ready(out["logvar"])
    assert mu.shape == (N, output_channel) and logvar.shape == (N, output_channel)
    assert jnp.allclose(mu, ref["mu"], rtol=1e-4, atol=1e-4), \
        float(jnp.max(jnp.abs(mu - ref["mu"])))
    assert jnp.allclose(logvar, ref["logvar"], rtol=1e-4, atol=1e-4), \
        float(jnp.max(jnp.abs(logvar - ref["logvar"])))

    # bf16 operand path (f32 MXU accumulation) -- looser tolerance by design.
    out_bf = dense_motion_encoder_forward(video, params,
                                          compute_dtype=jnp.bfloat16)
    mu_bf = jax.block_until_ready(out_bf["mu"])
    lv_bf = jax.block_until_ready(out_bf["logvar"])
    assert jnp.allclose(mu_bf, ref["mu"], rtol=1e-1, atol=2e-1)
    assert jnp.allclose(lv_bf, ref["logvar"], rtol=1e-1, atol=2e-1)

    print("KERNEL_OK")
</pallas_src>

<mosaic_0001>
module attributes {stable_mosaic.version = 11 : i64} {
  func.func @_encoder_kernel(%arg0: i32, %arg1: memref<1x128x108xf32, #tpu.memory_space<vmem>>, %arg2: memref<108x128xf32, #tpu.memory_space<vmem>>, %arg3: memref<1x128xf32, #tpu.memory_space<vmem>>, %arg4: memref<27x16x128xf32, #tpu.memory_space<vmem>>, %arg5: memref<27x128x128xf32, #tpu.memory_space<vmem>>, %arg6: memref<1x128xf32, #tpu.memory_space<vmem>>, %arg7: memref<16x128x128xf32, #tpu.memory_space<vmem>>, %arg8: memref<1x128xf32, #tpu.memory_space<vmem>>, %arg9: memref<1x8x128xf32, #tpu.memory_space<vmem>>) attributes {dimension_semantics = [#tpu.dimension_semantics<parallel>], iteration_bounds = array<i64: 2>, scalar_prefetch = 0 : i64, scratch_operands = 0 : i64, tpu.core_type = #tpu.core_type<tc>, window_params = [{transform_indices = @transform_0, window_bounds = array<i64: 1, 128, 108>}, {pipeline_mode = #tpu.pipeline_mode<synchronous>, transform_indices = @transform_1, window_bounds = array<i64: 108, 128>}, {pipeline_mode = #tpu.pipeline_mode<synchronous>, transform_indices = @transform_2, window_bounds = array<i64: 1, 128>}, {pipeline_mode = #tpu.pipeline_mode<synchronous>, transform_indices = @transform_3, window_bounds = array<i64: 27, 16, 128>}, {pipeline_mode = #tpu.pipeline_mode<synchronous>, transform_indices = @transform_4, window_bounds = array<i64: 27, 128, 128>}, {pipeline_mode = #tpu.pipeline_mode<synchronous>, transform_indices = @transform_5, window_bounds = array<i64: 1, 128>}, {pipeline_mode = #tpu.pipeline_mode<synchronous>, transform_indices = @transform_6, window_bounds = array<i64: 16, 128, 128>}, {pipeline_mode = #tpu.pipeline_mode<synchronous>, transform_indices = @transform_7, window_bounds = array<i64: 1, 128>}, {transform_indices = @transform_8, window_bounds = array<i64: 1, 8, 128>}]} {
    %c0 = arith.constant 0 : index
    %c0_0 = arith.constant 0 : index
    %c0_1 = arith.constant 0 : index
    %0 = vector.load %arg1[%c0, %c0_0, %c0_1] : memref<1x128x108xf32, #tpu.memory_space<vmem>>, vector<1x128x108xf32>
    %1 = vector.shape_cast %0 : vector<1x128x108xf32> to vector<128x108xf32>
    %c0_2 = arith.constant 0 : index
    %c0_3 = arith.constant 0 : index
    %2 = vector.load %arg2[%c0_2, %c0_3] : memref<108x128xf32, #tpu.memory_space<vmem>>, vector<108x128xf32>
    %cst = arith.constant dense<0.000000e+00> : vector<128x128xf32>
    %3 = tpu.matmul %1, %2, %cst {dimension_numbers = #tpu.dot_dimension_numbers<[1], [0], [0], [1], [0, 0, 1, 1], [], []>} : vector<128x108xf32>, vector<108x128xf32>, vector<128x128xf32> -> vector<128x128xf32>
    %c0_4 = arith.constant 0 : index
    %c0_5 = arith.constant 0 : index
    %4 = vector.load %arg3[%c0_4, %c0_5] : memref<1x128xf32, #tpu.memory_space<vmem>>, vector<1x128xf32>
    %5 = vector.broadcast %4 : vector<1x128xf32> to vector<128x128xf32>
    %6 = arith.addf %3, %5 : vector<128x128xf32>
    %cst_6 = arith.constant 0.000000e+00 : f32
    %7 = vector.broadcast %cst_6 : f32 to vector<128x128xf32>
    %8 = arith.maximumf %6, %7 : vector<128x128xf32>
    %cst_7 = arith.constant 0.000000e+00 : f32
    %9 = vector.broadcast %cst_7 : f32 to vector<16x128xf32>
    %c0_8 = arith.constant 0 : index
    %c0_9 = arith.constant 0 : index
    %c0_10 = arith.constant 0 : index
    %10 = vector.load %arg4[%c0_8, %c0_9, %c0_10] : memref<27x16x128xf32, #tpu.memory_space<vmem>>, vector<1x16x128xf32>
    %11 = vector.shape_cast %10 : vector<1x16x128xf32> to vector<16x128xf32>
    %cst_11 = arith.constant dense<0.000000e+00> : vector<16x128xf32>
    %12 = tpu.matmul %11, %8, %cst_11 {dimension_numbers = #tpu.dot_dimension_numbers<[1], [0], [0], [1], [0, 0, 1, 1], [], []>} : vector<16x128xf32>, vector<128x128xf32>, vector<16x128xf32> -> vector<16x128xf32>
    %c0_12 = arith.constant 0 : index
    %c0_13 = arith.constant 0 : index
    %c0_14 = arith.constant 0 : index
    %13 = vector.load %arg5[%c0_12, %c0_13, %c0_14] : memref<27x128x128xf32, #tpu.memory_space<vmem>>, vector<1x128x128xf32>
    %14 = vector.shape_cast %13 : vector<1x128x128xf32> to vector<128x128xf32>
    %cst_15 = arith.constant dense<0.000000e+00> : vector<16x128xf32>
    %15 = tpu.matmul %12, %14, %cst_15 {dimension_numbers = #tpu.dot_dimension_numbers<[1], [0], [0], [1], [0, 0, 1, 1], [], []>} : vector<16x128xf32>, vector<128x128xf32>, vector<16x128xf32> -> vector<16x128xf32>
    %16 = arith.addf %9, %15 : vector<16x128xf32>
    %c1 = arith.constant 1 : index
    %c0_16 = arith.constant 0 : index
    %c0_17 = arith.constant 0 : index
    %17 = vector.load %arg4[%c1, %c0_16, %c0_17] : memref<27x16x128xf32, #tpu.memory_space<vmem>>, vector<1x16x128xf32>
    %18 = vector.shape_cast %17 : vector<1x16x128xf32> to vector<16x128xf32>
    %cst_18 = arith.constant dense<0.000000e+00> : vector<16x128xf32>
    %19 = tpu.matmul %18, %8, %cst_18 {dimension_numbers = #tpu.dot_dimension_numbers<[1], [0], [0], [1], [0, 0, 1, 1], [], []>} : vector<16x128xf32>, vector<128x128xf32>, vector<16x128xf32> -> vector<16x128xf32>
    %c1_19 = arith.constant 1 : index
    %c0_20 = arith.constant 0 : index
    %c0_21 = arith.constant 0 : index
    %20 = vector.load %arg5[%c1_19, %c0_20, %c0_21] : memref<27x128x128xf32, #tpu.memory_space<vmem>>, vector<1x128x128xf32>
    %21 = vector.shape_cast %20 : vector<1x128x128xf32> to vector<128x128xf32>
    %cst_22 = arith.constant dense<0.000000e+00> : vector<16x128xf32>
    %22 = tpu.matmul %19, %21, %cst_22 {dimension_numbers = #tpu.dot_dimension_numbers<[1], [0], [0], [1], [0, 0, 1, 1], [], []>} : vector<16x128xf32>, vector<128x128xf32>, vector<16x128xf32> -> vector<16x128xf32>
    %23 = arith.addf %16, %22 : vector<16x128xf32>
    %c2 = arith.constant 2 : index
    %c0_23 = arith.constant 0 : index
    %c0_24 = arith.constant 0 : index
    %24 = vector.load %arg4[%c2, %c0_23, %c0_24] : memref<27x16x128xf32, #tpu.memory_space<vmem>>, vector<1x16x128xf32>
    %25 = vector.shape_cast %24 : vector<1x16x128xf32> to vector<16x128xf32>
    %cst_25 = arith.constant dense<0.000000e+00> : vector<16x128xf32>
    %26 = tpu.matmul %25, %8, %cst_25 {dimension_numbers = #tpu.dot_dimension_numbers<[1], [0], [0], [1], [0, 0, 1, 1], [], []>} : vector<16x128xf32>, vector<128x128xf32>, vector<16x128xf32> -> vector<16x128xf32>
    %c2_26 = arith.constant 2 : index
    %c0_27 = arith.constant 0 : index
    %c0_28 = arith.constant 0 : index
    %27 = vector.load %arg5[%c2_26, %c0_27, %c0_28] : memref<27x128x128xf32, #tpu.memory_space<vmem>>, vector<1x128x128xf32>
    %28 = vector.shape_cast %27 : vector<1x128x128xf32> to vector<128x128xf32>
    %cst_29 = arith.constant dense<0.000000e+00> : vector<16x128xf32>
    %29 = tpu.matmul %26, %28, %cst_29 {dimension_numbers = #tpu.dot_dimension_numbers<[1], [0], [0], [1], [0, 0, 1, 1], [], []>} : vector<16x128xf32>, vector<128x128xf32>, vector<16x128xf32> -> vector<16x128xf32>
    %30 = arith.addf %23, %29 : vector<16x128xf32>
    %c3 = arith.constant 3 : index
    %c0_30 = arith.constant 0 : index
    %c0_31 = arith.constant 0 : index
    %31 = vector.load %arg4[%c3, %c0_30, %c0_31] : memref<27x16x128xf32, #tpu.memory_space<vmem>>, vector<1x16x128xf32>
    %32 = vector.shape_cast %31 : vector<1x16x128xf32> to vector<16x128xf32>
    %cst_32 = arith.constant dense<0.000000e+00> : vector<16x128xf32>
    %33 = tpu.matmul %32, %8, %cst_32 {dimension_numbers = #tpu.dot_dimension_numbers<[1], [0], [0], [1], [0, 0, 1, 1], [], []>} : vector<16x128xf32>, vector<128x128xf32>, vector<16x128xf32> -> vector<16x128xf32>
    %c3_33 = arith.constant 3 : index
    %c0_34 = arith.constant 0 : index
    %c0_35 = arith.constant 0 : index
    %34 = vector.load %arg5[%c3_33, %c0_34, %c0_35] : memref<27x128x128xf32, #tpu.memory_space<vmem>>, vector<1x128x128xf32>
    %35 = vector.shape_cast %34 : vector<1x128x128xf32> to vector<128x128xf32>
    %cst_36 = arith.constant dense<0.000000e+00> : vector<16x128xf32>
    %36 = tpu.matmul %33, %35, %cst_36 {dimension_numbers = #tpu.dot_dimension_numbers<[1], [0], [0], [1], [0, 0, 1, 1], [], []>} : vector<16x128xf32>, vector<128x128xf32>, vector<16x128xf32> -> vector<16x128xf32>
    %37 = arith.addf %30, %36 : vector<16x128xf32>
    %c4 = arith.constant 4 : index
    %c0_37 = arith.constant 0 : index
    %c0_38 = arith.constant 0 : index
    %38 = vector.load %arg4[%c4, %c0_37, %c0_38] : memref<27x16x128xf32, #tpu.memory_space<vmem>>, vector<1x16x128xf32>
    %39 = vector.shape_cast %38 : vector<1x16x128xf32> to vector<16x128xf32>
    %cst_39 = arith.constant dense<0.000000e+00> : vector<16x128xf32>
    %40 = tpu.matmul %39, %8, %cst_39 {dimension_numbers = #tpu.dot_dimension_numbers<[1], [0], [0], [1], [0, 0, 1, 1], [], []>} : vector<16x128xf32>, vector<128x128xf32>, vector<16x128xf32> -> vector<16x128xf32>
    %c4_40 = arith.constant 4 : index
    %c0_41 = arith.constant 0 : index
    %c0_42 = arith.constant 0 : index
    %41 = vector.load %arg5[%c4_40, %c0_41, %c0_42] : memref<27x128x128xf32, #tpu.memory_space<vmem>>, vector<1x128x128xf32>
    %42 = vector.shape_cast %41 : vector<1x128x128xf32> to vector<128x128xf32>
    %cst_43 = arith.constant dense<0.000000e+00> : vector<16x128xf32>
    %43 = tpu.matmul %40, %42, %cst_43 {dimension_numbers = #tpu.dot_dimension_numbers<[1], [0], [0], [1], [0, 0, 1, 1], [], []>} : vector<16x128xf32>, vector<128x128xf32>, vector<16x128xf32> -> vector<16x128xf32>
    %44 = arith.addf %37, %43 : vector<16x128xf32>
    %c5 = arith.constant 5 : index
    %c0_44 = arith.constant 0 : index
    %c0_45 = arith.constant 0 : index
    %45 = vector.load %arg4[%c5, %c0_44, %c0_45] : memref<27x16x128xf32, #tpu.memory_space<vmem>>, vector<1x16x128xf32>
    %46 = vector.shape_cast %45 : vector<1x16x128xf32> to vector<16x128xf32>
    %cst_46 = arith.constant dense<0.000000e+00> : vector<16x128xf32>
    %47 = tpu.matmul %46, %8, %cst_46 {dimension_numbers = #tpu.dot_dimension_numbers<[1], [0], [0], [1], [0, 0, 1, 1], [], []>} : vector<16x128xf32>, vector<128x128xf32>, vector<16x128xf32> -> vector<16x128xf32>
    %c5_47 = arith.constant 5 : index
    %c0_48 = arith.constant 0 : index
    %c0_49 = arith.constant 0 : index
    %48 = vector.load %arg5[%c5_47, %c0_48, %c0_49] : memref<27x128x128xf32, #tpu.memory_space<vmem>>, vector<1x128x128xf32>
    %49 = vector.shape_cast %48 : vector<1x128x128xf32> to vector<128x128xf32>
    %cst_50 = arith.constant dense<0.000000e+00> : vector<16x128xf32>
    %50 = tpu.matmul %47, %49, %cst_50 {dimension_numbers = #tpu.dot_dimension_numbers<[1], [0], [0], [1], [0, 0, 1, 1], [], []>} : vector<16x128xf32>, vector<128x128xf32>, vector<16x128xf32> -> vector<16x128xf32>
    %51 = arith.addf %44, %50 : vector<16x128xf32>
    %c6 = arith.constant 6 : index
    %c0_51 = arith.constant 0 : index
    %c0_52 = arith.constant 0 : index
    %52 = vector.load %arg4[%c6, %c0_51, %c0_52] : memref<27x16x128xf32, #tpu.memory_space<vmem>>, vector<1x16x128xf32>
    %53 = vector.shape_cast %52 : vector<1x16x128xf32> to vector<16x128xf32>
    %cst_53 = arith.constant dense<0.000000e+00> : vector<16x128xf32>
    %54 = tpu.matmul %53, %8, %cst_53 {dimension_numbers = #tpu.dot_dimension_numbers<[1], [0], [0], [1], [0, 0, 1, 1], [], []>} : vector<16x128xf32>, vector<128x128xf32>, vector<16x128xf32> -> vector<16x128xf32>
    %c6_54 = arith.constant 6 : index
    %c0_55 = arith.constant 0 : index
    %c0_56 = arith.constant 0 : index
    %55 = vector.load %arg5[%c6_54, %c0_55, %c0_56] : memref<27x128x128xf32, #tpu.memory_space<vmem>>, vector<1x128x128xf32>
    %56 = vector.shape_cast %55 : vector<1x128x128xf32> to vector<128x128xf32>
    %cst_57 = arith.constant dense<0.000000e+00> : vector<16x128xf32>
    %57 = tpu.matmul %54, %56, %cst_57 {dimension_numbers = #tpu.dot_dimension_numbers<[1], [0], [0], [1], [0, 0, 1, 1], [], []>} : vector<16x128xf32>, vector<128x128xf32>, vector<16x128xf32> -> vector<16x128xf32>
    %58 = arith.addf %51, %57 : vector<16x128xf32>
    %c7 = arith.constant 7 : index
    %c0_58 = arith.constant 0 : index
    %c0_59 = arith.constant 0 : index
    %59 = vector.load %arg4[%c7, %c0_58, %c0_59] : memref<27x16x128xf32, #tpu.memory_space<vmem>>, vector<1x16x128xf32>
    %60 = vector.shape_cast %59 : vector<1x16x128xf32> to vector<16x128xf32>
    %cst_60 = arith.constant dense<0.000000e+00> : vector<16x128xf32>
    %61 = tpu.matmul %60, %8, %cst_60 {dimension_numbers = #tpu.dot_dimension_numbers<[1], [0], [0], [1], [0, 0, 1, 1], [], []>} : vector<16x128xf32>, vector<128x128xf32>, vector<16x128xf32> -> vector<16x128xf32>
    %c7_61 = arith.constant 7 : index
    %c0_62 = arith.constant 0 : index
    %c0_63 = arith.constant 0 : index
    %62 = vector.load %arg5[%c7_61, %c0_62, %c0_63] : memref<27x128x128xf32, #tpu.memory_space<vmem>>, vector<1x128x128xf32>
    %63 = vector.shape_cast %62 : vector<1x128x128xf32> to vector<128x128xf32>
    %cst_64 = arith.constant dense<0.000000e+00> : vector<16x128xf32>
    %64 = tpu.matmul %61, %63, %cst_64 {dimension_numbers = #tpu.dot_dimension_numbers<[1], [0], [0], [1], [0, 0, 1, 1], [], []>} : vector<16x128xf32>, vector<128x128xf32>, vector<16x128xf32> -> vector<16x128xf32>
    %65 = arith.addf %58, %64 : vector<16x128xf32>
    %c8 = arith.constant 8 : index
    %c0_65 = arith.constant 0 : index
    %c0_66 = arith.constant 0 : index
    %66 = vector.load %arg4[%c8, %c0_65, %c0_66] : memref<27x16x128xf32, #tpu.memory_space<vmem>>, vector<1x16x128xf32>
    %67 = vector.shape_cast %66 : vector<1x16x128xf32> to vector<16x128xf32>
    %cst_67 = arith.constant dense<0.000000e+00> : vector<16x128xf32>
    %68 = tpu.matmul %67, %8, %cst_67 {dimension_numbers = #tpu.dot_dimension_numbers<[1], [0], [0], [1], [0, 0, 1, 1], [], []>} : vector<16x128xf32>, vector<128x128xf32>, vector<16x128xf32> -> vector<16x128xf32>
    %c8_68 = arith.constant 8 : index
    %c0_69 = arith.constant 0 : index
    %c0_70 = arith.constant 0 : index
    %69 = vector.load %arg5[%c8_68, %c0_69, %c0_70] : memref<27x128x128xf32, #tpu.memory_space<vmem>>, vector<1x128x128xf32>
    %70 = vector.shape_cast %69 : vector<1x128x128xf32> to vector<128x128xf32>
    %cst_71 = arith.constant dense<0.000000e+00> : vector<16x128xf32>
    %71 = tpu.matmul %68, %70, %cst_71 {dimension_numbers = #tpu.dot_dimension_numbers<[1], [0], [0], [1], [0, 0, 1, 1], [], []>} : vector<16x128xf32>, vector<128x128xf32>, vector<16x128xf32> -> vector<16x128xf32>
    %72 = arith.addf %65, %71 : vector<16x128xf32>
    %c9 = arith.constant 9 : index
    %c0_72 = arith.constant 0 : index
    %c0_73 = arith.constant 0 : index
    %73 = vector.load %arg4[%c9, %c0_72, %c0_73] : memref<27x16x128xf32, #tpu.memory_space<vmem>>, vector<1x16x128xf32>
    %74 = vector.shape_cast %73 : vector<1x16x128xf32> to vector<16x128xf32>
    %cst_74 = arith.constant dense<0.000000e+00> : vector<16x128xf32>
    %75 = tpu.matmul %74, %8, %cst_74 {dimension_numbers = #tpu.dot_dimension_numbers<[1], [0], [0], [1], [0, 0, 1, 1], [], []>} : vector<16x128xf32>, vector<128x128xf32>, vector<16x128xf32> -> vector<16x128xf32>
    %c9_75 = arith.constant 9 : index
    %c0_76 = arith.constant 0 : index
    %c0_77 = arith.constant 0 : index
    %76 = vector.load %arg5[%c9_75, %c0_76, %c0_77] : memref<27x128x128xf32, #tpu.memory_space<vmem>>, vector<1x128x128xf32>
    %77 = vector.shape_cast %76 : vector<1x128x128xf32> to vector<128x128xf32>
    %cst_78 = arith.constant dense<0.000000e+00> : vector<16x128xf32>
    %78 = tpu.matmul %75, %77, %cst_78 {dimension_numbers = #tpu.dot_dimension_numbers<[1], [0], [0], [1], [0, 0, 1, 1], [], []>} : vector<16x128xf32>, vector<128x128xf32>, vector<16x128xf32> -> vector<16x128xf32>
    %79 = arith.addf %72, %78 : vector<16x128xf32>
    %c10 = arith.constant 10 : index
    %c0_79 = arith.constant 0 : index
    %c0_80 = arith.constant 0 : index
    %80 = vector.load %arg4[%c10, %c0_79, %c0_80] : memref<27x16x128xf32, #tpu.memory_space<vmem>>, vector<1x16x128xf32>
    %81 = vector.shape_cast %80 : vector<1x16x128xf32> to vector<16x128xf32>
    %cst_81 = arith.constant dense<0.000000e+00> : vector<16x128xf32>
    %82 = tpu.matmul %81, %8, %cst_81 {dimension_numbers = #tpu.dot_dimension_numbers<[1], [0], [0], [1], [0, 0, 1, 1], [], []>} : vector<16x128xf32>, vector<128x128xf32>, vector<16x128xf32> -> vector<16x128xf32>
    %c10_82 = arith.constant 10 : index
    %c0_83 = arith.constant 0 : index
    %c0_84 = arith.constant 0 : index
    %83 = vector.load %arg5[%c10_82, %c0_83, %c0_84] : memref<27x128x128xf32, #tpu.memory_space<vmem>>, vector<1x128x128xf32>
    %84 = vector.shape_cast %83 : vector<1x128x128xf32> to vector<128x128xf32>
    %cst_85 = arith.constant dense<0.000000e+00> : vector<16x128xf32>
    %85 = tpu.matmul %82, %84, %cst_85 {dimension_numbers = #tpu.dot_dimension_numbers<[1], [0], [0], [1], [0, 0, 1, 1], [], []>} : vector<16x128xf32>, vector<128x128xf32>, vector<16x128xf32> -> vector<16x128xf32>
    %86 = arith.addf %79, %85 : vector<16x128xf32>
    %c11 = arith.constant 11 : index
    %c0_86 = arith.constant 0 : index
    %c0_87 = arith.constant 0 : index
    %87 = vector.load %arg4[%c11, %c0_86, %c0_87] : memref<27x16x128xf32, #tpu.memory_space<vmem>>, vector<1x16x128xf32>
    %88 = vector.shape_cast %87 : vector<1x16x128xf32> to vector<16x128xf32>
    %cst_88 = arith.constant dense<0.000000e+00> : vector<16x128xf32>
    %89 = tpu.matmul %88, %8, %cst_88 {dimension_numbers = #tpu.dot_dimension_numbers<[1], [0], [0], [1], [0, 0, 1, 1], [], []>} : vector<16x128xf32>, vector<128x128xf32>, vector<16x128xf32> -> vector<16x128xf32>
    %c11_89 = arith.constant 11 : index
    %c0_90 = arith.constant 0 : index
    %c0_91 = arith.constant 0 : index
    %90 = vector.load %arg5[%c11_89, %c0_90, %c0_91] : memref<27x128x128xf32, #tpu.memory_space<vmem>>, vector<1x128x128xf32>
    %91 = vector.shape_cast %90 : vector<1x128x128xf32> to vector<128x128xf32>
    %cst_92 = arith.constant dense<0.000000e+00> : vector<16x128xf32>
    %92 = tpu.matmul %89, %91, %cst_92 {dimension_numbers = #tpu.dot_dimension_numbers<[1], [0], [0], [1], [0, 0, 1, 1], [], []>} : vector<16x128xf32>, vector<128x128xf32>, vector<16x128xf32> -> vector<16x128xf32>
    %93 = arith.addf %86, %92 : vector<16x128xf32>
    %c12 = arith.constant 12 : index
    %c0_93 = arith.constant 0 : index
    %c0_94 = arith.constant 0 : index
    %94 = vector.load %arg4[%c12, %c0_93, %c0_94] : memref<27x16x128xf32, #tpu.memory_space<vmem>>, vector<1x16x128xf32>
    %95 = vector.shape_cast %94 : vector<1x16x128xf32> to vector<16x128xf32>
    %cst_95 = arith.constant dense<0.000000e+00> : vector<16x128xf32>
    %96 = tpu.matmul %95, %8, %cst_95 {dimension_numbers = #tpu.dot_dimension_numbers<[1], [0], [0], [1], [0, 0, 1, 1], [], []>} : vector<16x128xf32>, vector<128x128xf32>, vector<16x128xf32> -> vector<16x128xf32>
    %c12_96 = arith.constant 12 : index
    %c0_97 = arith.constant 0 : index
    %c0_98 = arith.constant 0 : index
    %97 = vector.load %arg5[%c12_96, %c0_97, %c0_98] : memref<27x128x128xf32, #tpu.memory_space<vmem>>, vector<1x128x128xf32>
    %98 = vector.shape_cast %97 : vector<1x128x128xf32> to vector<128x128xf32>
    %cst_99 = arith.constant dense<0.000000e+00> : vector<16x128xf32>
    %99 = tpu.matmul %96, %98, %cst_99 {dimension_numbers = #tpu.dot_dimension_numbers<[1], [0], [0], [1], [0, 0, 1, 1], [], []>} : vector<16x128xf32>, vector<128x128xf32>, vector<16x128xf32> -> vector<16x128xf32>
    %100 = arith.addf %93, %99 : vector<16x128xf32>
    %c13 = arith.constant 13 : index
    %c0_100 = arith.constant 0 : index
    %c0_101 = arith.constant 0 : index
    %101 = vector.load %arg4[%c13, %c0_100, %c0_101] : memref<27x16x128xf32, #tpu.memory_space<vmem>>, vector<1x16x128xf32>
    %102 = vector.shape_cast %101 : vector<1x16x128xf32> to vector<16x128xf32>
    %cst_102 = arith.constant dense<0.000000e+00> : vector<16x128xf32>
    %103 = tpu.matmul %102, %8, %cst_102 {dimension_numbers = #tpu.dot_dimension_numbers<[1], [0], [0], [1], [0, 0, 1, 1], [], []>} : vector<16x128xf32>, vector<128x128xf32>, vector<16x128xf32> -> vector<16x128xf32>
    %c13_103 = arith.constant 13 : index
    %c0_104 = arith.constant 0 : index
    %c0_105 = arith.constant 0 : index
    %104 = vector.load %arg5[%c13_103, %c0_104, %c0_105] : memref<27x128x128xf32, #tpu.memory_space<vmem>>, vector<1x128x128xf32>
    %105 = vector.shape_cast %104 : vector<1x128x128xf32> to vector<128x128xf32>
    %cst_106 = arith.constant dense<0.000000e+00> : vector<16x128xf32>
    %106 = tpu.matmul %103, %105, %cst_106 {dimension_numbers = #tpu.dot_dimension_numbers<[1], [0], [0], [1], [0, 0, 1, 1], [], []>} : vector<16x128xf32>, vector<128x128xf32>, vector<16x128xf32> -> vector<16x128xf32>
    %107 = arith.addf %100, %106 : vector<16x128xf32>
    %c14 = arith.constant 14 : index
    %c0_107 = arith.constant 0 : index
    %c0_108 = arith.constant 0 : index
    %108 = vector.load %arg4[%c14, %c0_107, %c0_108] : memref<27x16x128xf32, #tpu.memory_space<vmem>>, vector<1x16x128xf32>
    %109 = vector.shape_cast %108 : vector<1x16x128xf32> to vector<16x128xf32>
    %cst_109 = arith.constant dense<0.000000e+00> : vector<16x128xf32>
    %110 = tpu.matmul %109, %8, %cst_109 {dimension_numbers = #tpu.dot_dimension_numbers<[1], [0], [0], [1], [0, 0, 1, 1], [], []>} : vector<16x128xf32>, vector<128x128xf32>, vector<16x128xf32> -> vector<16x128xf32>
    %c14_110 = arith.constant 14 : index
    %c0_111 = arith.constant 0 : index
    %c0_112 = arith.constant 0 : index
    %111 = vector.load %arg5[%c14_110, %c0_111, %c0_112] : memref<27x128x128xf32, #tpu.memory_space<vmem>>, vector<1x128x128xf32>
    %112 = vector.shape_cast %111 : vector<1x128x128xf32> to vector<128x128xf32>
    %cst_113 = arith.constant dense<0.000000e+00> : vector<16x128xf32>
    %113 = tpu.matmul %110, %112, %cst_113 {dimension_numbers = #tpu.dot_dimension_numbers<[1], [0], [0], [1], [0, 0, 1, 1], [], []>} : vector<16x128xf32>, vector<128x128xf32>, vector<16x128xf32> -> vector<16x128xf32>
    %114 = arith.addf %107, %113 : vector<16x128xf32>
    %c15 = arith.constant 15 : index
    %c0_114 = arith.constant 0 : index
    %c0_115 = arith.constant 0 : index
    %115 = vector.load %arg4[%c15, %c0_114, %c0_115] : memref<27x16x128xf32, #tpu.memory_space<vmem>>, vector<1x16x128xf32>
    %116 = vector.shape_cast %115 : vector<1x16x128xf32> to vector<16x128xf32>
    %cst_116 = arith.constant dense<0.000000e+00> : vector<16x128xf32>
    %117 = tpu.matmul %116, %8, %cst_116 {dimension_numbers = #tpu.dot_dimension_numbers<[1], [0], [0], [1], [0, 0, 1, 1], [], []>} : vector<16x128xf32>, vector<128x128xf32>, vector<16x128xf32> -> vector<16x128xf32>
    %c15_117 = arith.constant 15 : index
    %c0_118 = arith.constant 0 : index
    %c0_119 = arith.constant 0 : index
    %118 = vector.load %arg5[%c15_117, %c0_118, %c0_119] : memref<27x128x128xf32, #tpu.memory_space<vmem>>, vector<1x128x128xf32>
    %119 = vector.shape_cast %118 : vector<1x128x128xf32> to vector<128x128xf32>
    %cst_120 = arith.constant dense<0.000000e+00> : vector<16x128xf32>
    %120 = tpu.matmul %117, %119, %cst_120 {dimension_numbers = #tpu.dot_dimension_numbers<[1], [0], [0], [1], [0, 0, 1, 1], [], []>} : vector<16x128xf32>, vector<128x128xf32>, vector<16x128xf32> -> vector<16x128xf32>
    %121 = arith.addf %114, %120 : vector<16x128xf32>
    %c16 = arith.constant 16 : index
    %c0_121 = arith.constant 0 : index
    %c0_122 = arith.constant 0 : index
    %122 = vector.load %arg4[%c16, %c0_121, %c0_122] : memref<27x16x128xf32, #tpu.memory_space<vmem>>, vector<1x16x128xf32>
    %123 = vector.shape_cast %122 : vector<1x16x128xf32> to vector<16x128xf32>
    %cst_123 = arith.constant dense<0.000000e+00> : vector<16x128xf32>
    %124 = tpu.matmul %123, %8, %cst_123 {dimension_numbers = #tpu.dot_dimension_numbers<[1], [0], [0], [1], [0, 0, 1, 1], [], []>} : vector<16x128xf32>, vector<128x128xf32>, vector<16x128xf32> -> vector<16x128xf32>
    %c16_124 = arith.constant 16 : index
    %c0_125 = arith.constant 0 : index
    %c0_126 = arith.constant 0 : index
    %125 = vector.load %arg5[%c16_124, %c0_125, %c0_126] : memref<27x128x128xf32, #tpu.memory_space<vmem>>, vector<1x128x128xf32>
    %126 = vector.shape_cast %125 : vector<1x128x128xf32> to vector<128x128xf32>
    %cst_127 = arith.constant dense<0.000000e+00> : vector<16x128xf32>
    %127 = tpu.matmul %124, %126, %cst_127 {dimension_numbers = #tpu.dot_dimension_numbers<[1], [0], [0], [1], [0, 0, 1, 1], [], []>} : vector<16x128xf32>, vector<128x128xf32>, vector<16x128xf32> -> vector<16x128xf32>
    %128 = arith.addf %121, %127 : vector<16x128xf32>
    %c17 = arith.constant 17 : index
    %c0_128 = arith.constant 0 : index
    %c0_129 = arith.constant 0 : index
    %129 = vector.load %arg4[%c17, %c0_128, %c0_129] : memref<27x16x128xf32, #tpu.memory_space<vmem>>, vector<1x16x128xf32>
    %130 = vector.shape_cast %129 : vector<1x16x128xf32> to vector<16x128xf32>
    %cst_130 = arith.constant dense<0.000000e+00> : vector<16x128xf32>
    %131 = tpu.matmul %130, %8, %cst_130 {dimension_numbers = #tpu.dot_dimension_numbers<[1], [0], [0], [1], [0, 0, 1, 1], [], []>} : vector<16x128xf32>, vector<128x128xf32>, vector<16x128xf32> -> vector<16x128xf32>
    %c17_131 = arith.constant 17 : index
    %c0_132 = arith.constant 0 : index
    %c0_133 = arith.constant 0 : index
    %132 = vector.load %arg5[%c17_131, %c0_132, %c0_133] : memref<27x128x128xf32, #tpu.memory_space<vmem>>, vector<1x128x128xf32>
    %133 = vector.shape_cast %132 : vector<1x128x128xf32> to vector<128x128xf32>
    %cst_134 = arith.constant dense<0.000000e+00> : vector<16x128xf32>
    %134 = tpu.matmul %131, %133, %cst_134 {dimension_numbers = #tpu.dot_dimension_numbers<[1], [0], [0], [1], [0, 0, 1, 1], [], []>} : vector<16x128xf32>, vector<128x128xf32>, vector<16x128xf32> -> vector<16x128xf32>
    %135 = arith.addf %128, %134 : vector<16x128xf32>
    %c18 = arith.constant 18 : index
    %c0_135 = arith.constant 0 : index
    %c0_136 = arith.constant 0 : index
    %136 = vector.load %arg4[%c18, %c0_135, %c0_136] : memref<27x16x128xf32, #tpu.memory_space<vmem>>, vector<1x16x128xf32>
    %137 = vector.shape_cast %136 : vector<1x16x128xf32> to vector<16x128xf32>
    %cst_137 = arith.constant dense<0.000000e+00> : vector<16x128xf32>
    %138 = tpu.matmul %137, %8, %cst_137 {dimension_numbers = #tpu.dot_dimension_numbers<[1], [0], [0], [1], [0, 0, 1, 1], [], []>} : vector<16x128xf32>, vector<128x128xf32>, vector<16x128xf32> -> vector<16x128xf32>
    %c18_138 = arith.constant 18 : index
    %c0_139 = arith.constant 0 : index
    %c0_140 = arith.constant 0 : index
    %139 = vector.load %arg5[%c18_138, %c0_139, %c0_140] : memref<27x128x128xf32, #tpu.memory_space<vmem>>, vector<1x128x128xf32>
    %140 = vector.shape_cast %139 : vector<1x128x128xf32> to vector<128x128xf32>
    %cst_141 = arith.constant dense<0.000000e+00> : vector<16x128xf32>
    %141 = tpu.matmul %138, %140, %cst_141 {dimension_numbers = #tpu.dot_dimension_numbers<[1], [0], [0], [1], [0, 0, 1, 1], [], []>} : vector<16x128xf32>, vector<128x128xf32>, vector<16x128xf32> -> vector<16x128xf32>
    %142 = arith.addf %135, %141 : vector<16x128xf32>
    %c19 = arith.constant 19 : index
    %c0_142 = arith.constant 0 : index
    %c0_143 = arith.constant 0 : index
    %143 = vector.load %arg4[%c19, %c0_142, %c0_143] : memref<27x16x128xf32, #tpu.memory_space<vmem>>, vector<1x16x128xf32>
    %144 = vector.shape_cast %143 : vector<1x16x128xf32> to vector<16x128xf32>
    %cst_144 = arith.constant dense<0.000000e+00> : vector<16x128xf32>
    %145 = tpu.matmul %144, %8, %cst_144 {dimension_numbers = #tpu.dot_dimension_numbers<[1], [0], [0], [1], [0, 0, 1, 1], [], []>} : vector<16x128xf32>, vector<128x128xf32>, vector<16x128xf32> -> vector<16x128xf32>
    %c19_145 = arith.constant 19 : index
    %c0_146 = arith.constant 0 : index
    %c0_147 = arith.constant 0 : index
    %146 = vector.load %arg5[%c19_145, %c0_146, %c0_147] : memref<27x128x128xf32, #tpu.memory_space<vmem>>, vector<1x128x128xf32>
    %147 = vector.shape_cast %146 : vector<1x128x128xf32> to vector<128x128xf32>
    %cst_148 = arith.constant dense<0.000000e+00> : vector<16x128xf32>
    %148 = tpu.matmul %145, %147, %cst_148 {dimension_numbers = #tpu.dot_dimension_numbers<[1], [0], [0], [1], [0, 0, 1, 1], [], []>} : vector<16x128xf32>, vector<128x128xf32>, vector<16x128xf32> -> vector<16x128xf32>
    %149 = arith.addf %142, %148 : vector<16x128xf32>
    %c20 = arith.constant 20 : index
    %c0_149 = arith.constant 0 : index
    %c0_150 = arith.constant 0 : index
    %150 = vector.load %arg4[%c20, %c0_149, %c0_150] : memref<27x16x128xf32, #tpu.memory_space<vmem>>, vector<1x16x128xf32>
    %151 = vector.shape_cast %150 : vector<1x16x128xf32> to vector<16x128xf32>
    %cst_151 = arith.constant dense<0.000000e+00> : vector<16x128xf32>
    %152 = tpu.matmul %151, %8, %cst_151 {dimension_numbers = #tpu.dot_dimension_numbers<[1], [0], [0], [1], [0, 0, 1, 1], [], []>} : vector<16x128xf32>, vector<128x128xf32>, vector<16x128xf32> -> vector<16x128xf32>
    %c20_152 = arith.constant 20 : index
    %c0_153 = arith.constant 0 : index
    %c0_154 = arith.constant 0 : index
    %153 = vector.load %arg5[%c20_152, %c0_153, %c0_154] : memref<27x128x128xf32, #tpu.memory_space<vmem>>, vector<1x128x128xf32>
    %154 = vector.shape_cast %153 : vector<1x128x128xf32> to vector<128x128xf32>
    %cst_155 = arith.constant dense<0.000000e+00> : vector<16x128xf32>
    %155 = tpu.matmul %152, %154, %cst_155 {dimension_numbers = #tpu.dot_dimension_numbers<[1], [0], [0], [1], [0, 0, 1, 1], [], []>} : vector<16x128xf32>, vector<128x128xf32>, vector<16x128xf32> -> vector<16x128xf32>
    %156 = arith.addf %149, %155 : vector<16x128xf32>
    %c21 = arith.constant 21 : index
    %c0_156 = arith.constant 0 : index
    %c0_157 = arith.constant 0 : index
    %157 = vector.load %arg4[%c21, %c0_156, %c0_157] : memref<27x16x128xf32, #tpu.memory_space<vmem>>, vector<1x16x128xf32>
    %158 = vector.shape_cast %157 : vector<1x16x128xf32> to vector<16x128xf32>
    %cst_158 = arith.constant dense<0.000000e+00> : vector<16x128xf32>
    %159 = tpu.matmul %158, %8, %cst_158 {dimension_numbers = #tpu.dot_dimension_numbers<[1], [0], [0], [1], [0, 0, 1, 1], [], []>} : vector<16x128xf32>, vector<128x128xf32>, vector<16x128xf32> -> vector<16x128xf32>
    %c21_159 = arith.constant 21 : index
    %c0_160 = arith.constant 0 : index
    %c0_161 = arith.constant 0 : index
    %160 = vector.load %arg5[%c21_159, %c0_160, %c0_161] : memref<27x128x128xf32, #tpu.memory_space<vmem>>, vector<1x128x128xf32>
    %161 = vector.shape_cast %160 : vector<1x128x128xf32> to vector<128x128xf32>
    %cst_162 = arith.constant dense<0.000000e+00> : vector<16x128xf32>
    %162 = tpu.matmul %159, %161, %cst_162 {dimension_numbers = #tpu.dot_dimension_numbers<[1], [0], [0], [1], [0, 0, 1, 1], [], []>} : vector<16x128xf32>, vector<128x128xf32>, vector<16x128xf32> -> vector<16x128xf32>
    %163 = arith.addf %156, %162 : vector<16x128xf32>
    %c22 = arith.constant 22 : index
    %c0_163 = arith.constant 0 : index
    %c0_164 = arith.constant 0 : index
    %164 = vector.load %arg4[%c22, %c0_163, %c0_164] : memref<27x16x128xf32, #tpu.memory_space<vmem>>, vector<1x16x128xf32>
    %165 = vector.shape_cast %164 : vector<1x16x128xf32> to vector<16x128xf32>
    %cst_165 = arith.constant dense<0.000000e+00> : vector<16x128xf32>
    %166 = tpu.matmul %165, %8, %cst_165 {dimension_numbers = #tpu.dot_dimension_numbers<[1], [0], [0], [1], [0, 0, 1, 1], [], []>} : vector<16x128xf32>, vector<128x128xf32>, vector<16x128xf32> -> vector<16x128xf32>
    %c22_166 = arith.constant 22 : index
    %c0_167 = arith.constant 0 : index
    %c0_168 = arith.constant 0 : index
    %167 = vector.load %arg5[%c22_166, %c0_167, %c0_168] : memref<27x128x128xf32, #tpu.memory_space<vmem>>, vector<1x128x128xf32>
    %168 = vector.shape_cast %167 : vector<1x128x128xf32> to vector<128x128xf32>
    %cst_169 = arith.constant dense<0.000000e+00> : vector<16x128xf32>
    %169 = tpu.matmul %166, %168, %cst_169 {dimension_numbers = #tpu.dot_dimension_numbers<[1], [0], [0], [1], [0, 0, 1, 1], [], []>} : vector<16x128xf32>, vector<128x128xf32>, vector<16x128xf32> -> vector<16x128xf32>
    %170 = arith.addf %163, %169 : vector<16x128xf32>
    %c23 = arith.constant 23 : index
    %c0_170 = arith.constant 0 : index
    %c0_171 = arith.constant 0 : index
    %171 = vector.load %arg4[%c23, %c0_170, %c0_171] : memref<27x16x128xf32, #tpu.memory_space<vmem>>, vector<1x16x128xf32>
    %172 = vector.shape_cast %171 : vector<1x16x128xf32> to vector<16x128xf32>
    %cst_172 = arith.constant dense<0.000000e+00> : vector<16x128xf32>
    %173 = tpu.matmul %172, %8, %cst_172 {dimension_numbers = #tpu.dot_dimension_numbers<[1], [0], [0], [1], [0, 0, 1, 1], [], []>} : vector<16x128xf32>, vector<128x128xf32>, vector<16x128xf32> -> vector<16x128xf32>
    %c23_173 = arith.constant 23 : index
    %c0_174 = arith.constant 0 : index
    %c0_175 = arith.constant 0 : index
    %174 = vector.load %arg5[%c23_173, %c0_174, %c0_175] : memref<27x128x128xf32, #tpu.memory_space<vmem>>, vector<1x128x128xf32>
    %175 = vector.shape_cast %174 : vector<1x128x128xf32> to vector<128x128xf32>
    %cst_176 = arith.constant dense<0.000000e+00> : vector<16x128xf32>
    %176 = tpu.matmul %173, %175, %cst_176 {dimension_numbers = #tpu.dot_dimension_numbers<[1], [0], [0], [1], [0, 0, 1, 1], [], []>} : vector<16x128xf32>, vector<128x128xf32>, vector<16x128xf32> -> vector<16x128xf32>
    %177 = arith.addf %170, %176 : vector<16x128xf32>
    %c24 = arith.constant 24 : index
    %c0_177 = arith.constant 0 : index
    %c0_178 = arith.constant 0 : index
    %178 = vector.load %arg4[%c24, %c0_177, %c0_178] : memref<27x16x128xf32, #tpu.memory_space<vmem>>, vector<1x16x128xf32>
    %179 = vector.shape_cast %178 : vector<1x16x128xf32> to vector<16x128xf32>
    %cst_179 = arith.constant dense<0.000000e+00> : vector<16x128xf32>
    %180 = tpu.matmul %179, %8, %cst_179 {dimension_numbers = #tpu.dot_dimension_numbers<[1], [0], [0], [1], [0, 0, 1, 1], [], []>} : vector<16x128xf32>, vector<128x128xf32>, vector<16x128xf32> -> vector<16x128xf32>
    %c24_180 = arith.constant 24 : index
    %c0_181 = arith.constant 0 : index
    %c0_182 = arith.constant 0 : index
    %181 = vector.load %arg5[%c24_180, %c0_181, %c0_182] : memref<27x128x128xf32, #tpu.memory_space<vmem>>, vector<1x128x128xf32>
    %182 = vector.shape_cast %181 : vector<1x128x128xf32> to vector<128x128xf32>
    %cst_183 = arith.constant dense<0.000000e+00> : vector<16x128xf32>
    %183 = tpu.matmul %180, %182, %cst_183 {dimension_numbers = #tpu.dot_dimension_numbers<[1], [0], [0], [1], [0, 0, 1, 1], [], []>} : vector<16x128xf32>, vector<128x128xf32>, vector<16x128xf32> -> vector<16x128xf32>
    %184 = arith.addf %177, %183 : vector<16x128xf32>
    %c25 = arith.constant 25 : index
    %c0_184 = arith.constant 0 : index
    %c0_185 = arith.constant 0 : index
    %185 = vector.load %arg4[%c25, %c0_184, %c0_185] : memref<27x16x128xf32, #tpu.memory_space<vmem>>, vector<1x16x128xf32>
    %186 = vector.shape_cast %185 : vector<1x16x128xf32> to vector<16x128xf32>
    %cst_186 = arith.constant dense<0.000000e+00> : vector<16x128xf32>
    %187 = tpu.matmul %186, %8, %cst_186 {dimension_numbers = #tpu.dot_dimension_numbers<[1], [0], [0], [1], [0, 0, 1, 1], [], []>} : vector<16x128xf32>, vector<128x128xf32>, vector<16x128xf32> -> vector<16x128xf32>
    %c25_187 = arith.constant 25 : index
    %c0_188 = arith.constant 0 : index
    %c0_189 = arith.constant 0 : index
    %188 = vector.load %arg5[%c25_187, %c0_188, %c0_189] : memref<27x128x128xf32, #tpu.memory_space<vmem>>, vector<1x128x128xf32>
    %189 = vector.shape_cast %188 : vector<1x128x128xf32> to vector<128x128xf32>
    %cst_190 = arith.constant dense<0.000000e+00> : vector<16x128xf32>
    %190 = tpu.matmul %187, %189, %cst_190 {dimension_numbers = #tpu.dot_dimension_numbers<[1], [0], [0], [1], [0, 0, 1, 1], [], []>} : vector<16x128xf32>, vector<128x128xf32>, vector<16x128xf32> -> vector<16x128xf32>
    %191 = arith.addf %184, %190 : vector<16x128xf32>
    %c26 = arith.constant 26 : index
    %c0_191 = arith.constant 0 : index
    %c0_192 = arith.constant 0 : index
    %192 = vector.load %arg4[%c26, %c0_191, %c0_192] : memref<27x16x128xf32, #tpu.memory_space<vmem>>, vector<1x16x128xf32>
    %193 = vector.shape_cast %192 : vector<1x16x128xf32> to vector<16x128xf32>
    %cst_193 = arith.constant dense<0.000000e+00> : vector<16x128xf32>
    %194 = tpu.matmul %193, %8, %cst_193 {dimension_numbers = #tpu.dot_dimension_numbers<[1], [0], [0], [1], [0, 0, 1, 1], [], []>} : vector<16x128xf32>, vector<128x128xf32>, vector<16x128xf32> -> vector<16x128xf32>
    %c26_194 = arith.constant 26 : index
    %c0_195 = arith.constant 0 : index
    %c0_196 = arith.constant 0 : index
    %195 = vector.load %arg5[%c26_194, %c0_195, %c0_196] : memref<27x128x128xf32, #tpu.memory_space<vmem>>, vector<1x128x128xf32>
    %196 = vector.shape_cast %195 : vector<1x128x128xf32> to vector<128x128xf32>
    %cst_197 = arith.constant dense<0.000000e+00> : vector<16x128xf32>
    %197 = tpu.matmul %194, %196, %cst_197 {dimension_numbers = #tpu.dot_dimension_numbers<[1], [0], [0], [1], [0, 0, 1, 1], [], []>} : vector<16x128xf32>, vector<128x128xf32>, vector<16x128xf32> -> vector<16x128xf32>
    %198 = arith.addf %191, %197 : vector<16x128xf32>
    %c0_198 = arith.constant 0 : index
    %c0_199 = arith.constant 0 : index
    %199 = vector.load %arg6[%c0_198, %c0_199] : memref<1x128xf32, #tpu.memory_space<vmem>>, vector<1x128xf32>
    %200 = vector.broadcast %199 : vector<1x128xf32> to vector<16x128xf32>
    %201 = arith.addf %198, %200 : vector<16x128xf32>
    %cst_200 = arith.constant 0.000000e+00 : f32
    %202 = vector.broadcast %cst_200 : f32 to vector<16x128xf32>
    %203 = arith.maximumf %201, %202 : vector<16x128xf32>
    %c0_201 = arith.constant 0 : index
    %c0_202 = arith.constant 0 : index
    %204 = vector.load %arg8[%c0_201, %c0_202] : memref<1x128xf32, #tpu.memory_space<vmem>>, vector<1x128xf32>
    %205 = vector.extract_strided_slice %203 {offsets = [0, 0], sizes = [1, 128], strides = [1, 1]} : vector<16x128xf32> to vector<1x128xf32>
    %c0_203 = arith.constant 0 : index
    %c0_204 = arith.constant 0 : index
    %c0_205 = arith.constant 0 : index
    %206 = vector.load %arg7[%c0_203, %c0_204, %c0_205] : memref<16x128x128xf32, #tpu.memory_space<vmem>>, vector<1x128x128xf32>
    %207 = vector.shape_cast %206 : vector<1x128x128xf32> to vector<128x128xf32>
    %cst_206 = arith.constant dense<0.000000e+00> : vector<1x128xf32>
    %208 = tpu.matmul %205, %207, %cst_206 {dimension_numbers = #tpu.dot_dimension_numbers<[1], [0], [0], [1], [0, 0, 1, 1], [], []>} : vector<1x128xf32>, vector<128x128xf32>, vector<1x128xf32> -> vector<1x128xf32>
    %209 = arith.addf %204, %208 : vector<1x128xf32>
    %210 = vector.extract_strided_slice %203 {offsets = [1, 0], sizes = [1, 128], strides = [1, 1]} : vector<16x128xf32> to vector<1x128xf32>
    %c1_207 = arith.constant 1 : index
    %c0_208 = arith.constant 0 : index
    %c0_209 = arith.constant 0 : index
    %211 = vector.load %arg7[%c1_207, %c0_208, %c0_209] : memref<16x128x128xf32, #tpu.memory_space<vmem>>, vector<1x128x128xf32>
    %212 = vector.shape_cast %211 : vector<1x128x128xf32> to vector<128x128xf32>
    %cst_210 = arith.constant dense<0.000000e+00> : vector<1x128xf32>
    %213 = tpu.matmul %210, %212, %cst_210 {dimension_numbers = #tpu.dot_dimension_numbers<[1], [0], [0], [1], [0, 0, 1, 1], [], []>} : vector<1x128xf32>, vector<128x128xf32>, vector<1x128xf32> -> vector<1x128xf32>
    %214 = arith.addf %209, %213 : vector<1x128xf32>
    %215 = vector.extract_strided_slice %203 {offsets = [2, 0], sizes = [1, 128], strides = [1, 1]} : vector<16x128xf32> to vector<1x128xf32>
    %c2_211 = arith.constant 2 : index
    %c0_212 = arith.constant 0 : index
    %c0_213 = arith.constant 0 : index
    %216 = vector.load %arg7[%c2_211, %c0_212, %c0_213] : memref<16x128x128xf32, #tpu.memory_space<vmem>>, vector<1x128x128xf32>
    %217 = vector.shape_cast %216 : vector<1x128x128xf32> to vector<128x128xf32>
    %cst_214 = arith.constant dense<0.000000e+00> : vector<1x128xf32>
    %218 = tpu.matmul %215, %217, %cst_214 {dimension_numbers = #tpu.dot_dimension_numbers<[1], [0], [0], [1], [0, 0, 1, 1], [], []>} : vector<1x128xf32>, vector<128x128xf32>, vector<1x128xf32> -> vector<1x128xf32>
    %219 = arith.addf %214, %218 : vector<1x128xf32>
    %220 = vector.extract_strided_slice %203 {offsets = [3, 0], sizes = [1, 128], strides = [1, 1]} : vector<16x128xf32> to vector<1x128xf32>
    %c3_215 = arith.constant 3 : index
    %c0_216 = arith.constant 0 : index
    %c0_217 = arith.constant 0 : index
    %221 = vector.load %arg7[%c3_215, %c0_216, %c0_217] : memref<16x128x128xf32, #tpu.memory_space<vmem>>, vector<1x128x128xf32>
    %222 = vector.shape_cast %221 : vector<1x128x128xf32> to vector<128x128xf32>
    %cst_218 = arith.constant dense<0.000000e+00> : vector<1x128xf32>
    %223 = tpu.matmul %220, %222, %cst_218 {dimension_numbers = #tpu.dot_dimension_numbers<[1], [0], [0], [1], [0, 0, 1, 1], [], []>} : vector<1x128xf32>, vector<128x128xf32>, vector<1x128xf32> -> vector<1x128xf32>
    %224 = arith.addf %219, %223 : vector<1x128xf32>
    %225 = vector.extract_strided_slice %203 {offsets = [4, 0], sizes = [1, 128], strides = [1, 1]} : vector<16x128xf32> to vector<1x128xf32>
    %c4_219 = arith.constant 4 : index
    %c0_220 = arith.constant 0 : index
    %c0_221 = arith.constant 0 : index
    %226 = vector.load %arg7[%c4_219, %c0_220, %c0_221] : memref<16x128x128xf32, #tpu.memory_space<vmem>>, vector<1x128x128xf32>
    %227 = vector.shape_cast %226 : vector<1x128x128xf32> to vector<128x128xf32>
    %cst_222 = arith.constant dense<0.000000e+00> : vector<1x128xf32>
    %228 = tpu.matmul %225, %227, %cst_222 {dimension_numbers = #tpu.dot_dimension_numbers<[1], [0], [0], [1], [0, 0, 1, 1], [], []>} : vector<1x128xf32>, vector<128x128xf32>, vector<1x128xf32> -> vector<1x128xf32>
    %229 = arith.addf %224, %228 : vector<1x128xf32>
    %230 = vector.extract_strided_slice %203 {offsets = [5, 0], sizes = [1, 128], strides = [1, 1]} : vector<16x128xf32> to vector<1x128xf32>
    %c5_223 = arith.constant 5 : index
    %c0_224 = arith.constant 0 : index
    %c0_225 = arith.constant 0 : index
    %231 = vector.load %arg7[%c5_223, %c0_224, %c0_225] : memref<16x128x128xf32, #tpu.memory_space<vmem>>, vector<1x128x128xf32>
    %232 = vector.shape_cast %231 : vector<1x128x128xf32> to vector<128x128xf32>
    %cst_226 = arith.constant dense<0.000000e+00> : vector<1x128xf32>
    %233 = tpu.matmul %230, %232, %cst_226 {dimension_numbers = #tpu.dot_dimension_numbers<[1], [0], [0], [1], [0, 0, 1, 1], [], []>} : vector<1x128xf32>, vector<128x128xf32>, vector<1x128xf32> -> vector<1x128xf32>
    %234 = arith.addf %229, %233 : vector<1x128xf32>
    %235 = vector.extract_strided_slice %203 {offsets = [6, 0], sizes = [1, 128], strides = [1, 1]} : vector<16x128xf32> to vector<1x128xf32>
    %c6_227 = arith.constant 6 : index
    %c0_228 = arith.constant 0 : index
    %c0_229 = arith.constant 0 : index
    %236 = vector.load %arg7[%c6_227, %c0_228, %c0_229] : memref<16x128x128xf32, #tpu.memory_space<vmem>>, vector<1x128x128xf32>
    %237 = vector.shape_cast %236 : vector<1x128x128xf32> to vector<128x128xf32>
    %cst_230 = arith.constant dense<0.000000e+00> : vector<1x128xf32>
    %238 = tpu.matmul %235, %237, %cst_230 {dimension_numbers = #tpu.dot_dimension_numbers<[1], [0], [0], [1], [0, 0, 1, 1], [], []>} : vector<1x128xf32>, vector<128x128xf32>, vector<1x128xf32> -> vector<1x128xf32>
    %239 = arith.addf %234, %238 : vector<1x128xf32>
    %240 = vector.extract_strided_slice %203 {offsets = [7, 0], sizes = [1, 128], strides = [1, 1]} : vector<16x128xf32> to vector<1x128xf32>
    %c7_231 = arith.constant 7 : index
    %c0_232 = arith.constant 0 : index
    %c0_233 = arith.constant 0 : index
    %241 = vector.load %arg7[%c7_231, %c0_232, %c0_233] : memref<16x128x128xf32, #tpu.memory_space<vmem>>, vector<1x128x128xf32>
    %242 = vector.shape_cast %241 : vector<1x128x128xf32> to vector<128x128xf32>
    %cst_234 = arith.constant dense<0.000000e+00> : vector<1x128xf32>
    %243 = tpu.matmul %240, %242, %cst_234 {dimension_numbers = #tpu.dot_dimension_numbers<[1], [0], [0], [1], [0, 0, 1, 1], [], []>} : vector<1x128xf32>, vector<128x128xf32>, vector<1x128xf32> -> vector<1x128xf32>
    %244 = arith.addf %239, %243 : vector<1x128xf32>
    %245 = vector.extract_strided_slice %203 {offsets = [8, 0], sizes = [1, 128], strides = [1, 1]} : vector<16x128xf32> to vector<1x128xf32>
    %c8_235 = arith.constant 8 : index
    %c0_236 = arith.constant 0 : index
    %c0_237 = arith.constant 0 : index
    %246 = vector.load %arg7[%c8_235, %c0_236, %c0_237] : memref<16x128x128xf32, #tpu.memory_space<vmem>>, vector<1x128x128xf32>
    %247 = vector.shape_cast %246 : vector<1x128x128xf32> to vector<128x128xf32>
    %cst_238 = arith.constant dense<0.000000e+00> : vector<1x128xf32>
    %248 = tpu.matmul %245, %247, %cst_238 {dimension_numbers = #tpu.dot_dimension_numbers<[1], [0], [0], [1], [0, 0, 1, 1], [], []>} : vector<1x128xf32>, vector<128x128xf32>, vector<1x128xf32> -> vector<1x128xf32>
    %249 = arith.addf %244, %248 : vector<1x128xf32>
    %250 = vector.extract_strided_slice %203 {offsets = [9, 0], sizes = [1, 128], strides = [1, 1]} : vector<16x128xf32> to vector<1x128xf32>
    %c9_239 = arith.constant 9 : index
    %c0_240 = arith.constant 0 : index
    %c0_241 = arith.constant 0 : index
    %251 = vector.load %arg7[%c9_239, %c0_240, %c0_241] : memref<16x128x128xf32, #tpu.memory_space<vmem>>, vector<1x128x128xf32>
    %252 = vector.shape_cast %251 : vector<1x128x128xf32> to vector<128x128xf32>
    %cst_242 = arith.constant dense<0.000000e+00> : vector<1x128xf32>
    %253 = tpu.matmul %250, %252, %cst_242 {dimension_numbers = #tpu.dot_dimension_numbers<[1], [0], [0], [1], [0, 0, 1, 1], [], []>} : vector<1x128xf32>, vector<128x128xf32>, vector<1x128xf32> -> vector<1x128xf32>
    %254 = arith.addf %249, %253 : vector<1x128xf32>
    %255 = vector.extract_strided_slice %203 {offsets = [10, 0], sizes = [1, 128], strides = [1, 1]} : vector<16x128xf32> to vector<1x128xf32>
    %c10_243 = arith.constant 10 : index
    %c0_244 = arith.constant 0 : index
    %c0_245 = arith.constant 0 : index
    %256 = vector.load %arg7[%c10_243, %c0_244, %c0_245] : memref<16x128x128xf32, #tpu.memory_space<vmem>>, vector<1x128x128xf32>
    %257 = vector.shape_cast %256 : vector<1x128x128xf32> to vector<128x128xf32>
    %cst_246 = arith.constant dense<0.000000e+00> : vector<1x128xf32>
    %258 = tpu.matmul %255, %257, %cst_246 {dimension_numbers = #tpu.dot_dimension_numbers<[1], [0], [0], [1], [0, 0, 1, 1], [], []>} : vector<1x128xf32>, vector<128x128xf32>, vector<1x128xf32> -> vector<1x128xf32>
    %259 = arith.addf %254, %258 : vector<1x128xf32>
    %260 = vector.extract_strided_slice %203 {offsets = [11, 0], sizes = [1, 128], strides = [1, 1]} : vector<16x128xf32> to vector<1x128xf32>
    %c11_247 = arith.constant 11 : index
    %c0_248 = arith.constant 0 : index
    %c0_249 = arith.constant 0 : index
    %261 = vector.load %arg7[%c11_247, %c0_248, %c0_249] : memref<16x128x128xf32, #tpu.memory_space<vmem>>, vector<1x128x128xf32>
    %262 = vector.shape_cast %261 : vector<1x128x128xf32> to vector<128x128xf32>
    %cst_250 = arith.constant dense<0.000000e+00> : vector<1x128xf32>
    %263 = tpu.matmul %260, %262, %cst_250 {dimension_numbers = #tpu.dot_dimension_numbers<[1], [0], [0], [1], [0, 0, 1, 1], [], []>} : vector<1x128xf32>, vector<128x128xf32>, vector<1x128xf32> -> vector<1x128xf32>
    %264 = arith.addf %259, %263 : vector<1x128xf32>
    %265 = vector.extract_strided_slice %203 {offsets = [12, 0], sizes = [1, 128], strides = [1, 1]} : vector<16x128xf32> to vector<1x128xf32>
    %c12_251 = arith.constant 12 : index
    %c0_252 = arith.constant 0 : index
    %c0_253 = arith.constant 0 : index
    %266 = vector.load %arg7[%c12_251, %c0_252, %c0_253] : memref<16x128x128xf32, #tpu.memory_space<vmem>>, vector<1x128x128xf32>
    %267 = vector.shape_cast %266 : vector<1x128x128xf32> to vector<128x128xf32>
    %cst_254 = arith.constant dense<0.000000e+00> : vector<1x128xf32>
    %268 = tpu.matmul %265, %267, %cst_254 {dimension_numbers = #tpu.dot_dimension_numbers<[1], [0], [0], [1], [0, 0, 1, 1], [], []>} : vector<1x128xf32>, vector<128x128xf32>, vector<1x128xf32> -> vector<1x128xf32>
    %269 = arith.addf %264, %268 : vector<1x128xf32>
    %270 = vector.extract_strided_slice %203 {offsets = [13, 0], sizes = [1, 128], strides = [1, 1]} : vector<16x128xf32> to vector<1x128xf32>
    %c13_255 = arith.constant 13 : index
    %c0_256 = arith.constant 0 : index
    %c0_257 = arith.constant 0 : index
    %271 = vector.load %arg7[%c13_255, %c0_256, %c0_257] : memref<16x128x128xf32, #tpu.memory_space<vmem>>, vector<1x128x128xf32>
    %272 = vector.shape_cast %271 : vector<1x128x128xf32> to vector<128x128xf32>
    %cst_258 = arith.constant dense<0.000000e+00> : vector<1x128xf32>
    %273 = tpu.matmul %270, %272, %cst_258 {dimension_numbers = #tpu.dot_dimension_numbers<[1], [0], [0], [1], [0, 0, 1, 1], [], []>} : vector<1x128xf32>, vector<128x128xf32>, vector<1x128xf32> -> vector<1x128xf32>
    %274 = arith.addf %269, %273 : vector<1x128xf32>
    %275 = vector.extract_strided_slice %203 {offsets = [14, 0], sizes = [1, 128], strides = [1, 1]} : vector<16x128xf32> to vector<1x128xf32>
    %c14_259 = arith.constant 14 : index
    %c0_260 = arith.constant 0 : index
    %c0_261 = arith.constant 0 : index
    %276 = vector.load %arg7[%c14_259, %c0_260, %c0_261] : memref<16x128x128xf32, #tpu.memory_space<vmem>>, vector<1x128x128xf32>
    %277 = vector.shape_cast %276 : vector<1x128x128xf32> to vector<128x128xf32>
    %cst_262 = arith.constant dense<0.000000e+00> : vector<1x128xf32>
    %278 = tpu.matmul %275, %277, %cst_262 {dimension_numbers = #tpu.dot_dimension_numbers<[1], [0], [0], [1], [0, 0, 1, 1], [], []>} : vector<1x128xf32>, vector<128x128xf32>, vector<1x128xf32> -> vector<1x128xf32>
    %279 = arith.addf %274, %278 : vector<1x128xf32>
    %280 = vector.extract_strided_slice %203 {offsets = [15, 0], sizes = [1, 128], strides = [1, 1]} : vector<16x128xf32> to vector<1x128xf32>
    %c15_263 = arith.constant 15 : index
    %c0_264 = arith.constant 0 : index
    %c0_265 = arith.constant 0 : index
    %281 = vector.load %arg7[%c15_263, %c0_264, %c0_265] : memref<16x128x128xf32, #tpu.memory_space<vmem>>, vector<1x128x128xf32>
    %282 = vector.shape_cast %281 : vector<1x128x128xf32> to vector<128x128xf32>
    %cst_266 = arith.constant dense<0.000000e+00> : vector<1x128xf32>
    %283 = tpu.matmul %280, %282, %cst_266 {dimension_numbers = #tpu.dot_dimension_numbers<[1], [0], [0], [1], [0, 0, 1, 1], [], []>} : vector<1x128xf32>, vector<128x128xf32>, vector<1x128xf32> -> vector<1x128xf32>
    %284 = arith.addf %279, %283 : vector<1x128xf32>
    %285 = vector.shape_cast %284 : vector<1x128xf32> to vector<1x128xf32>
    %286 = vector.broadcast %285 : vector<1x128xf32> to vector<8x128xf32>
    %c0_267 = arith.constant 0 : index
    %c0_268 = arith.constant 0 : index
    %c0_269 = arith.constant 0 : index
    %287 = vector.load %arg9[%c0_267, %c0_268, %c0_269] : memref<1x8x128xf32, #tpu.memory_space<vmem>>, vector<1x8x128xf32>
    %288 = vector.shape_cast %287 : vector<1x8x128xf32> to vector<8x128xf32>
    %289 = vector.shape_cast %286 : vector<8x128xf32> to vector<1x8x128xf32>
    tpu.vector_store %arg9[%c0_267, %c0_268, %c0_269], %289 {strides = array<i32>} : memref<1x8x128xf32, #tpu.memory_space<vmem>>, vector<1x8x128xf32>,
    return
  }
  func.func @transform_0(%arg0: i32) -> (i32, i32, i32) {
    %c0_i32 = arith.constant 0 : i32
    %c0_i32_0 = arith.constant 0 : i32
    %c0_i32_1 = arith.constant 0 : i32
    return %arg0, %c0_i32, %c0_i32_0 : i32, i32, i32
  }
  func.func @transform_1(%arg0: i32) -> (i32, i32) {
    %c0_i32 = arith.constant 0 : i32
    %c0_i32_0 = arith.constant 0 : i32
    %c0_i32_1 = arith.constant 0 : i32
    return %c0_i32, %c0_i32_0 : i32, i32
  }
  func.func @transform_2(%arg0: i32) -> (i32, i32) {
    %c0_i32 = arith.constant 0 : i32
    %c0_i32_0 = arith.constant 0 : i32
    %c0_i32_1 = arith.constant 0 : i32
    return %c0_i32, %c0_i32_0 : i32, i32
  }
  func.func @transform_3(%arg0: i32) -> (i32, i32, i32) {
    %c0_i32 = arith.constant 0 : i32
    %c0_i32_0 = arith.constant 0 : i32
    %c0_i32_1 = arith.constant 0 : i32
    %c0_i32_2 = arith.constant 0 : i32
    return %c0_i32, %c0_i32_0, %c0_i32_1 : i32, i32, i32
  }
  func.func @transform_4(%arg0: i32) -> (i32, i32, i32) {
    %c0_i32 = arith.constant 0 : i32
    %c0_i32_0 = arith.constant 0 : i32
    %c0_i32_1 = arith.constant 0 : i32
    %c0_i32_2 = arith.constant 0 : i32
    return %c0_i32, %c0_i32_0, %c0_i32_1 : i32, i32, i32
  }
  func.func @transform_5(%arg0: i32) -> (i32, i32) {
    %c0_i32 = arith.constant 0 : i32
    %c0_i32_0 = arith.constant 0 : i32
    %c0_i32_1 = arith.constant 0 : i32
    return %c0_i32, %c0_i32_0 : i32, i32
  }
  func.func @transform_6(%arg0: i32) -> (i32, i32, i32) {
    %c0_i32 = arith.constant 0 : i32
    %c0_i32_0 = arith.constant 0 : i32
    %c0_i32_1 = arith.constant 0 : i32
    %c0_i32_2 = arith.constant 0 : i32
    return %c0_i32, %c0_i32_0, %c0_i32_1 : i32, i32, i32
  }
  func.func @transform_7(%arg0: i32) -> (i32, i32) {
    %c0_i32 = arith.constant 0 : i32
    %c0_i32_0 = arith.constant 0 : i32
    %c0_i32_1 = arith.constant 0 : i32
    return %c0_i32, %c0_i32_0 : i32, i32
  }
  func.func @transform_8(%arg0: i32) -> (i32, i32, i32) {
    %c0_i32 = arith.constant 0 : i32
    %c0_i32_0 = arith.constant 0 : i32
    %c0_i32_1 = arith.constant 0 : i32
    return %arg0, %c0_i32, %c0_i32_0 : i32, i32, i32
  }
}

</mosaic_0001>

<bundles_post_ra>
// kernel: tpu_custom_call.1
= control target key start
LH: loop header
LB: loop body
LE: loop exit
PB: predicated region body
PF: predicated region fallthrough
CT: control target
= control target key end

     0   :  { %s14464_s0 = inlined_call_operand.vmem [shape: f32[2,128,108], index: 0, kind: input, shape index: {}]   ;;  %s14465_s1 = inlined_call_operand.hbm [shape: f32[108,128], index: 1, kind: input, shape index: {}]   ;;  %s14466_s2 = inlined_call_operand.hbm [shape: f32[1,128], index: 2, kind: input, shape index: {}]   ;;  %s14467_s3 = inlined_call_operand.hbm [shape: f32[27,16,128], index: 3, kind: input, shape index: {}]   ;;  %s14468_s4 = inlined_call_operand.hbm [shape: f32[27,128,128], index: 4, kind: input, shape index: {}]   ;;  %s14469_s5 = inlined_call_operand.hbm [shape: f32[1,128], index: 5, kind: input, shape index: {}]   ;;  %s14470_s6 = inlined_call_operand.hbm [shape: f32[16,128,128], index: 6, kind: input, shape index: {}]   ;;  %s14471_s7 = inlined_call_operand.hbm [shape: f32[1,128], index: 7, kind: input, shape index: {}]   ;;  %s14472_s8 = inlined_call_operand.hbm [shape: f32[2,8,128], index: 8, kind: output, shape index: {}]  }
   0x1   :  { %14479 = sst [smem:[#allocation23_spill]] %s14466_s2 }
   0x2   :  { %14480 = sst [smem:[#allocation24_spill]] %s14468_s4 }
   0x3   :  { %13 = vsyncpa [#allocation3], 0 }
   0x4   :  { %14 = vsyncpa [#allocation6], 0 }
   0x5   :  { %15 = vsyncpa [#allocation9], 0 }
   0x6   :  { %16 = vsyncpa [#allocation12], 0 }
   0x7   :  { %17 = vsyncpa [#allocation4], 0 }
   0x8   :  { %19 = vsyncpa [#allocation4 + $0x1], 0  ;;  %s13384_s27 = smov 0   ;;  %s13386_s28 = smov 0  }
   0x9   :  { %s13388_s29 = smov 0   ;;  %s13390_s30 = smov 0  }
   0xa LB: > { %14481 = sst [smem:[#allocation20_spill]] %s13319_s29  ;;  %s13405_s9 = sadd.s32 4294967295, %s13323_s30   ;;  %s13323_s30 = sphi %s13390_s30, %s14502_s30   ;;  %s13319_s29 = sphi %s13388_s29, %s14504_s29   ;;  %s13315_s28 = sphi %s13386_s28, %s14506_s28   ;;  %s13311_s27 = sphi %s13384_s27, %s14505_s27  }
   0xb   : > { %s6887_s10 = sadd.s32 4294967294, %s13323_s30   ;;  %s13409_s11 = sadd.s32 1, %s13323_s30  }
   0xc   : > { %14482 = sst [smem:[#allocation21_spill]] %s13409_s11  ;;  %s205_s12 = sadd.s32 1, %s13319_s29 }
   0xd   : > { %s202_s13 = ssub.s32 %s13323_s30, %s13409_s11  ;;  %p215_p0 = scmp.ne.s32.totalorder %s13319_s29, %s13315_s28 }
   0xe   : > { %p203_p1 = scmp.eq.s32.totalorder %s202_s13, 0  ;;  %p216_p2 = scmp.eq.s32.totalorder %s13405_s9, 1 }
   0xf   : > { %p221_p3 = scmp.ne.s32.totalorder %s13315_s28, %s13311_s27  ;;  %p222_p4 = scmp.eq.s32.totalorder %s6887_s10, 1 }
  0x10   : > { %s13420_s14 = scalar_select %p203_p1, %s13319_s29, %s205_s12  }
  0x11   : > { %p13422_p5 = por %p216_p2, %p215_p0  ;;  %p13426_p6 = por %p222_p4, %p221_p3 }
  0x12   : > { %14483 = sst [smem:[#allocation22_spill]] %s13420_s14  ;;  %p6888_p7 = scmp.ge.s32.totalorder %s13323_s30, 1 }
  0x13   : > { %s14484_s15 = scalar_select %p13422_p5, 1, 0 }
  0x14   : > { %s14485_s16 = scalar_select %p13426_p6, 1, 0 }
  0x15   : > { %p229_p8 = scmp.lt.s32.totalorder %s13323_s30, 3  ;;  %p14473_p9 = scmp.eq.s32.totalorder %s13405_s9, 0 }
  0x16   : > { %s13325_s18 = smov [#allocation5]   ;;  %s13326_s21 = smov [#allocation8]  }
  0x17   : > { %p13433_p10 = pnand %p6888_p7, %p229_p8  ;;  %s255_s19 = sshll.u32 %s13325_s18, 4  ;;  %s256_s19 = int_to_ptr.vmem [resolvable:$true] %s255_s19 }
  0x18   : > { %s278_s22 = sshll.u32 %s13326_s21, 4  ;;  %s13327_s23 = smov [#allocation11]   ;;  %s13445_s22 = int_to_ptr.vmem [resolvable:$true] %s278_s22 }
  0x19   : > { %s14486_s17 = scalar_select %p13433_p10, 1, 0 }
  0x1a   : > { %p12963_p11 = pneg %p13433_p10  ;;  %s13447_s24 = sshll.u32 %s13327_s23, 4  ;;  %s303_s24 = int_to_ptr.vmem [resolvable:$true] %s13447_s24 }
  0x1b   : > { %s14488_s2 = sld [smem:[#allocation23_spill]] }
  0x1c   : > { %p13441_p12 = pnand %p14473_p9, %p12963_p11 }
  0x1e   : > { %p13457_p0 = pneg %p13441_p12 }
  0x21   : > { %s13049_s10 = scalar_lea.hbm %s14488_s2, 16 }
  0x22   : > { %p13050_p13 = scmp.ne.s32.totalorder %s14488_s2, %s13049_s10  ;;  %p13056_p3 = scmp.lt.u32.totalorder %s13049_s10, %s14488_s2 }
  0x24   : > { %p13052_p1 = pnand %p13457_p0, %p13050_p13 }
  0x26   : > { %p13053_p2 = pneg %p13052_p1 }
  0x28   : > { %p13058_p4 = pnand %p13056_p3, %p13053_p2 }
  0x2a   : > { %13061 = shalt.err (!%p13058_p4)
}
  0x2b   : > { %s13062_s25 = scalar_lea.vmem %s256_s19, 16  ;;  %s13069_s26 = scalar_lea.vmem %s256_s19, 32 }
  0x2c   : > { %p13063_p7 = scmp.ne.s32.totalorder %s256_s19, %s13062_s25  ;;  %p13070_p9 = scmp.lt.s32.totalorder %s256_s19, %s256_s19 }
  0x2d   : > { %p13071_p6 = scmp.lt.s32.totalorder %s13069_s26, %s13062_s25 }
  0x2e   : > { %p13065_p8 = pnand %p13063_p7, %p13457_p0 }
  0x2f   : > { %p13072_p5 = por %p13071_p6, %p13070_p9 }
  0x30   : > { %p13066_p11 = pneg %p13065_p8 }
  0x32   : > { %p13073_p10 = pnand %p13072_p5, %p13066_p11 }
  0x34   : > { %13076 = shalt.err (!%p13073_p10)
}
  0x35   : > { %12969 = dma.hbm_to_vmem [thread:$0]  (!%p13441_p12), %s14488_s2, 16, %s256_s19, [#allocation6]  }
  0x36   : > { %s14490_s4 = sld [smem:[#allocation24_spill]] }
  0x3c   : > { %s13077_s23 = scalar_lea.hbm %s14490_s4, 55296 }
  0x3d   : > { %p13078_p13 = scmp.ne.s32.totalorder %s14490_s4, %s13077_s23  ;;  %p13084_p5 = scmp.lt.u32.totalorder %s13077_s23, %s14490_s4 }
  0x3f   : > { %p13080_p1 = pnand %p13078_p13, %p13457_p0 }
  0x41   : > { %p13081_p6 = pneg %p13080_p1 }
  0x43   : > { %p13086_p9 = pnand %p13084_p5, %p13081_p6 }
  0x45   : > { %13089 = shalt.err (!%p13086_p9)
}
  0x46   : > { %s13090_s19 = scalar_lea.vmem %s13445_s22, 55296  ;;  %p13098_p4 = scmp.lt.s32.totalorder %s13445_s22, %s13445_s22 }
  0x47   : > { %p13091_p10 = scmp.ne.s32.totalorder %s13445_s22, %s13090_s19  ;;  %p13099_p7 = scmp.lt.s32.totalorder %s13090_s19, %s13090_s19 }
  0x49   : > { %p13093_p2 = pnand %p13091_p10, %p13457_p0  ;;  %p13100_p8 = por %p13099_p7, %p13098_p4 }
  0x4b   : > { %p13094_p3 = pneg %p13093_p2 }
  0x4d   : > { %p13101_p11 = pnand %p13100_p8, %p13094_p3 }
  0x4f   : > { %13104 = shalt.err (!%p13101_p11)
}
  0x50   : > { %s13328_s29 = smov 128   ;;  %s13329_s14 = smov 8  }
  0x51   : > { %12975 = dma.hbm_to_vmem [thread:$0]  (!%p13441_p12), %s14490_s4, 55296, %s13445_s22, [#allocation9], %s13328_s29, %s13328_s29, %s13329_s14  }
  0x52   : > { %s13105_s23 = scalar_lea.hbm %s14470_s6, 32768 }
  0x53   : > { %p13106_p13 = scmp.ne.s32.totalorder %s14470_s6, %s13105_s23  ;;  %p13112_p5 = scmp.lt.u32.totalorder %s13105_s23, %s14470_s6 }
  0x55   : > { %p13108_p1 = pnand %p13106_p13, %p13457_p0 }
  0x57   : > { %p13109_p6 = pneg %p13108_p1 }
  0x59   : > { %p13114_p9 = pnand %p13112_p5, %p13109_p6 }
  0x5b   : > { %13117 = shalt.err (!%p13114_p9)
}
  0x5c   : > { %s13118_s12 = scalar_lea.vmem %s303_s24, 32768  ;;  %p13126_p4 = scmp.lt.s32.totalorder %s303_s24, %s303_s24 }
  0x5d   : > { %p13119_p10 = scmp.ne.s32.totalorder %s303_s24, %s13118_s12  ;;  %p13127_p7 = scmp.lt.s32.totalorder %s13118_s12, %s13118_s12 }
  0x5f   : > { %p13121_p2 = pnand %p13119_p10, %p13457_p0  ;;  %p13128_p8 = por %p13127_p7, %p13126_p4 }
  0x61   : > { %p13122_p3 = pneg %p13121_p2 }
  0x63   : > { %p13129_p11 = pnand %p13128_p8, %p13122_p3 }
  0x65   : > { %13132 = shalt.err (!%p13129_p11)
}
  0x66   : > { %12981 = dma.hbm_to_vmem [thread:$0]  (!%p13441_p12), %s14470_s6, 32768, %s303_s24, [#allocation12], %s13328_s29, %s13328_s29, %s13329_s14  }
  0x67   : > { %s13330_s13 = smov [#allocation2]   ;;  %s13331_s21 = smov [#allocation7]  }
  0x68   : > { %s241_s10 = sshll.u32 %s13330_s13, 4  ;;  %s265_s23 = sshll.u32 %s13331_s21, 4  ;;  %s242_s10 = int_to_ptr.vmem [resolvable:$true] %s241_s10  ;;  %s266_s23 = int_to_ptr.vmem [resolvable:$true] %s265_s23 }
  0x69   : > { %s13133_s19 = scalar_lea.hbm %s14465_s1, 1792 }
  0x6a   : > { %p13134_p13 = scmp.ne.s32.totalorder %s14465_s1, %s13133_s19  ;;  %p13140_p5 = scmp.lt.u32.totalorder %s13133_s19, %s14465_s1 }
  0x6c   : > { %p13136_p1 = pnand %p13134_p13, %p13457_p0 }
  0x6e   : > { %p13137_p6 = pneg %p13136_p1 }
  0x70   : > { %p13142_p9 = pnand %p13140_p5, %p13137_p6 }
  0x72   : > { %13145 = shalt.err (!%p13142_p9)
}
  0x73   : > { %s13146_s24 = scalar_lea.vmem %s242_s10, 1792  ;;  %p13154_p4 = scmp.lt.s32.totalorder %s242_s10, %s242_s10 }
  0x74   : > { %p13147_p10 = scmp.ne.s32.totalorder %s242_s10, %s13146_s24  ;;  %p13155_p7 = scmp.lt.s32.totalorder %s13146_s24, %s13146_s24 }
  0x76   : > { %p13149_p2 = pnand %p13147_p10, %p13457_p0  ;;  %p13156_p8 = por %p13155_p7, %p13154_p4 }
  0x78   : > { %p13150_p3 = pneg %p13149_p2 }
  0x7a   : > { %p13157_p11 = pnand %p13156_p8, %p13150_p3 }
  0x7c   : > { %13160 = shalt.err (!%p13157_p11)
}
  0x7d   : > { %12966 = dma.hbm_to_vmem [thread:$0]  (!%p13441_p12), %s14465_s1, 1792, %s242_s10, [#allocation3], %s13328_s29, %s13328_s29, %s13329_s14  }
  0x7e   : > { %s13161_s21 = scalar_lea.hbm %s14467_s3, 6912 }
  0x7f   : > { %p13162_p13 = scmp.ne.s32.totalorder %s14467_s3, %s13161_s21  ;;  %p13168_p5 = scmp.lt.u32.totalorder %s13161_s21, %s14467_s3 }
  0x81   : > { %p13164_p1 = pnand %p13162_p13, %p13457_p0 }
  0x83   : > { %p13165_p6 = pneg %p13164_p1 }
  0x85   : > { %p13170_p9 = pnand %p13168_p5, %p13165_p6 }
  0x87   : > { %13173 = shalt.err (!%p13170_p9)
}
  0x88   : > { %s13174_s2 = scalar_lea.vmem %s266_s23, 6912  ;;  %p13182_p4 = scmp.lt.s32.totalorder %s266_s23, %s266_s23 }
  0x89   : > { %p13175_p10 = scmp.ne.s32.totalorder %s266_s23, %s13174_s2  ;;  %p13183_p7 = scmp.lt.s32.totalorder %s13174_s2, %s13174_s2 }
  0x8b   : > { %p13177_p2 = pnand %p13175_p10, %p13457_p0  ;;  %p13184_p8 = por %p13183_p7, %p13182_p4 }
  0x8d   : > { %p13178_p3 = pneg %p13177_p2 }
  0x8f   : > { %p13185_p11 = pnand %p13184_p8, %p13178_p3 }
  0x91   : > { %13188 = shalt.err (!%p13185_p11)
}
  0x92   : > { %12972 = dma.hbm_to_vmem [thread:$0]  (!%p13441_p12), %s14467_s3, 6912, %s266_s23, [#allocation6], %s13328_s29, %s13328_s29, %s13329_s14  }
  0x93   : > { %s13332_s4 = smov [#allocation10]   ;;  %s13333_s22 = smov [#allocation13]  }
  0x94   : > { %s292_s11 = sshll.u32 %s13332_s4, 4  ;;  %s316_s13 = sshll.u32 %s13333_s22, 4  ;;  %s293_s11 = int_to_ptr.vmem [resolvable:$true] %s292_s11  ;;  %s317_s13 = int_to_ptr.vmem [resolvable:$true] %s316_s13 }
  0x95   : > { %s13189_s26 = scalar_lea.hbm %s14469_s5, 16 }
  0x96   : > { %p13190_p13 = scmp.ne.s32.totalorder %s14469_s5, %s13189_s26  ;;  %p13196_p5 = scmp.lt.u32.totalorder %s13189_s26, %s14469_s5 }
  0x98   : > { %p13192_p1 = pnand %p13190_p13, %p13457_p0 }
  0x9a   : > { %p13193_p6 = pneg %p13192_p1 }
  0x9c   : > { %p13198_p9 = pnand %p13196_p5, %p13193_p6 }
  0x9e   : > { %13201 = shalt.err (!%p13198_p9)
}
  0x9f   : > { %s13202_s29 = scalar_lea.vmem %s293_s11, 16  ;;  %s13209_s14 = scalar_lea.vmem %s293_s11, 32 }
  0xa0   : > { %p13203_p10 = scmp.ne.s32.totalorder %s293_s11, %s13202_s29  ;;  %p13210_p4 = scmp.lt.s32.totalorder %s293_s11, %s293_s11 }
  0xa1   : > { %p13211_p7 = scmp.lt.s32.totalorder %s13209_s14, %s13202_s29 }
  0xa2   : > { %p13205_p2 = pnand %p13203_p10, %p13457_p0 }
  0xa3   : > { %p13212_p8 = por %p13211_p7, %p13210_p4 }
  0xa4   : > { %p13206_p3 = pneg %p13205_p2 }
  0xa6   : > { %p13213_p11 = pnand %p13212_p8, %p13206_p3 }
  0xa8   : > { %13216 = shalt.err (!%p13213_p11)
}
  0xa9   : > { %12978 = dma.hbm_to_vmem [thread:$0]  (!%p13441_p12), %s14469_s5, 16, %s293_s11, [#allocation9]  }
  0xaa   : > { %s13217_s21 = scalar_lea.hbm %s14471_s7, 16 }
  0xab   : > { %p13218_p13 = scmp.ne.s32.totalorder %s14471_s7, %s13217_s21  ;;  %p13224_p5 = scmp.lt.u32.totalorder %s13217_s21, %s14471_s7 }
  0xad   : > { %p13220_p1 = pnand %p13218_p13, %p13457_p0 }
  0xaf   : > { %p13221_p6 = pneg %p13220_p1 }
  0xb1   : > { %p13226_p9 = pnand %p13224_p5, %p13221_p6 }
  0xb3   : > { %13229 = shalt.err (!%p13226_p9)
}
  0xb4   : > { %s13230_s2 = scalar_lea.vmem %s317_s13, 16  ;;  %s13237_s11 = scalar_lea.vmem %s317_s13, 32 }
  0xb5   : > { %p13231_p10 = scmp.ne.s32.totalorder %s317_s13, %s13230_s2  ;;  %p13238_p4 = scmp.lt.s32.totalorder %s317_s13, %s317_s13 }
  0xb6   : > { %p13239_p7 = scmp.lt.s32.totalorder %s13237_s11, %s13230_s2 }
  0xb7   : > { %p13233_p2 = pnand %p13231_p10, %p13457_p0 }
  0xb8   : > { %p13240_p8 = por %p13239_p7, %p13238_p4 }
  0xb9   : > { %p13234_p3 = pneg %p13233_p2 }
  0xbb   : > { %p13241_p11 = pnand %p13240_p8, %p13234_p3 }
  0xbd   : > { %13244 = shalt.err (!%p13241_p11)
}
  0xbe   : > { %12984 = dma.hbm_to_vmem [thread:$0]  (!%p13441_p12), %s14471_s7, 16, %s317_s13, [#allocation12]  }
  0xbf   : > { %p14491_p13 = scmp.ne.s32.totalorder %s14486_s17, 0 }
  0xc0   : > { %p14492_p1 = scmp.eq.s32.totalorder (!%p14491_p13), %s13405_s9, 0 }
  0xc1   : > { %337 = sbr.rel (%p14491_p13) target bundleno = 3782 (0xec6), region = 52 }
  0xc8   : > { %13290 = dma.done.wait (%p14492_p1), [#allocation3], 1792   ;;  %p14493_p0 = pmov %p14492_p1 }
  0xca   : > { %13292 = vsyncadd (%p14493_p0), [#allocation3], 4294965504  ;;  %p14494_p6 = pmov %p14493_p0 }
  0xcb   : > { %p14495_p5 = pmov %p14493_p0 }
  0xcc   : > { %13294 = dma.done.wait (%p14494_p6), [#allocation6], 6928  }
  0xcd   : > { %13296 = vsyncadd (%p14495_p5), [#allocation6], 4294960368  ;;  %p14496_p9 = pmov %p14493_p0 }
  0xce   : > { %p14497_p12 = pmov %p14493_p0 }
  0xcf   : > { %13298 = dma.done.wait (%p14496_p9), [#allocation9], 55312  }
  0xd0   : > { %13300 = vsyncadd (%p14497_p12), [#allocation9], 4294911984  ;;  %p14498_p10 = pmov %p14493_p0 }
  0xd1   : > { %p14499_p2 = pmov %p14493_p0 }
  0xd2   : > { %13302 = dma.done.wait (%p14498_p10), [#allocation12], 32784  }
  0xd3   : > { %13304 = vsyncadd (%p14499_p2), [#allocation12], 4294934512  ;;  %p395_p3 = scmp.lt.s32.totalorder %s13405_s9, 1  ;;  %v416_v0 = vld [vmem:[#allocation2] sm:$0xff]  ;;  %v417_v1 = vld [vmem:[#allocation2 + $0x8] sm:$0xff]  ;;  %vm437_vm0 = vcmask 883712  }
  0xd4   : > { %v418_v2 = vld [vmem:[#allocation2 + $0x10] sm:$0xff]  ;;  %v10708_v3 = vpack.c.bf16 %v417_v1, %v416_v0  ;;  %v419_v4 = vld [vmem:[#allocation2 + $0x18] sm:$0xff]  ;;  %v420_v6 = vld [vmem:[#allocation2 + $0x20] sm:$0xff]  ;;  %vm486_vm1 = vcmask 1043456   ;;  %vm13334_vm2 = vmmov 1   ;;  %vm13336_vm4 = vmmov 0  }
  0xd5   : > { %s396_s17 = scalar_select %p395_p3, %s13405_s9, 1  ;;  %v10712_v5 = vpack.c.bf16 %v419_v4, %v418_v2  ;;  %v421_v7 = vld [vmem:[#allocation2 + $0x28] sm:$0xff]  ;;  %v422_v10 = vld [vmem:[#allocation2 + $0x30] sm:$0xff]  ;;  %v423_v11 = vld [vmem:[#allocation2 + $0x38] sm:$0xff] }
  0xd6   : > { %10709 = vmatprep.subr.bf16.mxu0 %v10708_v3  ;;  %v10716_v9 = vpack.c.bf16 %v421_v7, %v420_v6  ;;  %v10720_v12 = vpack.c.bf16 %v423_v11, %v422_v10  ;;  %v424_v13 = vld [vmem:[#allocation2 + $0x40] sm:$0xff]  ;;  %v425_v14 = vld [vmem:[#allocation2 + $0x48] sm:$0xff]  ;;  %v426_v16 = vld [vmem:[#allocation2 + $0x50] sm:$0xff]  ;;  %s392_s23 = sand.u32 1, %s13315_s28   ;;  %s6928_s4 = sshll.u32 %s13405_s9, 7 }
  0xd7   : > { %s6931_s20 = sshll.u32 %s396_s17, 7  ;;  %10711 = vmatpush3.bf16.msra.mxu0 %v10708_v3  ;;  %v10724_v15 = vpack.c.bf16 %v425_v14, %v424_v13  ;;  %v427_v17 = vld [vmem:[#allocation2 + $0x58] sm:$0xff]  ;;  %v428_v19 = vld [vmem:[#allocation2 + $0x60] sm:$0xff]  ;;  %v429_v20 = vld [vmem:[#allocation2 + $0x68] sm:$0xf]  ;;  %s6905_s24 = sshll.u32 %s392_s23, 3 }
  0xd8   : > { %s13622_s14 = scalar_lea.vmem %s14464_s0, %s6931_s20  ;;  %10713 = vmatprep.subr.bf16.mxu0 %v10712_v5  ;;  %v10728_v18 = vpack.c.bf16 %v427_v17, %v426_v16  ;;  %v10732_v21 = vpack.c.bf16 %v429_v20, %v428_v19  ;;  %vm10733_vm3 = vmpackc.low %vm486_vm1, %vm13334_vm2  ;;  %v651_v37 = vld [vmem:[#allocation7] sm:$0xff]  ;;  %v13656_v39 = vld [vmem:[#allocation5] ss:$0 sm:$0xff]  ;;  %s394_s22 = scalar_lea.vmem [#allocation14], %s6905_s24 }
  0xd9   : > { %v400_v8 = vld [vmem:[%s13622_s14] sm:$0xff]  ;;  %v401_v22 = vld [vmem:[%s13622_s14 + $0x8] sm:$0xff]  ;;  %v402_v23 = vld [vmem:[%s13622_s14 + $0x10] sm:$0xff]  ;;  %8290 = vmatprep.mubr.f32.mxu1 %v651_v37  ;;  %s6759_s21 = sshll.u32 %s394_s22, 4  ;;  %s14422_s19 = scalar_lea.hbm %s14472_s8, %s6928_s4  ;;  %s14424_s21 = int_to_ptr.vmem [resolvable:$true] %s6759_s21 }
  0xda   : > { %8234 = vmatprep.mubr.msk.f32.mxu0 %vm437_vm0, %v400_v8  ;;  %v403_v24 = vld [vmem:[%s13622_s14 + $0x18] sm:$0xff]  ;;  %v404_v25 = vld [vmem:[%s13622_s14 + $0x20] sm:$0xff]  ;;  %v405_v26 = vld [vmem:[%s13622_s14 + $0x28] sm:$0xff]  ;;  %s6746_s12 = scalar_lea.sflag [#allocation4], %s392_s23  ;;  %s13245_s2 = scalar_lea.vmem %s14424_s21, 128 }
  0xdb   : > { %10715 = vmatpush3.bf16.msra.mxu0 %v10712_v5  ;;  %v406_v27 = vld [vmem:[%s13622_s14 + $0x30] sm:$0xff]  ;;  %v407_v28 = vld [vmem:[%s13622_s14 + $0x38] sm:$0xff]  ;;  %v408_v29 = vld [vmem:[%s13622_s14 + $0x40] sm:$0xff]  ;;  %p13246_p4 = scmp.ne.s32.totalorder %s14424_s21, %s13245_s2  ;;  %p14500_p7 = scmp.ne.s32.totalorder %s14484_s15, 0 }
  0xdc   : > { %10717 = vmatprep.subr.bf16.mxu0 %v10716_v9  ;;  %v409_v30 = vld [vmem:[%s13622_s14 + $0x48] sm:$0xff]  ;;  %v410_v31 = vld [vmem:[%s13622_s14 + $0x50] sm:$0xff]  ;;  %v411_v32 = vld [vmem:[%s13622_s14 + $0x58] sm:$0xff]  ;;  %s13338_s9 = smov [#allocation14]  }
  0xdd   : > { %v412_v33 = vld [vmem:[%s13622_s14 + $0x60] sm:$0xff]  ;;  %v413_v34 = vld [vmem:[%s13622_s14 + $0x68] sm:$0xff]  ;;  %v414_v35 = vld [vmem:[%s13622_s14 + $0x70] sm:$0xff]  ;;  %p13247_p8 = pnand %p13246_p4, %p14500_p7  ;;  %s13249_s11 = sshll.u32 %s13338_s9, 4  ;;  %s13250_s11 = int_to_ptr.vmem [resolvable:$false] %s13249_s11 }
  0xde   : > { %v415_v36 = vld [vmem:[%s13622_s14 + $0x78] sm:$0xff]  ;;  %v2195_v37 = vld [vmem:[#allocation7 + $0x98] sm:$0xff]  ;;  %s13251_s10 = scalar_lea.vmem %s13250_s11, 256  ;;  %p13252_p13 = scmp.lt.s32.totalorder %s14424_s21, %s13250_s11 }
  0xdf   : > { %10719 = vmatpush3.bf16.msra.mxu0 %v10716_v9  ;;  %v2022_v38 = vld [vmem:[#allocation7 + $0x80] sm:$0xff]  ;;  %p13248_p11 = pneg %p13247_p8  ;;  %p13253_p1 = scmp.lt.s32.totalorder %s13251_s10, %s13245_s2 }
  0xe0   : > { %10721 = vmatprep.subr.bf16.mxu0 %v10720_v12 }
  0xe1   : > { %p13254_p0 = por %p13253_p1, %p13252_p13 }
  0xe3   : > { %10723 = vmatpush3.bf16.msra.mxu0 %v10720_v12  ;;  %p13255_p6 = pnand %p13254_p0, %p13248_p11 }
  0xe4   : > { %10725 = vmatprep.subr.bf16.mxu0 %v10724_v15 }
  0xe7   : > { %10727 = vmatpush3.bf16.msra.mxu0 %v10724_v15 }
  0xe8   : > { %10729 = vmatprep.subr.bf16.mxu0 %v10728_v18 }
  0xeb   : > { %10731 = vmatpush3.bf16.msra.mxu0 %v10728_v18 }
  0xec   : > { %10734 = vmatprep.subr.msk.bf16.mxu0 %vm10733_vm3, %v10732_v21 }
  0xef   : > { %10737 = vmatpush3.bf16.msk.msra.mxu0 %vm10733_vm3, %v10732_v21 }
  0xf2   : > { %8235 = vmatmul.mubr.msk.f32.vlgmr.msra.gmra.mrb[0].mxu0 %vm437_vm0, %v401_v22 }
  0xf3   : > { %8237 = vmatprep.mubr.msk.f32.mxu0 %vm437_vm0, %v402_v23 }
  0xf6   : > { %8238 = vmatmul.mubr.msk.f32.gmra.mrb[2].mxu0 %vm437_vm0, %v403_v24 }
  0xf7   : > { %8240 = vmatprep.mubr.msk.f32.mxu0 %vm437_vm0, %v404_v25 }
  0xfa   : > { %8241 = vmatmul.mubr.msk.f32.gmra.mrb[4].mxu0 %vm437_vm0, %v405_v26 }
  0xfb   : > { %8243 = vmatprep.mubr.msk.f32.mxu0 %vm437_vm0, %v406_v27 }
  0xfe   : > { %8244 = vmatmul.mubr.msk.f32.gmra.mrb[6].mxu0 %vm437_vm0, %v407_v28 }
  0xff   : > { %8246 = vmatprep.mubr.msk.f32.mxu0 %vm437_vm0, %v408_v29 }
 0x102   : > { %8247 = vmatmul.mubr.msk.f32.gmra.mrb[8].mxu0 %vm437_vm0, %v409_v30 }
 0x103   : > { %8249 = vmatprep.mubr.msk.f32.mxu0 %vm437_vm0, %v410_v31 }
 0x106   : > { %8250 = vmatmul.mubr.msk.f32.gmra.mrb[10].mxu0 %vm437_vm0, %v411_v32  ;;  %v652_v32 = vld [vmem:[#allocation7 + $0x8] sm:$0xff] }
 0x107   : > { %8252 = vmatprep.mubr.msk.f32.mxu0 %vm437_vm0, %v412_v33  ;;  %v2023_v33 = vld [vmem:[#allocation7 + $0x88] sm:$0xff] }
 0x10a   : > { %8253 = vmatmul.mubr.msk.f32.gmra.mrb[12].mxu0 %vm437_vm0, %v413_v34  ;;  %v745_v34 = vld [vmem:[#allocation7 + $0x10] sm:$0xff] }
 0x10b   : > { %8255 = vmatprep.mubr.msk.f32.mxu0 %vm437_vm0, %v414_v35  ;;  %v2194_v35 = vld [vmem:[#allocation7 + $0x90] sm:$0xff] }
 0x10e   : > { %8256 = vmatmul.mubr.msk.f32.gmra.mrb[14].mxu0 %vm437_vm0, %v415_v36  ;;  %v746_v36 = vld [vmem:[#allocation7 + $0x18] sm:$0xff] }
 0x10f   : > { %8850 = vmatprep.mubr.f32.mxu0 %v2022_v38  ;;  %v2366_v38 = vld [vmem:[#allocation7 + $0xa0] sm:$0xff] }
 0x1c5   : > { %v8236_v40 = vpop.f32.mrb[0].mxu0 }
 0x1c6   : > { %v562_v41 = vadd.f32 %v8236_v40, %v13656_v39  ;;  %v556_v42 = vpop.f32.mrb[1].mxu0  ;;  %v2538_v40 = vld [vmem:[#allocation7 + $0xb0] sm:$0xff] }
 0x1c7   : > { %v557_v43 = vadd.f32 %v13656_v39, %v556_v42  ;;  %v824_v42 = vld [vmem:[#allocation8 + $0x88] sm:$0xff] }
 0x1c8   : > { %v636_v44 = vmax.f32 %v562_v41, 0.0  ;;  %v823_v41 = vld [vmem:[#allocation8 + $0x80] sm:$0xff] }
 0x1c9   : > { %v635_v45 = vmax.f32 %v557_v43, 0.0  ;;  %v8239_v46 = vpop.f32.mrb[2].mxu0  ;;  %v10802_v43 = vpack.c.bf16 %v824_v42, %v823_v41  ;;  %v739_v41 = vld [vmem:[#allocation8 + $0x58] sm:$0xff] }
 0x1ca   : > { %v572_v47 = vadd.f32 %v8239_v46, %v13656_v39  ;;  %v566_v48 = vpop.f32.mrb[3].mxu0 }
 0x1cb   : > { %v13661_v49 = vpack.c.bf16 %v636_v44, %v635_v45  ;;  %v567_v50 = vadd.f32 %v13656_v39, %v566_v48  ;;  %v825_v44 = vld [vmem:[#allocation8 + $0x90] sm:$0xff]  ;;  %v826_v45 = vld [vmem:[#allocation8 + $0x98] sm:$0xff]  ;;  %v828_v48 = vld [vmem:[#allocation8 + $0xa8] sm:$0xff] }
 0x1cc   : > { %v638_v51 = vmax.f32 %v572_v47, 0.0  ;;  %v10806_v46 = vpack.c.bf16 %v826_v45, %v825_v44  ;;  %v827_v47 = vld [vmem:[#allocation8 + $0xa0] sm:$0xff]  ;;  %v741_v44 = vld [vmem:[#allocation8 + $0x68] sm:$0xff] }
 0x1cd   : > { %v637_v52 = vmax.f32 %v567_v50, 0.0  ;;  %v8242_v53 = vpop.f32.mrb[4].mxu0  ;;  %10739 = vmatprep.subr.bf16.mxu1 %v13661_v49  ;;  %11251 = vmatprep.subr.bf16.mxu0 %v13661_v49  ;;  %v10810_v50 = vpack.c.bf16 %v828_v48, %v827_v47  ;;  %v743_v47 = vld [vmem:[#allocation8 + $0x78] sm:$0xff] }
 0x1ce   : > { %v582_v54 = vadd.f32 %v8242_v53, %v13656_v39  ;;  %v576_v55 = vpop.f32.mrb[5].mxu0  ;;  %10741 = vmatpush3.bf16.msra.mxu1 %v13661_v49  ;;  %11253 = vmatpush3.bf16.msra.mxu0 %v13661_v49  ;;  %v829_v53 = vld [vmem:[#allocation8 + $0xb0] sm:$0xff] }
 0x1cf   : > { %v13669_v56 = vpack.c.bf16 %v638_v51, %v637_v52  ;;  %v577_v57 = vadd.f32 %v13656_v39, %v576_v55  ;;  %v2539_v51 = vld [vmem:[#allocation7 + $0xb8] sm:$0xff]  ;;  %v2710_v52 = vld [vmem:[#allocation7 + $0xc0] sm:$0xff] }
 0x1d0   : > { %v640_v58 = vmax.f32 %v582_v54, 0.0  ;;  %v830_v54 = vld [vmem:[#allocation8 + $0xb8] sm:$0xff] }
 0x1d1   : > { %v639_v59 = vmax.f32 %v577_v57, 0.0  ;;  %v8245_v60 = vpop.f32.mrb[6].mxu0  ;;  %10743 = vmatprep.subr.bf16.mxu1 %v13669_v56  ;;  %11255 = vmatprep.subr.bf16.mxu0 %v13669_v56  ;;  %v10814_v55 = vpack.c.bf16 %v830_v54, %v829_v53  ;;  %v831_v57 = vld [vmem:[#allocation8 + $0xc0] sm:$0xff]  ;;  %v1069_v54 = vld [vmem:[#allocation8 + $0x108] sm:$0xff] }
 0x1d2   : > { %v592_v61 = vadd.f32 %v8245_v60, %v13656_v39  ;;  %v586_v62 = vpop.f32.mrb[7].mxu0  ;;  %10745 = vmatpush3.bf16.msra.mxu1 %v13669_v56  ;;  %11257 = vmatpush3.bf16.msra.mxu0 %v13669_v56  ;;  %v833_v60 = vld [vmem:[#allocation8 + $0xd0] sm:$0xff]  ;;  %v1068_v53 = vld [vmem:[#allocation8 + $0x100] sm:$0xff] }
 0x1d3   : > { %v13677_v63 = vpack.c.bf16 %v640_v58, %v639_v59  ;;  %v587_v0 = vadd.f32 %v13656_v39, %v586_v62  ;;  %v832_v58 = vld [vmem:[#allocation8 + $0xc8] sm:$0xff] }
 0x1d4   : > { %v642_v1 = vmax.f32 %v592_v61, 0.0  ;;  %v10818_v59 = vpack.c.bf16 %v832_v58, %v831_v57  ;;  %v834_v61 = vld [vmem:[#allocation8 + $0xd8] sm:$0xff]  ;;  %v1070_v57 = vld [vmem:[#allocation8 + $0x110] sm:$0xff] }
 0x1d5   : > { %v641_v2 = vmax.f32 %v587_v0, 0.0  ;;  %v8248_v3 = vpop.f32.mrb[8].mxu0  ;;  %10747 = vmatprep.subr.bf16.mxu1 %v13677_v63  ;;  %11259 = vmatprep.subr.bf16.mxu0 %v13677_v63  ;;  %v10822_v62 = vpack.c.bf16 %v834_v61, %v833_v60  ;;  %v835_v0 = vld [vmem:[#allocation8 + $0xe0] sm:$0xff]  ;;  %v1071_v58 = vld [vmem:[#allocation8 + $0x118] sm:$0xff] }
 0x1d6   : > { %v602_v4 = vadd.f32 %v8248_v3, %v13656_v39  ;;  %v596_v5 = vpop.f32.mrb[9].mxu0  ;;  %10749 = vmatpush3.bf16.msra.mxu1 %v13677_v63  ;;  %11261 = vmatpush3.bf16.msra.mxu0 %v13677_v63  ;;  %v837_v3 = vld [vmem:[#allocation8 + $0xf0] sm:$0xff]  ;;  %v10902_v60 = vpack.c.bf16 %v1071_v58, %v1070_v57  ;;  %v1072_v61 = vld [vmem:[#allocation8 + $0x120] sm:$0xff]  ;;  %v1251_v58 = vld [vmem:[#allocation8 + $0x1d8] sm:$0xff] }
 0x1d7   : > { %v13685_v6 = vpack.c.bf16 %v642_v1, %v641_v2  ;;  %v597_v7 = vadd.f32 %v13656_v39, %v596_v5  ;;  %v836_v1 = vld [vmem:[#allocation8 + $0xe8] sm:$0xff]  ;;  %v1250_v57 = vld [vmem:[#allocation8 + $0x1d0] sm:$0xff] }
 0x1d8   : > { %v644_v8 = vmax.f32 %v602_v4, 0.0  ;;  %v10826_v2 = vpack.c.bf16 %v836_v1, %v835_v0  ;;  %v838_v4 = vld [vmem:[#allocation8 + $0xf8] sm:$0xff]  ;;  %v1074_v1 = vld [vmem:[#allocation8 + $0x130] sm:$0xff] }
 0x1d9   : > { %v643_v9 = vmax.f32 %v597_v7, 0.0  ;;  %v8251_v10 = vpop.f32.mrb[10].mxu0  ;;  %10751 = vmatprep.subr.bf16.mxu1 %v13685_v6  ;;  %11263 = vmatprep.subr.bf16.mxu0 %v13685_v6  ;;  %v10830_v5 = vpack.c.bf16 %v838_v4, %v837_v3  ;;  %v728_v7 = vld [vmem:[#allocation8] sm:$0xff]  ;;  %v3743_v4 = vld [vmem:[#allocation7 + $0x128] sm:$0xff] }
 0x1da   : > { %v612_v11 = vadd.f32 %v8251_v10, %v13656_v39  ;;  %v606_v12 = vpop.f32.mrb[11].mxu0  ;;  %10753 = vmatpush3.bf16.msra.mxu1 %v13685_v6  ;;  %11265 = vmatpush3.bf16.msra.mxu0 %v13685_v6  ;;  %v2711_v10 = vld [vmem:[#allocation7 + $0xc8] sm:$0xff] }
 0x1db   : > { %v13693_v13 = vpack.c.bf16 %v644_v8, %v643_v9  ;;  %v607_v14 = vadd.f32 %v13656_v39, %v606_v12  ;;  %v729_v8 = vld [vmem:[#allocation8 + $0x8] sm:$0xff] }
 0x1dc   : > { %v646_v15 = vmax.f32 %v612_v11, 0.0  ;;  %v13797_v9 = vpack.c.bf16 %v729_v8, %v728_v7  ;;  %v2882_v11 = vld [vmem:[#allocation7 + $0xd0] sm:$0xff]  ;;  %v2883_v12 = vld [vmem:[#allocation7 + $0xd8] sm:$0xff] }
 0x1dd   : > { %v645_v16 = vmax.f32 %v607_v14, 0.0  ;;  %v8254_v17 = vpop.f32.mrb[12].mxu0  ;;  %10755 = vmatprep.subr.bf16.mxu1 %v13693_v13  ;;  %11267 = vmatprep.subr.bf16.mxu0 %v13693_v13  ;;  %v3054_v14 = vld [vmem:[#allocation7 + $0xe0] sm:$0xff]  ;;  %v1077_v7 = vld [vmem:[#allocation8 + $0x148] sm:$0xff]  ;;  %v3914_v8 = vld [vmem:[#allocation7 + $0x130] sm:$0xff] }
 0x1de   : > { %v622_v18 = vadd.f32 %v8254_v17, %v13656_v39  ;;  %v616_v19 = vpop.f32.mrb[13].mxu0  ;;  %10757 = vmatpush3.bf16.msra.mxu1 %v13693_v13  ;;  %11269 = vmatpush3.bf16.msra.mxu0 %v13693_v13 }
 0x1df   : > { %v13701_v20 = vpack.c.bf16 %v646_v15, %v645_v16  ;;  %v617_v21 = vadd.f32 %v13656_v39, %v616_v19  ;;  %v3055_v15 = vld [vmem:[#allocation7 + $0xe8] sm:$0xff]  ;;  %v3226_v16 = vld [vmem:[#allocation7 + $0xf0] sm:$0xff]  ;;  %v3227_v19 = vld [vmem:[#allocation7 + $0xf8] sm:$0xff] }
 0x1e0   : > { %v648_v22 = vmax.f32 %v622_v18, 0.0 }
 0x1e1   : > { %v647_v23 = vmax.f32 %v617_v21, 0.0  ;;  %v8257_v24 = vpop.f32.mrb[14].mxu0  ;;  %10759 = vmatprep.subr.bf16.mxu1 %v13701_v20  ;;  %11271 = vmatprep.subr.bf16.mxu0 %v13701_v20  ;;  %v3398_v21 = vld [vmem:[#allocation7 + $0x100] sm:$0xff] }
 0x1e2   : > { %v632_v25 = vadd.f32 %v8257_v24, %v13656_v39  ;;  %v626_v26 = vpop.f32.mrb[15].mxu0  ;;  %10761 = vmatpush3.bf16.msra.mxu1 %v13701_v20  ;;  %11273 = vmatpush3.bf16.msra.mxu0 %v13701_v20 }
 0x1e3   : > { %v13709_v27 = vpack.c.bf16 %v648_v22, %v647_v23  ;;  %v627_v28 = vadd.f32 %v13656_v39, %v626_v26  ;;  %v2367_v39 = vld [vmem:[#allocation7 + $0xa8] sm:$0xff]  ;;  %v730_v22 = vld [vmem:[#allocation8 + $0x10] sm:$0xff] }
 0x1e4   : > { %v650_v29 = vmax.f32 %v632_v25, 0.0  ;;  %v731_v23 = vld [vmem:[#allocation8 + $0x18] sm:$0xff] }
 0x1e5   : > { %v649_v30 = vmax.f32 %v627_v28, 0.0  ;;  %10763 = vmatprep.subr.bf16.mxu1 %v13709_v27  ;;  %11275 = vmatprep.subr.bf16.mxu0 %v13709_v27  ;;  %v10838_v26 = vpack.c.bf16 %v731_v23, %v730_v22  ;;  %v732_v28 = vld [vmem:[#allocation8 + $0x20] sm:$0xff]  ;;  %v4086_v22 = vld [vmem:[#allocation7 + $0x140] sm:$0xff]  ;;  %v4087_v23 = vld [vmem:[#allocation7 + $0x148] sm:$0xff] }
 0x1e6   : > { %10765 = vmatpush3.bf16.msra.mxu1 %v13709_v27  ;;  %11277 = vmatpush3.bf16.msra.mxu0 %v13709_v27 }
 0x1e7   : > { %v13716_v31 = vpack.c.bf16 %v650_v29, %v649_v30  ;;  %v733_v29 = vld [vmem:[#allocation8 + $0x28] sm:$0xff] }
 0x1e8   : > { %v10842_v30 = vpack.c.bf16 %v733_v29, %v732_v28  ;;  %v4431_v28 = vld [vmem:[#allocation7 + $0x168] sm:$0xff]  ;;  %v4602_v29 = vld [vmem:[#allocation7 + $0x170] sm:$0xff] }
 0x1e9   : > { %10767 = vmatprep.subr.bf16.mxu1 %v13716_v31  ;;  %11279 = vmatprep.subr.bf16.mxu0 %v13716_v31 }
 0x1ea   : > { %10769 = vmatpush3.bf16.msra.mxu1 %v13716_v31  ;;  %11281 = vmatpush3.bf16.msra.mxu0 %v13716_v31 }
 0x1eb   : > { %10771 = vmatprep.subr.bf16.mxu1 %v13661_v49  ;;  %11315 = vmatprep.subr.bf16.mxu0 %v13661_v49 }
 0x1ed   : > { %8291 = vmatmul.mubr.f32.vlgmr.msra.gmra.mrb[0].mxu1 %v652_v32  ;;  %8851 = vmatmul.mubr.f32.vlgmr.msra.gmra.mrb[16].mxu0 %v2023_v33  ;;  %v734_v32 = vld [vmem:[#allocation8 + $0x30] sm:$0xff]  ;;  %v735_v33 = vld [vmem:[#allocation8 + $0x38] sm:$0xff] }
 0x1ee   : > { %10773 = vmatpush3.bf16.msra.mxu1 %v13661_v49  ;;  %11317 = vmatpush3.bf16.msra.mxu0 %v13661_v49 }
 0x1ef   : > { %10775 = vmatprep.subr.bf16.mxu1 %v13669_v56  ;;  %11319 = vmatprep.subr.bf16.mxu0 %v13669_v56 }
 0x1f0   : > { %8325 = vmatprep.mubr.f32.mxu1 %v745_v34  ;;  %8920 = vmatprep.mubr.f32.mxu0 %v2194_v35  ;;  %v10846_v34 = vpack.c.bf16 %v735_v33, %v734_v32  ;;  %v3399_v35 = vld [vmem:[#allocation7 + $0x108] sm:$0xff]  ;;  %v4774_v32 = vld [vmem:[#allocation7 + $0x180] sm:$0xff] }
 0x1f1   : > { %v4775_v33 = vld [vmem:[#allocation7 + $0x188] sm:$0xff] }
 0x1f2   : > { %10777 = vmatpush3.bf16.msra.mxu1 %v13669_v56  ;;  %11321 = vmatpush3.bf16.msra.mxu0 %v13669_v56 }
 0x1f3   : > { %10779 = vmatprep.subr.bf16.mxu1 %v13677_v63  ;;  %11323 = vmatprep.subr.bf16.mxu0 %v13677_v63 }
 0x1f6   : > { %10781 = vmatpush3.bf16.msra.mxu1 %v13677_v63  ;;  %11325 = vmatpush3.bf16.msra.mxu0 %v13677_v63 }
 0x1f7   : > { %10783 = vmatprep.subr.bf16.mxu1 %v13685_v6  ;;  %11327 = vmatprep.subr.bf16.mxu0 %v13685_v6 }
 0x1fa   : > { %10785 = vmatpush3.bf16.msra.mxu1 %v13685_v6  ;;  %11329 = vmatpush3.bf16.msra.mxu0 %v13685_v6 }
 0x1fb   : > { %10787 = vmatprep.subr.bf16.mxu1 %v13693_v13  ;;  %11331 = vmatprep.subr.bf16.mxu0 %v13693_v13 }
 0x1fe   : > { %10789 = vmatpush3.bf16.msra.mxu1 %v13693_v13  ;;  %11333 = vmatpush3.bf16.msra.mxu0 %v13693_v13 }
 0x1ff   : > { %10791 = vmatprep.subr.bf16.mxu1 %v13701_v20  ;;  %11335 = vmatprep.subr.bf16.mxu0 %v13701_v20 }
 0x202   : > { %10793 = vmatpush3.bf16.msra.mxu1 %v13701_v20  ;;  %11337 = vmatpush3.bf16.msra.mxu0 %v13701_v20 }
 0x203   : > { %10795 = vmatprep.subr.bf16.mxu1 %v13709_v27  ;;  %11339 = vmatprep.subr.bf16.mxu0 %v13709_v27 }
 0x206   : > { %10797 = vmatpush3.bf16.msra.mxu1 %v13709_v27  ;;  %11341 = vmatpush3.bf16.msra.mxu0 %v13709_v27 }
 0x207   : > { %10799 = vmatprep.subr.bf16.mxu1 %v13716_v31  ;;  %11343 = vmatprep.subr.bf16.mxu0 %v13716_v31 }
 0x20a   : > { %10801 = vmatpush3.bf16.msra.mxu1 %v13716_v31  ;;  %11345 = vmatpush3.bf16.msra.mxu0 %v13716_v31 }
 0x20b   : > { %11379 = vmatprep.subr.bf16.mxu0 %v13661_v49  ;;  %10803 = vmatprep.subr.bf16.mxu1 %v10802_v43 }
 0x20d   : > { %8326 = vmatmul.mubr.f32.vlgmr.msra.gmra.mrb[2].mxu1 %v746_v36  ;;  %8921 = vmatmul.mubr.f32.vlgmr.msra.gmra.mrb[18].mxu0 %v2195_v37  ;;  %v736_v36 = vld [vmem:[#allocation8 + $0x40] sm:$0xff]  ;;  %v737_v37 = vld [vmem:[#allocation8 + $0x48] sm:$0xff] }
 0x20e   : > { %11381 = vmatpush3.bf16.msra.mxu0 %v13661_v49  ;;  %8990 = vmatprep.mubr.f32.mxu0 %v2366_v38  ;;  %v3570_v38 = vld [vmem:[#allocation7 + $0x110] sm:$0xff] }
 0x20f   : > { %11383 = vmatprep.subr.bf16.mxu0 %v13669_v56  ;;  %10805 = vmatpush3.bf16.msra.mxu1 %v10802_v43  ;;  %v740_v43 = vld [vmem:[#allocation8 + $0x60] sm:$0xff] }
 0x210   : > { %10807 = vmatprep.subr.bf16.mxu1 %v10806_v46  ;;  %v10858_v45 = vpack.c.bf16 %v741_v44, %v740_v43  ;;  %v1243_v43 = vld [vmem:[#allocation8 + $0x198] sm:$0xff]  ;;  %v1163_v44 = vld [vmem:[#allocation7 + $0x38] sm:$0xff] }
 0x212   : > { %11385 = vmatpush3.bf16.msra.mxu0 %v13669_v56 }
 0x213   : > { %11387 = vmatprep.subr.bf16.mxu0 %v13677_v63  ;;  %10809 = vmatpush3.bf16.msra.mxu1 %v10806_v46  ;;  %v742_v46 = vld [vmem:[#allocation8 + $0x70] sm:$0xff] }
 0x214   : > { %10811 = vmatprep.subr.bf16.mxu1 %v10810_v50  ;;  %v10862_v48 = vpack.c.bf16 %v743_v47, %v742_v46  ;;  %v1244_v46 = vld [vmem:[#allocation8 + $0x1a0] sm:$0xff]  ;;  %v1245_v47 = vld [vmem:[#allocation8 + $0x1a8] sm:$0xff] }
 0x216   : > { %11389 = vmatpush3.bf16.msra.mxu0 %v13677_v63 }
 0x217   : > { %11391 = vmatprep.subr.bf16.mxu0 %v13685_v6  ;;  %10813 = vmatpush3.bf16.msra.mxu1 %v10810_v50  ;;  %v990_v50 = vld [vmem:[#allocation7 + $0x20] sm:$0xff] }
 0x218   : > { %10815 = vmatprep.subr.bf16.mxu1 %v10814_v55 }
 0x21a   : > { %11393 = vmatpush3.bf16.msra.mxu0 %v13685_v6 }
 0x21b   : > { %11395 = vmatprep.subr.bf16.mxu0 %v13693_v13  ;;  %10817 = vmatpush3.bf16.msra.mxu1 %v10814_v55  ;;  %v10898_v55 = vpack.c.bf16 %v1069_v54, %v1068_v53  ;;  %v1248_v53 = vld [vmem:[#allocation8 + $0x1c0] sm:$0xff]  ;;  %v1249_v54 = vld [vmem:[#allocation8 + $0x1c8] sm:$0xff] }
 0x21c   : > { %10819 = vmatprep.subr.bf16.mxu1 %v10818_v59 }
 0x21e   : > { %11397 = vmatpush3.bf16.msra.mxu0 %v13693_v13 }
 0x21f   : > { %11399 = vmatprep.subr.bf16.mxu0 %v13701_v20  ;;  %10821 = vmatpush3.bf16.msra.mxu1 %v10818_v59  ;;  %v991_v59 = vld [vmem:[#allocation7 + $0x28] sm:$0xff] }
 0x220   : > { %10823 = vmatprep.subr.bf16.mxu1 %v10822_v62 }
 0x222   : > { %11401 = vmatpush3.bf16.msra.mxu0 %v13701_v20 }
 0x223   : > { %11403 = vmatprep.subr.bf16.mxu0 %v13709_v27  ;;  %10825 = vmatpush3.bf16.msra.mxu1 %v10822_v62  ;;  %v1073_v62 = vld [vmem:[#allocation8 + $0x128] sm:$0xff] }
 0x224   : > { %10827 = vmatprep.subr.bf16.mxu1 %v10826_v2  ;;  %v10906_v0 = vpack.c.bf16 %v1073_v62, %v1072_v61  ;;  %v1253_v61 = vld [vmem:[#allocation8 + $0x1e8] sm:$0xff] }
 0x226   : > { %11405 = vmatpush3.bf16.msra.mxu0 %v13709_v27 }
 0x227   : > { %11407 = vmatprep.subr.bf16.mxu0 %v13716_v31  ;;  %10829 = vmatpush3.bf16.msra.mxu1 %v10826_v2  ;;  %v1075_v2 = vld [vmem:[#allocation8 + $0x138] sm:$0xff] }
 0x228   : > { %10831 = vmatprep.subr.bf16.mxu1 %v10830_v5  ;;  %v10910_v3 = vpack.c.bf16 %v1075_v2, %v1074_v1  ;;  %v1255_v1 = vld [vmem:[#allocation8 + $0x1f8] sm:$0xff] }
 0x22a   : > { %11409 = vmatpush3.bf16.msra.mxu0 %v13716_v31 }
 0x22b   : > { %11443 = vmatprep.subr.bf16.mxu0 %v13661_v49  ;;  %10833 = vmatpush3.bf16.msra.mxu1 %v10830_v5  ;;  %v1076_v5 = vld [vmem:[#allocation8 + $0x140] sm:$0xff] }
 0x22c   : > { %10835 = vmatprep.subr.bf16.mxu1 %v13797_v9 }
 0x22d   : > { %8991 = vmatmul.mubr.f32.vlgmr.msra.gmra.mrb[20].mxu0 %v2367_v39  ;;  %v10850_v39 = vpack.c.bf16 %v737_v37, %v736_v36  ;;  %v1162_v37 = vld [vmem:[#allocation7 + $0x30] sm:$0xff] }
 0x22e   : > { %11445 = vmatpush3.bf16.msra.mxu0 %v13661_v49  ;;  %9060 = vmatprep.mubr.f32.mxu0 %v2538_v40  ;;  %v738_v40 = vld [vmem:[#allocation8 + $0x50] sm:$0xff] }
 0x22f   : > { %11447 = vmatprep.subr.bf16.mxu0 %v13669_v56  ;;  %v10854_v42 = vpack.c.bf16 %v739_v41, %v738_v40  ;;  %v1241_v40 = vld [vmem:[#allocation8 + $0x188] sm:$0xff] }
 0x232   : > { %11449 = vmatpush3.bf16.msra.mxu0 %v13669_v56 }
 0x233   : > { %11451 = vmatprep.subr.bf16.mxu0 %v13677_v63 }
 0x236   : > { %11453 = vmatpush3.bf16.msra.mxu0 %v13677_v63 }
 0x237   : > { %11455 = vmatprep.subr.bf16.mxu0 %v13685_v6 }
 0x23a   : > { %11457 = vmatpush3.bf16.msra.mxu0 %v13685_v6 }
 0x23b   : > { %11459 = vmatprep.subr.bf16.mxu0 %v13693_v13 }
 0x23e   : > { %11461 = vmatpush3.bf16.msra.mxu0 %v13693_v13 }
 0x23f   : > { %11463 = vmatprep.subr.bf16.mxu0 %v13701_v20 }
 0x242   : > { %11465 = vmatpush3.bf16.msra.mxu0 %v13701_v20 }
 0x243   : > { %11467 = vmatprep.subr.bf16.mxu0 %v13709_v27 }
 0x246   : > { %11469 = vmatpush3.bf16.msra.mxu0 %v13709_v27 }
 0x247   : > { %11471 = vmatprep.subr.bf16.mxu0 %v13716_v31 }
 0x24a   : > { %11473 = vmatpush3.bf16.msra.mxu0 %v13716_v31 }
 0x24b   : > { %11507 = vmatprep.subr.bf16.mxu0 %v13661_v49 }
 0x24d   : > { %9061 = vmatmul.mubr.f32.vlgmr.msra.gmra.mrb[22].mxu0 %v2539_v51  ;;  %v3571_v51 = vld [vmem:[#allocation7 + $0x118] sm:$0xff] }
 0x24e   : > { %11509 = vmatpush3.bf16.msra.mxu0 %v13661_v49  ;;  %9130 = vmatprep.mubr.f32.mxu0 %v2710_v52  ;;  %v3742_v52 = vld [vmem:[#allocation7 + $0x120] sm:$0xff] }
 0x24f   : > { %11511 = vmatprep.subr.bf16.mxu0 %v13669_v56 }
 0x252   : > { %11513 = vmatpush3.bf16.msra.mxu0 %v13669_v56 }
 0x253   : > { %11515 = vmatprep.subr.bf16.mxu0 %v13677_v63 }
 0x256   : > { %11517 = vmatpush3.bf16.msra.mxu0 %v13677_v63 }
 0x257   : > { %11519 = vmatprep.subr.bf16.mxu0 %v13685_v6 }
 0x25a   : > { %11521 = vmatpush3.bf16.msra.mxu0 %v13685_v6 }
 0x25b   : > { %11523 = vmatprep.subr.bf16.mxu0 %v13693_v13 }
 0x25e   : > { %11525 = vmatpush3.bf16.msra.mxu0 %v13693_v13 }
 0x25f   : > { %11527 = vmatprep.subr.bf16.mxu0 %v13701_v20 }
 0x262   : > { %11529 = vmatpush3.bf16.msra.mxu0 %v13701_v20 }
 0x263   : > { %11531 = vmatprep.subr.bf16.mxu0 %v13709_v27 }
 0x266   : > { %11533 = vmatpush3.bf16.msra.mxu0 %v13709_v27 }
 0x267   : > { %11535 = vmatprep.subr.bf16.mxu0 %v13716_v31 }
 0x26a   : > { %11537 = vmatpush3.bf16.msra.mxu0 %v13716_v31 }
 0x26b   : > { %11571 = vmatprep.subr.bf16.mxu0 %v13661_v49 }
 0x26d   : > { %9131 = vmatmul.mubr.f32.vlgmr.msra.gmra.mrb[24].mxu0 %v2711_v10  ;;  %v1078_v10 = vld [vmem:[#allocation8 + $0x150] sm:$0xff] }
 0x26e   : > { %11573 = vmatpush3.bf16.msra.mxu0 %v13661_v49  ;;  %9200 = vmatprep.mubr.f32.mxu0 %v2882_v11  ;;  %v1079_v11 = vld [vmem:[#allocation8 + $0x158] sm:$0xff] }
 0x26f   : > { %11575 = vmatprep.subr.bf16.mxu0 %v13669_v56 }
 0x272   : > { %11577 = vmatpush3.bf16.msra.mxu0 %v13669_v56 }
 0x273   : > { %11579 = vmatprep.subr.bf16.mxu0 %v13677_v63 }
 0x276   : > { %11581 = vmatpush3.bf16.msra.mxu0 %v13677_v63 }
 0x277   : > { %11583 = vmatprep.subr.bf16.mxu0 %v13685_v6 }
 0x27a   : > { %11585 = vmatpush3.bf16.msra.mxu0 %v13685_v6 }
 0x27b   : > { %11587 = vmatprep.subr.bf16.mxu0 %v13693_v13 }
 0x27e   : > { %11589 = vmatpush3.bf16.msra.mxu0 %v13693_v13 }
 0x27f   : > { %11591 = vmatprep.subr.bf16.mxu0 %v13701_v20 }
 0x282   : > { %11593 = vmatpush3.bf16.msra.mxu0 %v13701_v20 }
 0x283   : > { %11595 = vmatprep.subr.bf16.mxu0 %v13709_v27 }
 0x286   : > { %11597 = vmatpush3.bf16.msra.mxu0 %v13709_v27 }
 0x287   : > { %11599 = vmatprep.subr.bf16.mxu0 %v13716_v31 }
 0x28a   : > { %11601 = vmatpush3.bf16.msra.mxu0 %v13716_v31 }
 0x28b   : > { %11635 = vmatprep.subr.bf16.mxu0 %v13661_v49 }
 0x28d   : > { %9201 = vmatmul.mubr.f32.vlgmr.msra.gmra.mrb[26].mxu0 %v2883_v12  ;;  %v10918_v12 = vpack.c.bf16 %v1079_v11, %v1078_v10  ;;  %v1414_v10 = vld [vmem:[#allocation8 + $0x210] sm:$0xff]  ;;  %v1415_v11 = vld [vmem:[#allocation8 + $0x218] sm:$0xff] }
 0x28e   : > { %11637 = vmatpush3.bf16.msra.mxu0 %v13661_v49  ;;  %9270 = vmatprep.mubr.f32.mxu0 %v3054_v14  ;;  %v1080_v14 = vld [vmem:[#allocation8 + $0x160] sm:$0xff] }
 0x28f   : > { %11639 = vmatprep.subr.bf16.mxu0 %v13669_v56 }
 0x292   : > { %11641 = vmatpush3.bf16.msra.mxu0 %v13669_v56 }
 0x293   : > { %11643 = vmatprep.subr.bf16.mxu0 %v13677_v63 }
 0x296   : > { %11645 = vmatpush3.bf16.msra.mxu0 %v13677_v63 }
 0x297   : > { %11647 = vmatprep.subr.bf16.mxu0 %v13685_v6 }
 0x29a   : > { %11649 = vmatpush3.bf16.msra.mxu0 %v13685_v6 }
 0x29b   : > { %11651 = vmatprep.subr.bf16.mxu0 %v13693_v13 }
 0x29e   : > { %11653 = vmatpush3.bf16.msra.mxu0 %v13693_v13 }
 0x29f   : > { %11655 = vmatprep.subr.bf16.mxu0 %v13701_v20 }
 0x2a2   : > { %11657 = vmatpush3.bf16.msra.mxu0 %v13701_v20 }
 0x2a3   : > { %11659 = vmatprep.subr.bf16.mxu0 %v13709_v27 }
 0x2a6   : > { %11661 = vmatpush3.bf16.msra.mxu0 %v13709_v27 }
 0x2a7   : > { %11663 = vmatprep.subr.bf16.mxu0 %v13716_v31 }
 0x2aa   : > { %11665 = vmatpush3.bf16.msra.mxu0 %v13716_v31 }
 0x2ab   : > { %11699 = vmatprep.subr.bf16.mxu0 %v13661_v49 }
 0x2ad   : > { %9271 = vmatmul.mubr.f32.vlgmr.msra.gmra.mrb[28].mxu0 %v3055_v15  ;;  %v1081_v15 = vld [vmem:[#allocation8 + $0x168] sm:$0xff] }
 0x2ae   : > { %11701 = vmatpush3.bf16.msra.mxu0 %v13661_v49  ;;  %9340 = vmatprep.mubr.f32.mxu0 %v3226_v16  ;;  %v10922_v16 = vpack.c.bf16 %v1081_v15, %v1080_v14  ;;  %v11030_v14 = vpack.c.bf16 %v1415_v11, %v1414_v10  ;;  %v1416_v15 = vld [vmem:[#allocation8 + $0x220] sm:$0xff]  ;;  %v1758_v10 = vld [vmem:[#allocation8 + $0x310] sm:$0xff]  ;;  %v1759_v11 = vld [vmem:[#allocation8 + $0x318] sm:$0xff] }
 0x2af   : > { %11703 = vmatprep.subr.bf16.mxu0 %v13669_v56 }
 0x2b2   : > { %11705 = vmatpush3.bf16.msra.mxu0 %v13669_v56 }
 0x2b3   : > { %11707 = vmatprep.subr.bf16.mxu0 %v13677_v63 }
 0x2b6   : > { %11709 = vmatpush3.bf16.msra.mxu0 %v13677_v63 }
 0x2b7   : > { %11711 = vmatprep.subr.bf16.mxu0 %v13685_v6 }
 0x2ba   : > { %11713 = vmatpush3.bf16.msra.mxu0 %v13685_v6 }
 0x2bb   : > { %11715 = vmatprep.subr.bf16.mxu0 %v13693_v13 }
 0x2be   : > { %11717 = vmatpush3.bf16.msra.mxu0 %v13693_v13 }
 0x2bf   : > { %11719 = vmatprep.subr.bf16.mxu0 %v13701_v20 }
 0x2c0   : > { %v13848_v17 = vpop.f32.mrb[0].mxu1 }
 0x2c1   : > { %v719_v18 = vpop.f32.mrb[1].mxu1 }
 0x2c2   : > { %11721 = vmatpush3.bf16.msra.mxu0 %v13701_v20 }
 0x2c3   : > { %11723 = vmatprep.subr.bf16.mxu0 %v13709_v27 }
 0x2c6   : > { %11725 = vmatpush3.bf16.msra.mxu0 %v13709_v27 }
 0x2c7   : > { %11727 = vmatprep.subr.bf16.mxu0 %v13716_v31 }
 0x2ca   : > { %11729 = vmatpush3.bf16.msra.mxu0 %v13716_v31 }
 0x2cb   : > { %11763 = vmatprep.subr.bf16.mxu0 %v13661_v49 }
 0x2cd   : > { %9341 = vmatmul.mubr.f32.vlgmr.msra.gmra.mrb[30].mxu0 %v3227_v19 }
 0x2ce   : > { %11765 = vmatpush3.bf16.msra.mxu0 %v13661_v49  ;;  %9410 = vmatprep.mubr.f32.mxu0 %v3398_v21  ;;  %v3915_v21 = vld [vmem:[#allocation7 + $0x138] sm:$0xff] }
 0x2cf   : > { %11767 = vmatprep.subr.bf16.mxu0 %v13669_v56 }
 0x2d2   : > { %11769 = vmatpush3.bf16.msra.mxu0 %v13669_v56 }
 0x2d3   : > { %11771 = vmatprep.subr.bf16.mxu0 %v13677_v63 }
 0x2d6   : > { %11773 = vmatpush3.bf16.msra.mxu0 %v13677_v63 }
 0x2d7   : > { %11775 = vmatprep.subr.bf16.mxu0 %v13685_v6 }
 0x2da   : > { %11777 = vmatpush3.bf16.msra.mxu0 %v13685_v6 }
 0x2db   : > { %11779 = vmatprep.subr.bf16.mxu0 %v13693_v13 }
 0x2de   : > { %11781 = vmatpush3.bf16.msra.mxu0 %v13693_v13 }
 0x2df   : > { %11783 = vmatprep.subr.bf16.mxu0 %v13701_v20 }
 0x2e0   : > { %v8327_v24 = vpop.f32.mrb[2].mxu1 }
 0x2e1   : > { %v813_v25 = vpop.f32.mrb[3].mxu1 }
 0x2e2   : > { %8360 = vmatprep.mubr.f32.mxu1 %v813_v25  ;;  %11785 = vmatpush3.bf16.msra.mxu0 %v13701_v20  ;;  %v4259_v25 = vld [vmem:[#allocation7 + $0x158] sm:$0xff] }
 0x2e3   : > { %8361 = vmatmul.mubr.f32.vlgmr.msra.gmra.mrb[4].mxu1 %v8327_v24  ;;  %11787 = vmatprep.subr.bf16.mxu0 %v13709_v27  ;;  %v4258_v24 = vld [vmem:[#allocation7 + $0x150] sm:$0xff] }
 0x2e4   : > { %10837 = vmatpush3.bf16.msra.mxu1 %v13797_v9  ;;  %8395 = vmatprep.mubr.f32.mxu1 %v719_v18  ;;  %v10914_v9 = vpack.c.bf16 %v1077_v7, %v1076_v5  ;;  %v1083_v18 = vld [vmem:[#allocation8 + $0x178] sm:$0xff]  ;;  %v1334_v5 = vld [vmem:[#allocation7 + $0x40] sm:$0xff]  ;;  %v1412_v7 = vld [vmem:[#allocation8 + $0x200] sm:$0xff] }
 0x2e5   : > { %10839 = vmatprep.subr.bf16.mxu1 %v10838_v26 }
 0x2e6   : > { %11789 = vmatpush3.bf16.msra.mxu0 %v13709_v27 }
 0x2e7   : > { %11791 = vmatprep.subr.bf16.mxu0 %v13716_v31 }
 0x2e8   : > { %10841 = vmatpush3.bf16.msra.mxu1 %v10838_v26  ;;  %v4430_v26 = vld [vmem:[#allocation7 + $0x160] sm:$0xff] }
 0x2e9   : > { %10843 = vmatprep.subr.bf16.mxu1 %v10842_v30 }
 0x2ea   : > { %11793 = vmatpush3.bf16.msra.mxu0 %v13716_v31 }
 0x2eb   : > { %11827 = vmatprep.subr.bf16.mxu0 %v13661_v49 }
 0x2ec   : > { %10845 = vmatpush3.bf16.msra.mxu1 %v10842_v30  ;;  %v4603_v30 = vld [vmem:[#allocation7 + $0x178] sm:$0xff] }
 0x2ed   : > { %10847 = vmatprep.subr.bf16.mxu1 %v10846_v34  ;;  %9411 = vmatmul.mubr.f32.vlgmr.msra.gmra.mrb[32].mxu0 %v3399_v35 }
 0x2ee   : > { %11829 = vmatpush3.bf16.msra.mxu0 %v13661_v49  ;;  %9480 = vmatprep.mubr.f32.mxu0 %v3570_v38  ;;  %v4947_v38 = vld [vmem:[#allocation7 + $0x198] sm:$0xff] }
 0x2ef   : > { %11831 = vmatprep.subr.bf16.mxu0 %v13669_v56 }
 0x2f0   : > { %10849 = vmatpush3.bf16.msra.mxu1 %v10846_v34  ;;  %v4946_v34 = vld [vmem:[#allocation7 + $0x190] sm:$0xff] }
 0x2f1   : > { %10851 = vmatprep.subr.bf16.mxu1 %v10850_v39 }
 0x2f2   : > { %11833 = vmatpush3.bf16.msra.mxu0 %v13669_v56 }
 0x2f3   : > { %11835 = vmatprep.subr.bf16.mxu0 %v13677_v63 }
 0x2f4   : > { %10853 = vmatpush3.bf16.msra.mxu1 %v10850_v39  ;;  %v1240_v39 = vld [vmem:[#allocation8 + $0x180] sm:$0xff] }
 0x2f5   : > { %10855 = vmatprep.subr.bf16.mxu1 %v10854_v42  ;;  %v10962_v41 = vpack.c.bf16 %v1241_v40, %v1240_v39  ;;  %v1584_v39 = vld [vmem:[#allocation8 + $0x280] sm:$0xff]  ;;  %v1585_v40 = vld [vmem:[#allocation8 + $0x288] sm:$0xff] }
 0x2f6   : > { %11837 = vmatpush3.bf16.msra.mxu0 %v13677_v63 }
 0x2f7   : > { %11839 = vmatprep.subr.bf16.mxu0 %v13685_v6 }
 0x2f8   : > { %10857 = vmatpush3.bf16.msra.mxu1 %v10854_v42  ;;  %v1242_v42 = vld [vmem:[#allocation8 + $0x190] sm:$0xff] }
 0x2f9   : > { %10859 = vmatprep.subr.bf16.mxu1 %v10858_v45 }
 0x2fa   : > { %11841 = vmatpush3.bf16.msra.mxu0 %v13685_v6 }
 0x2fb   : > { %11843 = vmatprep.subr.bf16.mxu0 %v13693_v13 }
 0x2fc   : > { %10861 = vmatpush3.bf16.msra.mxu1 %v10858_v45  ;;  %v10966_v45 = vpack.c.bf16 %v1243_v43, %v1242_v42  ;;  %v1586_v42 = vld [vmem:[#allocation8 + $0x290] sm:$0xff]  ;;  %v1587_v43 = vld [vmem:[#allocation8 + $0x298] sm:$0xff] }
 0x2fd   : > { %10863 = vmatprep.subr.bf16.mxu1 %v10862_v48 }
 0x2fe   : > { %11845 = vmatpush3.bf16.msra.mxu0 %v13693_v13 }
 0x2ff   : > { %11847 = vmatprep.subr.bf16.mxu0 %v13701_v20 }
 0x300   : > { %10865 = vmatpush3.bf16.msra.mxu1 %v10862_v48  ;;  %v10970_v48 = vpack.c.bf16 %v1245_v47, %v1244_v46  ;;  %v1588_v46 = vld [vmem:[#allocation8 + $0x2a0] sm:$0xff]  ;;  %v1589_v47 = vld [vmem:[#allocation8 + $0x2a8] sm:$0xff] }
 0x301   : > { %10867 = vmatprep.subr.bf16.mxu1 %v13661_v49 }
 0x302   : > { %11849 = vmatpush3.bf16.msra.mxu0 %v13701_v20 }
 0x303   : > { %8396 = vmatmul.mubr.f32.vlgmr.msra.gmra.mrb[4].mxu1 %v13848_v17  ;;  %11851 = vmatprep.subr.bf16.mxu0 %v13709_v27  ;;  %v1082_v17 = vld [vmem:[#allocation8 + $0x170] sm:$0xff] }
 0x304   : > { %10869 = vmatpush3.bf16.msra.mxu1 %v13661_v49  ;;  %8430 = vmatprep.mubr.f32.mxu1 %v990_v50  ;;  %v10926_v19 = vpack.c.bf16 %v1083_v18, %v1082_v17  ;;  %v1246_v50 = vld [vmem:[#allocation8 + $0x1b0] sm:$0xff] }
 0x305   : > { %10871 = vmatprep.subr.bf16.mxu1 %v13669_v56  ;;  %v1418_v18 = vld [vmem:[#allocation8 + $0x230] sm:$0xff] }
 0x306   : > { %11853 = vmatpush3.bf16.msra.mxu0 %v13709_v27 }
 0x307   : > { %11855 = vmatprep.subr.bf16.mxu0 %v13716_v31 }
 0x308   : > { %10873 = vmatpush3.bf16.msra.mxu1 %v13669_v56 }
 0x309   : > { %10875 = vmatprep.subr.bf16.mxu1 %v13677_v63 }
 0x30a   : > { %11857 = vmatpush3.bf16.msra.mxu0 %v13716_v31 }
 0x30b   : > { %11891 = vmatprep.subr.bf16.mxu0 %v13661_v49 }
 0x30c   : > { %10877 = vmatpush3.bf16.msra.mxu1 %v13677_v63 }
 0x30d   : > { %10879 = vmatprep.subr.bf16.mxu1 %v13685_v6  ;;  %9481 = vmatmul.mubr.f32.vlgmr.msra.gmra.mrb[34].mxu0 %v3571_v51  ;;  %v1247_v51 = vld [vmem:[#allocation8 + $0x1b8] sm:$0xff] }
 0x30e   : > { %11893 = vmatpush3.bf16.msra.mxu0 %v13661_v49  ;;  %9550 = vmatprep.mubr.f32.mxu0 %v3742_v52  ;;  %v10974_v52 = vpack.c.bf16 %v1247_v51, %v1246_v50  ;;  %v1590_v50 = vld [vmem:[#allocation8 + $0x2b0] sm:$0xff]  ;;  %v1591_v51 = vld [vmem:[#allocation8 + $0x2b8] sm:$0xff] }
 0x30f   : > { %11895 = vmatprep.subr.bf16.mxu0 %v13669_v56 }
 0x310   : > { %10881 = vmatpush3.bf16.msra.mxu1 %v13685_v6 }
 0x311   : > { %10883 = vmatprep.subr.bf16.mxu1 %v13693_v13 }
 0x312   : > { %11897 = vmatpush3.bf16.msra.mxu0 %v13669_v56 }
 0x313   : > { %11899 = vmatprep.subr.bf16.mxu0 %v13677_v63 }
 0x314   : > { %10885 = vmatpush3.bf16.msra.mxu1 %v13693_v13 }
 0x315   : > { %10887 = vmatprep.subr.bf16.mxu1 %v13701_v20 }
 0x316   : > { %11901 = vmatpush3.bf16.msra.mxu0 %v13677_v63 }
 0x317   : > { %11903 = vmatprep.subr.bf16.mxu0 %v13685_v6 }
 0x318   : > { %10889 = vmatpush3.bf16.msra.mxu1 %v13701_v20 }
 0x319   : > { %10891 = vmatprep.subr.bf16.mxu1 %v13709_v27 }
 0x31a   : > { %11905 = vmatpush3.bf16.msra.mxu0 %v13685_v6 }
 0x31b   : > { %11907 = vmatprep.subr.bf16.mxu0 %v13693_v13 }
 0x31c   : > { %10893 = vmatpush3.bf16.msra.mxu1 %v13709_v27 }
 0x31d   : > { %10895 = vmatprep.subr.bf16.mxu1 %v13716_v31 }
 0x31e   : > { %11909 = vmatpush3.bf16.msra.mxu0 %v13693_v13 }
 0x31f   : > { %11911 = vmatprep.subr.bf16.mxu0 %v13701_v20 }
 0x320   : > { %10897 = vmatpush3.bf16.msra.mxu1 %v13716_v31 }
 0x321   : > { %10899 = vmatprep.subr.bf16.mxu1 %v10898_v55 }
 0x322   : > { %11913 = vmatpush3.bf16.msra.mxu0 %v13701_v20 }
 0x323   : > { %8431 = vmatmul.mubr.f32.vlgmr.msra.gmra.mrb[6].mxu1 %v991_v59  ;;  %11915 = vmatprep.subr.bf16.mxu0 %v13709_v27  ;;  %v10982_v59 = vpack.c.bf16 %v1251_v58, %v1250_v57  ;;  %v1594_v57 = vld [vmem:[#allocation8 + $0x2d0] sm:$0xff]  ;;  %v1595_v58 = vld [vmem:[#allocation8 + $0x2d8] sm:$0xff] }
 0x324   : > { %10901 = vmatpush3.bf16.msra.mxu1 %v10898_v55  ;;  %v10978_v55 = vpack.c.bf16 %v1249_v54, %v1248_v53  ;;  %v1592_v53 = vld [vmem:[#allocation8 + $0x2c0] sm:$0xff]  ;;  %v1593_v54 = vld [vmem:[#allocation8 + $0x2c8] sm:$0xff] }
 0x325   : > { %10903 = vmatprep.subr.bf16.mxu1 %v10902_v60 }
 0x326   : > { %11917 = vmatpush3.bf16.msra.mxu0 %v13709_v27 }
 0x327   : > { %11919 = vmatprep.subr.bf16.mxu0 %v13716_v31 }
 0x328   : > { %10905 = vmatpush3.bf16.msra.mxu1 %v10902_v60  ;;  %v1252_v60 = vld [vmem:[#allocation8 + $0x1e0] sm:$0xff] }
 0x329   : > { %10907 = vmatprep.subr.bf16.mxu1 %v10906_v0  ;;  %v10986_v62 = vpack.c.bf16 %v1253_v61, %v1252_v60  ;;  %v1596_v60 = vld [vmem:[#allocation8 + $0x2e0] sm:$0xff]  ;;  %v1597_v61 = vld [vmem:[#allocation8 + $0x2e8] sm:$0xff] }
 0x32a   : > { %11921 = vmatpush3.bf16.msra.mxu0 %v13716_v31 }
 0x32b   : > { %11955 = vmatprep.subr.bf16.mxu0 %v13661_v49 }
 0x32c   : > { %10909 = vmatpush3.bf16.msra.mxu1 %v10906_v0  ;;  %v1254_v0 = vld [vmem:[#allocation8 + $0x1f0] sm:$0xff] }
 0x32d   : > { %10911 = vmatprep.subr.bf16.mxu1 %v10910_v3  ;;  %9551 = vmatmul.mubr.f32.vlgmr.msra.gmra.mrb[36].mxu0 %v3743_v4  ;;  %v10990_v2 = vpack.c.bf16 %v1255_v1, %v1254_v0  ;;  %v1598_v0 = vld [vmem:[#allocation8 + $0x2f0] sm:$0xff]  ;;  %v1599_v1 = vld [vmem:[#allocation8 + $0x2f8] sm:$0xff] }
 0x32e   : > { %11957 = vmatpush3.bf16.msra.mxu0 %v13661_v49  ;;  %9620 = vmatprep.mubr.f32.mxu0 %v3914_v8  ;;  %v1413_v8 = vld [vmem:[#allocation8 + $0x208] sm:$0xff] }
 0x32f   : > { %11959 = vmatprep.subr.bf16.mxu0 %v13669_v56 }
 0x330   : > { %10913 = vmatpush3.bf16.msra.mxu1 %v10910_v3 }
 0x331   : > { %10915 = vmatprep.subr.bf16.mxu1 %v10914_v9 }
 0x332   : > { %11961 = vmatpush3.bf16.msra.mxu0 %v13669_v56 }
 0x333   : > { %11963 = vmatprep.subr.bf16.mxu0 %v13677_v63 }
 0x334   : > { %10917 = vmatpush3.bf16.msra.mxu1 %v10914_v9  ;;  %v11026_v9 = vpack.c.bf16 %v1413_v8, %v1412_v7  ;;  %v1756_v7 = vld [vmem:[#allocation8 + $0x300] sm:$0xff]  ;;  %v1757_v8 = vld [vmem:[#allocation8 + $0x308] sm:$0xff] }
 0x335   : > { %10919 = vmatprep.subr.bf16.mxu1 %v10918_v12 }
 0x336   : > { %11965 = vmatpush3.bf16.msra.mxu0 %v13677_v63 }
 0x337   : > { %11967 = vmatprep.subr.bf16.mxu0 %v13685_v6 }
 0x338   : > { %10921 = vmatpush3.bf16.msra.mxu1 %v10918_v12  ;;  %v1335_v12 = vld [vmem:[#allocation7 + $0x48] sm:$0xff] }
 0x339   : > { %10923 = vmatprep.subr.bf16.mxu1 %v10922_v16 }
 0x33a   : > { %11969 = vmatpush3.bf16.msra.mxu0 %v13685_v6 }
 0x33b   : > { %11971 = vmatprep.subr.bf16.mxu0 %v13693_v13 }
 0x33c   : > { %10925 = vmatpush3.bf16.msra.mxu1 %v10922_v16  ;;  %v1417_v16 = vld [vmem:[#allocation8 + $0x228] sm:$0xff] }
 0x33d   : > { %10927 = vmatprep.subr.bf16.mxu1 %v10926_v19  ;;  %v11034_v17 = vpack.c.bf16 %v1417_v16, %v1416_v15  ;;  %v1760_v15 = vld [vmem:[#allocation8 + $0x320] sm:$0xff]  ;;  %v1761_v16 = vld [vmem:[#allocation8 + $0x328] sm:$0xff] }
 0x33e   : > { %11973 = vmatpush3.bf16.msra.mxu0 %v13693_v13 }
 0x33f   : > { %11975 = vmatprep.subr.bf16.mxu0 %v13701_v20 }
 0x340   : > { %10929 = vmatpush3.bf16.msra.mxu1 %v10926_v19  ;;  %v1419_v19 = vld [vmem:[#allocation8 + $0x238] sm:$0xff] }
 0x341   : > { %10931 = vmatprep.subr.bf16.mxu1 %v13661_v49 }
 0x342   : > { %11977 = vmatpush3.bf16.msra.mxu0 %v13701_v20 }
 0x343   : > { %11979 = vmatprep.subr.bf16.mxu0 %v13709_v27 }
 0x346   : > { %11981 = vmatpush3.bf16.msra.mxu0 %v13709_v27 }
 0x347   : > { %11983 = vmatprep.subr.bf16.mxu0 %v13716_v31 }
 0x34a   : > { %11985 = vmatpush3.bf16.msra.mxu0 %v13716_v31 }
 0x34b   : > { %12019 = vmatprep.subr.bf16.mxu0 %v13661_v49 }
 0x34d   : > { %9621 = vmatmul.mubr.f32.vlgmr.msra.gmra.mrb[38].mxu0 %v3915_v21  ;;  %v11038_v21 = vpack.c.bf16 %v1419_v19, %v1418_v18  ;;  %v1762_v18 = vld [vmem:[#allocation8 + $0x330] sm:$0xff]  ;;  %v1763_v19 = vld [vmem:[#allocation8 + $0x338] sm:$0xff] }
 0x34e   : > { %12021 = vmatpush3.bf16.msra.mxu0 %v13661_v49  ;;  %9690 = vmatprep.mubr.f32.mxu0 %v4086_v22  ;;  %v1420_v22 = vld [vmem:[#allocation8 + $0x240] sm:$0xff] }
 0x34f   : > { %12023 = vmatprep.subr.bf16.mxu0 %v13669_v56 }
 0x352   : > { %12025 = vmatpush3.bf16.msra.mxu0 %v13669_v56 }
 0x353   : > { %12027 = vmatprep.subr.bf16.mxu0 %v13677_v63 }
 0x356   : > { %12029 = vmatpush3.bf16.msra.mxu0 %v13677_v63 }
 0x357   : > { %12031 = vmatprep.subr.bf16.mxu0 %v13685_v6 }
 0x35a   : > { %12033 = vmatpush3.bf16.msra.mxu0 %v13685_v6 }
 0x35b   : > { %12035 = vmatprep.subr.bf16.mxu0 %v13693_v13 }
 0x35e   : > { %12037 = vmatpush3.bf16.msra.mxu0 %v13693_v13 }
 0x35f   : > { %12039 = vmatprep.subr.bf16.mxu0 %v13701_v20 }
 0x362   : > { %12041 = vmatpush3.bf16.msra.mxu0 %v13701_v20 }
 0x363   : > { %12043 = vmatprep.subr.bf16.mxu0 %v13709_v27 }
 0x366   : > { %12045 = vmatpush3.bf16.msra.mxu0 %v13709_v27 }
 0x367   : > { %12047 = vmatprep.subr.bf16.mxu0 %v13716_v31 }
 0x36a   : > { %12049 = vmatpush3.bf16.msra.mxu0 %v13716_v31 }
 0x36b   : > { %12083 = vmatprep.subr.bf16.mxu0 %v13661_v49 }
 0x36d   : > { %9691 = vmatmul.mubr.f32.vlgmr.msra.gmra.mrb[40].mxu0 %v4087_v23  ;;  %v1421_v23 = vld [vmem:[#allocation8 + $0x248] sm:$0xff] }
 0x36e   : > { %12085 = vmatpush3.bf16.msra.mxu0 %v13661_v49  ;;  %9760 = vmatprep.mubr.f32.mxu0 %v4258_v24  ;;  %v11042_v24 = vpack.c.bf16 %v1421_v23, %v1420_v22  ;;  %v1764_v22 = vld [vmem:[#allocation8 + $0x340] sm:$0xff]  ;;  %v1765_v23 = vld [vmem:[#allocation8 + $0x348] sm:$0xff] }
 0x36f   : > { %12087 = vmatprep.subr.bf16.mxu0 %v13669_v56 }
 0x372   : > { %12089 = vmatpush3.bf16.msra.mxu0 %v13669_v56 }
 0x373   : > { %12091 = vmatprep.subr.bf16.mxu0 %v13677_v63 }
 0x376   : > { %12093 = vmatpush3.bf16.msra.mxu0 %v13677_v63 }
 0x377   : > { %12095 = vmatprep.subr.bf16.mxu0 %v13685_v6 }
 0x37a   : > { %12097 = vmatpush3.bf16.msra.mxu0 %v13685_v6 }
 0x37b   : > { %12099 = vmatprep.subr.bf16.mxu0 %v13693_v13 }
 0x37e   : > { %12101 = vmatpush3.bf16.msra.mxu0 %v13693_v13 }
 0x37f   : > { %12103 = vmatprep.subr.bf16.mxu0 %v13701_v20 }
 0x382   : > { %12105 = vmatpush3.bf16.msra.mxu0 %v13701_v20 }
 0x383   : > { %12107 = vmatprep.subr.bf16.mxu0 %v13709_v27 }
 0x386   : > { %12109 = vmatpush3.bf16.msra.mxu0 %v13709_v27 }
 0x387   : > { %12111 = vmatprep.subr.bf16.mxu0 %v13716_v31 }
 0x38a   : > { %12113 = vmatpush3.bf16.msra.mxu0 %v13716_v31 }
 0x38b   : > { %12147 = vmatprep.subr.bf16.mxu0 %v13661_v49 }
 0x38d   : > { %9761 = vmatmul.mubr.f32.vlgmr.msra.gmra.mrb[42].mxu0 %v4259_v25  ;;  %v1422_v25 = vld [vmem:[#allocation8 + $0x250] sm:$0xff] }
 0x38e   : > { %12149 = vmatpush3.bf16.msra.mxu0 %v13661_v49  ;;  %9830 = vmatprep.mubr.f32.mxu0 %v4430_v26  ;;  %v1423_v26 = vld [vmem:[#allocation8 + $0x258] sm:$0xff] }
 0x38f   : > { %12151 = vmatprep.subr.bf16.mxu0 %v13669_v56 }
 0x392   : > { %12153 = vmatpush3.bf16.msra.mxu0 %v13669_v56 }
 0x393   : > { %12155 = vmatprep.subr.bf16.mxu0 %v13677_v63 }
 0x396   : > { %12157 = vmatpush3.bf16.msra.mxu0 %v13677_v63 }
 0x397   : > { %12159 = vmatprep.subr.bf16.mxu0 %v13685_v6 }
 0x39a   : > { %12161 = vmatpush3.bf16.msra.mxu0 %v13685_v6 }
 0x39b   : > { %12163 = vmatprep.subr.bf16.mxu0 %v13693_v13 }
 0x39e   : > { %12165 = vmatpush3.bf16.msra.mxu0 %v13693_v13 }
 0x39f   : > { %12167 = vmatprep.subr.bf16.mxu0 %v13701_v20 }
 0x3a2   : > { %12169 = vmatpush3.bf16.msra.mxu0 %v13701_v20 }
 0x3a3   : > { %12171 = vmatprep.subr.bf16.mxu0 %v13709_v27 }
 0x3a6   : > { %12173 = vmatpush3.bf16.msra.mxu0 %v13709_v27 }
 0x3a7   : > { %12175 = vmatprep.subr.bf16.mxu0 %v13716_v31 }
 0x3aa   : > { %12177 = vmatpush3.bf16.msra.mxu0 %v13716_v31 }
 0x3ab   : > { %12211 = vmatprep.subr.bf16.mxu0 %v13661_v49 }
 0x3ad   : > { %9831 = vmatmul.mubr.f32.vlgmr.msra.gmra.mrb[44].mxu0 %v4431_v28  ;;  %v11046_v28 = vpack.c.bf16 %v1423_v26, %v1422_v25  ;;  %v1766_v25 = vld [vmem:[#allocation8 + $0x350] sm:$0xff]  ;;  %v1767_v26 = vld [vmem:[#allocation8 + $0x358] sm:$0xff] }
 0x3ae   : > { %12213 = vmatpush3.bf16.msra.mxu0 %v13661_v49  ;;  %9900 = vmatprep.mubr.f32.mxu0 %v4602_v29  ;;  %v1424_v29 = vld [vmem:[#allocation8 + $0x260] sm:$0xff] }
 0x3af   : > { %12215 = vmatprep.subr.bf16.mxu0 %v13669_v56 }
 0x3b2   : > { %12217 = vmatpush3.bf16.msra.mxu0 %v13669_v56 }
 0x3b3   : > { %12219 = vmatprep.subr.bf16.mxu0 %v13677_v63 }
 0x3b6   : > { %12221 = vmatpush3.bf16.msra.mxu0 %v13677_v63 }
 0x3b7   : > { %12223 = vmatprep.subr.bf16.mxu0 %v13685_v6 }
 0x3ba   : > { %12225 = vmatpush3.bf16.msra.mxu0 %v13685_v6 }
 0x3bb   : > { %12227 = vmatprep.subr.bf16.mxu0 %v13693_v13 }
 0x3be   : > { %12229 = vmatpush3.bf16.msra.mxu0 %v13693_v13 }
 0x3bf   : > { %12231 = vmatprep.subr.bf16.mxu0 %v13701_v20 }
 0x3c2   : > { %12233 = vmatpush3.bf16.msra.mxu0 %v13701_v20 }
 0x3c3   : > { %12235 = vmatprep.subr.bf16.mxu0 %v13709_v27 }
 0x3c6   : > { %12237 = vmatpush3.bf16.msra.mxu0 %v13709_v27 }
 0x3c7   : > { %12239 = vmatprep.subr.bf16.mxu0 %v13716_v31 }
 0x3ca   : > { %12241 = vmatpush3.bf16.msra.mxu0 %v13716_v31 }
 0x3cb   : > { %12275 = vmatprep.subr.bf16.mxu0 %v13661_v49 }
 0x3cd   : > { %9901 = vmatmul.mubr.f32.vlgmr.msra.gmra.mrb[46].mxu0 %v4603_v30  ;;  %v1425_v30 = vld [vmem:[#allocation8 + $0x268] sm:$0xff] }
 0x3ce   : > { %12277 = vmatpush3.bf16.msra.mxu0 %v13661_v49  ;;  %9970 = vmatprep.mubr.f32.mxu0 %v4774_v32  ;;  %v11050_v32 = vpack.c.bf16 %v1425_v30, %v1424_v29  ;;  %v1768_v29 = vld [vmem:[#allocation8 + $0x360] sm:$0xff]  ;;  %v1769_v30 = vld [vmem:[#allocation8 + $0x368] sm:$0xff] }
 0x3cf   : > { %12279 = vmatprep.subr.bf16.mxu0 %v13669_v56 }
 0x3d2   : > { %12281 = vmatpush3.bf16.msra.mxu0 %v13669_v56 }
 0x3d3   : > { %12283 = vmatprep.subr.bf16.mxu0 %v13677_v63 }
 0x3d6   : > { %12285 = vmatpush3.bf16.msra.mxu0 %v13677_v63 }
 0x3d7   : > { %12287 = vmatprep.subr.bf16.mxu0 %v13685_v6 }
 0x3da   : > { %12289 = vmatpush3.bf16.msra.mxu0 %v13685_v6 }
 0x3db   : > { %12291 = vmatprep.subr.bf16.mxu0 %v13693_v13 }
 0x3de   : > { %12293 = vmatpush3.bf16.msra.mxu0 %v13693_v13 }
 0x3df   : > { %12295 = vmatprep.subr.bf16.mxu0 %v13701_v20 }
 0x3e2   : > { %12297 = vmatpush3.bf16.msra.mxu0 %v13701_v20 }
 0x3e3   : > { %12299 = vmatprep.subr.bf16.mxu0 %v13709_v27 }
 0x3e6   : > { %12301 = vmatpush3.bf16.msra.mxu0 %v13709_v27 }
 0x3e7   : > { %12303 = vmatprep.subr.bf16.mxu0 %v13716_v31 }
 0x3ea   : > { %12305 = vmatpush3.bf16.msra.mxu0 %v13716_v31 }
 0x3eb   : > { %12339 = vmatprep.subr.bf16.mxu0 %v13661_v49 }
 0x3ed   : > { %9971 = vmatmul.mubr.f32.vlgmr.msra.gmra.mrb[48].mxu0 %v4775_v33  ;;  %v1426_v33 = vld [vmem:[#allocation8 + $0x270] sm:$0xff] }
 0x3ee   : > { %12341 = vmatpush3.bf16.msra.mxu0 %v13661_v49  ;;  %10040 = vmatprep.mubr.f32.mxu0 %v4946_v34  ;;  %v1427_v34 = vld [vmem:[#allocation8 + $0x278] sm:$0xff] }
 0x3ef   : > { %12343 = vmatprep.subr.bf16.mxu0 %v13669_v56 }
 0x3f2   : > { %12345 = vmatpush3.bf16.msra.mxu0 %v13669_v56 }
 0x3f3   : > { %12347 = vmatprep.subr.bf16.mxu0 %v13677_v63 }
 0x3f6   : > { %v8432_v35 = vpop.f32.mrb[6].mxu1  ;;  %12349 = vmatpush3.bf16.msra.mxu0 %v13677_v63 }
 0x3f7   : > { %v1058_v36 = vpop.f32.mrb[7].mxu1  ;;  %12351 = vmatprep.subr.bf16.mxu0 %v13685_v6 }
 0x3f8   : > { %8465 = vmatprep.mubr.f32.mxu1 %v1058_v36 }
 0x3f9   : > { %8466 = vmatmul.mubr.f32.vlgmr.msra.gmra.mrb[4].mxu1 %v8432_v35  ;;  %v11054_v35 = vpack.c.bf16 %v1427_v34, %v1426_v33  ;;  %v1770_v33 = vld [vmem:[#allocation8 + $0x370] sm:$0xff]  ;;  %v1771_v34 = vld [vmem:[#allocation8 + $0x378] sm:$0xff] }
 0x3fa   : > { %10933 = vmatpush3.bf16.msra.mxu1 %v13661_v49  ;;  %12353 = vmatpush3.bf16.msra.mxu0 %v13685_v6 }
 0x3fb   : > { %10935 = vmatprep.subr.bf16.mxu1 %v13669_v56  ;;  %12355 = vmatprep.subr.bf16.mxu0 %v13693_v13 }
 0x3fc   : > { %8500 = vmatprep.mubr.f32.mxu1 %v1162_v37 }
 0x3fe   : > { %10937 = vmatpush3.bf16.msra.mxu1 %v13669_v56  ;;  %12357 = vmatpush3.bf16.msra.mxu0 %v13693_v13 }
 0x3ff   : > { %10939 = vmatprep.subr.bf16.mxu1 %v13677_v63  ;;  %12359 = vmatprep.subr.bf16.mxu0 %v13701_v20 }
 0x402   : > { %10941 = vmatpush3.bf16.msra.mxu1 %v13677_v63  ;;  %12361 = vmatpush3.bf16.msra.mxu0 %v13701_v20 }
 0x403   : > { %10943 = vmatprep.subr.bf16.mxu1 %v13685_v6  ;;  %12363 = vmatprep.subr.bf16.mxu0 %v13709_v27 }
 0x406   : > { %10945 = vmatpush3.bf16.msra.mxu1 %v13685_v6  ;;  %12365 = vmatpush3.bf16.msra.mxu0 %v13709_v27 }
 0x407   : > { %10947 = vmatprep.subr.bf16.mxu1 %v13693_v13  ;;  %12367 = vmatprep.subr.bf16.mxu0 %v13716_v31 }
 0x40a   : > { %10949 = vmatpush3.bf16.msra.mxu1 %v13693_v13  ;;  %12369 = vmatpush3.bf16.msra.mxu0 %v13716_v31 }
 0x40b   : > { %10951 = vmatprep.subr.bf16.mxu1 %v13701_v20  ;;  %12403 = vmatprep.subr.bf16.mxu0 %v13661_v49 }
 0x40d   : > { %10041 = vmatmul.mubr.f32.vlgmr.msra.gmra.mrb[50].mxu0 %v4947_v38  ;;  %v1506_v38 = vld [vmem:[#allocation7 + $0x50] sm:$0xff] }
 0x40e   : > { %10953 = vmatpush3.bf16.msra.mxu1 %v13701_v20  ;;  %12405 = vmatpush3.bf16.msra.mxu0 %v13661_v49 }
 0x40f   : > { %10955 = vmatprep.subr.bf16.mxu1 %v13709_v27  ;;  %12407 = vmatprep.subr.bf16.mxu0 %v13669_v56 }
 0x412   : > { %10957 = vmatpush3.bf16.msra.mxu1 %v13709_v27  ;;  %12409 = vmatpush3.bf16.msra.mxu0 %v13669_v56 }
 0x413   : > { %10959 = vmatprep.subr.bf16.mxu1 %v13716_v31  ;;  %12411 = vmatprep.subr.bf16.mxu0 %v13677_v63 }
 0x416   : > { %10961 = vmatpush3.bf16.msra.mxu1 %v13716_v31  ;;  %12413 = vmatpush3.bf16.msra.mxu0 %v13677_v63 }
 0x417   : > { %10963 = vmatprep.subr.bf16.mxu1 %v10962_v41  ;;  %12415 = vmatprep.subr.bf16.mxu0 %v13685_v6 }
 0x419   : > { %8501 = vmatmul.mubr.f32.vlgmr.msra.gmra.mrb[8].mxu1 %v1163_v44  ;;  %v1507_v44 = vld [vmem:[#allocation7 + $0x58] sm:$0xff] }
 0x41a   : > { %10965 = vmatpush3.bf16.msra.mxu1 %v10962_v41  ;;  %12417 = vmatpush3.bf16.msra.mxu0 %v13685_v6  ;;  %v11090_v41 = vpack.c.bf16 %v1585_v40, %v1584_v39  ;;  %v1930_v39 = vld [vmem:[#allocation8 + $0x390] sm:$0xff]  ;;  %v1931_v40 = vld [vmem:[#allocation8 + $0x398] sm:$0xff] }
 0x41b   : > { %10967 = vmatprep.subr.bf16.mxu1 %v10966_v45  ;;  %12419 = vmatprep.subr.bf16.mxu0 %v13693_v13 }
 0x41e   : > { %10969 = vmatpush3.bf16.msra.mxu1 %v10966_v45  ;;  %12421 = vmatpush3.bf16.msra.mxu0 %v13693_v13  ;;  %v11094_v45 = vpack.c.bf16 %v1587_v43, %v1586_v42  ;;  %v1933_v42 = vld [vmem:[#allocation8 + $0x3a8] sm:$0xff]  ;;  %v1934_v43 = vld [vmem:[#allocation8 + $0x3b0] sm:$0xff] }
 0x41f   : > { %10971 = vmatprep.subr.bf16.mxu1 %v10970_v48  ;;  %12423 = vmatprep.subr.bf16.mxu0 %v13701_v20 }
 0x422   : > { %10973 = vmatpush3.bf16.msra.mxu1 %v10970_v48  ;;  %12425 = vmatpush3.bf16.msra.mxu0 %v13701_v20  ;;  %v11098_v48 = vpack.c.bf16 %v1589_v47, %v1588_v46  ;;  %v1937_v46 = vld [vmem:[#allocation8 + $0x3c8] sm:$0xff] }
 0x423   : > { %10975 = vmatprep.subr.bf16.mxu1 %v10974_v52  ;;  %12427 = vmatprep.subr.bf16.mxu0 %v13709_v27 }
 0x426   : > { %10977 = vmatpush3.bf16.msra.mxu1 %v10974_v52  ;;  %12429 = vmatpush3.bf16.msra.mxu0 %v13709_v27  ;;  %v11102_v52 = vpack.c.bf16 %v1591_v51, %v1590_v50  ;;  %v1940_v51 = vld [vmem:[#allocation8 + $0x3e0] sm:$0xff] }
 0x427   : > { %10979 = vmatprep.subr.bf16.mxu1 %v10978_v55  ;;  %12431 = vmatprep.subr.bf16.mxu0 %v13716_v31 }
 0x42a   : > { %10981 = vmatpush3.bf16.msra.mxu1 %v10978_v55  ;;  %12433 = vmatpush3.bf16.msra.mxu0 %v13716_v31  ;;  %v11106_v55 = vpack.c.bf16 %v1593_v54, %v1592_v53  ;;  %v1942_v54 = vld [vmem:[#allocation8 + $0x3f0] sm:$0xff] }
 0x42b   : > { %10983 = vmatprep.subr.bf16.mxu1 %v10982_v59 }
 0x42e   : > { %10985 = vmatpush3.bf16.msra.mxu1 %v10982_v59  ;;  %v11110_v59 = vpack.c.bf16 %v1595_v58, %v1594_v57  ;;  %v2100_v58 = vld [vmem:[#allocation8 + $0x400] sm:$0xff] }
 0x42f   : > { %10987 = vmatprep.subr.bf16.mxu1 %v10986_v62 }
 0x432   : > { %10989 = vmatpush3.bf16.msra.mxu1 %v10986_v62  ;;  %v11114_v62 = vpack.c.bf16 %v1597_v61, %v1596_v60  ;;  %v8852_v61 = vpop.f32.mrb[16].mxu0 }
 0x433   : > { %10991 = vmatprep.subr.bf16.mxu1 %v10990_v2 }
 0x436   : > { %10993 = vmatpush3.bf16.msra.mxu1 %v10990_v2  ;;  %v11118_v2 = vpack.c.bf16 %v1599_v1, %v1598_v0 }
 0x437   : > { %10995 = vmatprep.subr.bf16.mxu1 %v13661_v49 }
 0x4ec   : > { %v8502_v3 = vpop.f32.mrb[8].mxu1 }
 0x4ed   : > { %v1230_v4 = vpop.f32.mrb[9].mxu1 }
 0x4ee   : > { %8535 = vmatprep.mubr.f32.mxu1 %v1230_v4 }
 0x4ef   : > { %8536 = vmatmul.mubr.f32.vlgmr.msra.gmra.mrb[4].mxu1 %v8502_v3 }
 0x4f0   : > { %10997 = vmatpush3.bf16.msra.mxu1 %v13661_v49  ;;  %8570 = vmatprep.mubr.f32.mxu1 %v1334_v5  ;;  %v1678_v5 = vld [vmem:[#allocation7 + $0x60] sm:$0xff] }
 0x4f1   : > { %10999 = vmatprep.subr.bf16.mxu1 %v13669_v56 }
 0x4f4   : > { %11001 = vmatpush3.bf16.msra.mxu1 %v13669_v56 }
 0x4f5   : > { %11003 = vmatprep.subr.bf16.mxu1 %v13677_v63 }
 0x4f8   : > { %11005 = vmatpush3.bf16.msra.mxu1 %v13677_v63 }
 0x4f9   : > { %11007 = vmatprep.subr.bf16.mxu1 %v13685_v6 }
 0x4fc   : > { %11009 = vmatpush3.bf16.msra.mxu1 %v13685_v6 }
 0x4fd   : > { %11011 = vmatprep.subr.bf16.mxu1 %v13693_v13 }
 0x500   : > { %11013 = vmatpush3.bf16.msra.mxu1 %v13693_v13 }
 0x501   : > { %11015 = vmatprep.subr.bf16.mxu1 %v13701_v20 }
 0x504   : > { %11017 = vmatpush3.bf16.msra.mxu1 %v13701_v20 }
 0x505   : > { %11019 = vmatprep.subr.bf16.mxu1 %v13709_v27 }
 0x508   : > { %11021 = vmatpush3.bf16.msra.mxu1 %v13709_v27 }
 0x509   : > { %11023 = vmatprep.subr.bf16.mxu1 %v13716_v31 }
 0x50c   : > { %11025 = vmatpush3.bf16.msra.mxu1 %v13716_v31 }
 0x50d   : > { %11027 = vmatprep.subr.bf16.mxu1 %v11026_v9 }
 0x50f   : > { %8571 = vmatmul.mubr.f32.vlgmr.msra.gmra.mrb[10].mxu1 %v1335_v12  ;;  %v1679_v12 = vld [vmem:[#allocation7 + $0x68] sm:$0xff] }
 0x510   : > { %11029 = vmatpush3.bf16.msra.mxu1 %v11026_v9  ;;  %v11154_v9 = vpack.c.bf16 %v1757_v8, %v1756_v7  ;;  %v2103_v7 = vld [vmem:[#allocation8 + $0x418] sm:$0xff] }
 0x511   : > { %11031 = vmatprep.subr.bf16.mxu1 %v11030_v14 }
 0x514   : > { %11033 = vmatpush3.bf16.msra.mxu1 %v11030_v14  ;;  %v11158_v14 = vpack.c.bf16 %v1759_v11, %v1758_v10 }
 0x515   : > { %11035 = vmatprep.subr.bf16.mxu1 %v11034_v17 }
 0x518   : > { %11037 = vmatpush3.bf16.msra.mxu1 %v11034_v17  ;;  %v11162_v17 = vpack.c.bf16 %v1761_v16, %v1760_v15  ;;  %v2106_v16 = vld [vmem:[#allocation8 + $0x430] sm:$0xff] }
 0x519   : > { %11039 = vmatprep.subr.bf16.mxu1 %v11038_v21 }
 0x51c   : > { %11041 = vmatpush3.bf16.msra.mxu1 %v11038_v21  ;;  %v11166_v21 = vpack.c.bf16 %v1763_v19, %v1762_v18  ;;  %v2108_v19 = vld [vmem:[#allocation8 + $0x440] sm:$0xff] }
 0x51d   : > { %11043 = vmatprep.subr.bf16.mxu1 %v11042_v24 }
 0x520   : > { %11045 = vmatpush3.bf16.msra.mxu1 %v11042_v24  ;;  %v11170_v24 = vpack.c.bf16 %v1765_v23, %v1764_v22  ;;  %v2110_v23 = vld [vmem:[#allocation8 + $0x450] sm:$0xff] }
 0x521   : > { %11047 = vmatprep.subr.bf16.mxu1 %v11046_v28 }
 0x524   : > { %11049 = vmatpush3.bf16.msra.mxu1 %v11046_v28  ;;  %v11174_v28 = vpack.c.bf16 %v1767_v26, %v1766_v25  ;;  %v2112_v26 = vld [vmem:[#allocation8 + $0x460] sm:$0xff] }
 0x525   : > { %11051 = vmatprep.subr.bf16.mxu1 %v11050_v32 }
 0x528   : > { %11053 = vmatpush3.bf16.msra.mxu1 %v11050_v32  ;;  %v11178_v32 = vpack.c.bf16 %v1769_v30, %v1768_v29  ;;  %v2114_v30 = vld [vmem:[#allocation8 + $0x470] sm:$0xff] }
 0x529   : > { %11055 = vmatprep.subr.bf16.mxu1 %v11054_v35 }
 0x52c   : > { %11057 = vmatpush3.bf16.msra.mxu1 %v11054_v35  ;;  %v11182_v35 = vpack.c.bf16 %v1771_v34, %v1770_v33  ;;  %v2272_v34 = vld [vmem:[#allocation8 + $0x480] sm:$0xff] }
 0x52d   : > { %11059 = vmatprep.subr.bf16.mxu1 %v13661_v49 }
 0x5e2   : > { %v8572_v36 = vpop.f32.mrb[10].mxu1 }
 0x5e3   : > { %v1402_v37 = vpop.f32.mrb[11].mxu1 }
 0x5e4   : > { %8605 = vmatprep.mubr.f32.mxu1 %v1402_v37 }
 0x5e5   : > { %8606 = vmatmul.mubr.f32.vlgmr.msra.gmra.mrb[4].mxu1 %v8572_v36 }
 0x5e6   : > { %11061 = vmatpush3.bf16.msra.mxu1 %v13661_v49  ;;  %8640 = vmatprep.mubr.f32.mxu1 %v1506_v38  ;;  %v1850_v38 = vld [vmem:[#allocation7 + $0x70] sm:$0xff] }
 0x5e7   : > { %11063 = vmatprep.subr.bf16.mxu1 %v13669_v56 }
 0x5ea   : > { %11065 = vmatpush3.bf16.msra.mxu1 %v13669_v56 }
 0x5eb   : > { %11067 = vmatprep.subr.bf16.mxu1 %v13677_v63 }
 0x5ee   : > { %11069 = vmatpush3.bf16.msra.mxu1 %v13677_v63 }
 0x5ef   : > { %11071 = vmatprep.subr.bf16.mxu1 %v13685_v6 }
 0x5f2   : > { %11073 = vmatpush3.bf16.msra.mxu1 %v13685_v6 }
 0x5f3   : > { %11075 = vmatprep.subr.bf16.mxu1 %v13693_v13 }
 0x5f6   : > { %11077 = vmatpush3.bf16.msra.mxu1 %v13693_v13 }
 0x5f7   : > { %11079 = vmatprep.subr.bf16.mxu1 %v13701_v20 }
 0x5fa   : > { %11081 = vmatpush3.bf16.msra.mxu1 %v13701_v20 }
 0x5fb   : > { %11083 = vmatprep.subr.bf16.mxu1 %v13709_v27 }
 0x5fe   : > { %11085 = vmatpush3.bf16.msra.mxu1 %v13709_v27 }
 0x5ff   : > { %11087 = vmatprep.subr.bf16.mxu1 %v13716_v31 }
 0x602   : > { %11089 = vmatpush3.bf16.msra.mxu1 %v13716_v31 }
 0x603   : > { %11091 = vmatprep.subr.bf16.mxu1 %v11090_v41 }
 0x605   : > { %8641 = vmatmul.mubr.f32.vlgmr.msra.gmra.mrb[12].mxu1 %v1507_v44  ;;  %v1935_v44 = vld [vmem:[#allocation8 + $0x3b8] sm:$0xff] }
 0x606   : > { %11093 = vmatpush3.bf16.msra.mxu1 %v11090_v41  ;;  %v1932_v41 = vld [vmem:[#allocation8 + $0x3a0] sm:$0xff] }
 0x607   : > { %11095 = vmatprep.subr.bf16.mxu1 %v11094_v45 }
 0x60a   : > { %11097 = vmatpush3.bf16.msra.mxu1 %v11094_v45  ;;  %v1936_v45 = vld [vmem:[#allocation8 + $0x3c0] sm:$0xff] }
 0x60b   : > { %11099 = vmatprep.subr.bf16.mxu1 %v11098_v48  ;;  %v11234_v47 = vpack.c.bf16 %v1937_v46, %v1936_v45  ;;  %v2283_v45 = vld [vmem:[#allocation8 + $0x4d8] sm:$0xff] }
 0x60e   : > { %11101 = vmatpush3.bf16.msra.mxu1 %v11098_v48  ;;  %v1939_v48 = vld [vmem:[#allocation8 + $0x3d8] sm:$0xff] }
 0x60f   : > { %11103 = vmatprep.subr.bf16.mxu1 %v11102_v52 }
 0x612   : > { %11105 = vmatpush3.bf16.msra.mxu1 %v11102_v52  ;;  %v1941_v52 = vld [vmem:[#allocation8 + $0x3e8] sm:$0xff] }
 0x613   : > { %11107 = vmatprep.subr.bf16.mxu1 %v11106_v55  ;;  %v11242_v53 = vpack.c.bf16 %v1941_v52, %v1940_v51  ;;  %v2287_v51 = vld [vmem:[#allocation8 + $0x4f8] sm:$0xff] }
 0x616   : > { %11109 = vmatpush3.bf16.msra.mxu1 %v11106_v55  ;;  %v1943_v55 = vld [vmem:[#allocation8 + $0x3f8] sm:$0xff] }
 0x617   : > { %11111 = vmatprep.subr.bf16.mxu1 %v11110_v59  ;;  %v11246_v57 = vpack.c.bf16 %v1943_v55, %v1942_v54  ;;  %v2445_v54 = vld [vmem:[#allocation8 + $0x508] sm:$0xff] }
 0x61a   : > { %11113 = vmatpush3.bf16.msra.mxu1 %v11110_v59  ;;  %v2101_v59 = vld [vmem:[#allocation8 + $0x408] sm:$0xff] }
 0x61b   : > { %11115 = vmatprep.subr.bf16.mxu1 %v11114_v62  ;;  %v11282_v60 = vpack.c.bf16 %v2101_v59, %v2100_v58  ;;  %v2446_v58 = vld [vmem:[#allocation8 + $0x510] sm:$0xff]  ;;  %v2447_v59 = vld [vmem:[#allocation8 + $0x518] sm:$0xff] }
 0x61e   : > { %11117 = vmatpush3.bf16.msra.mxu1 %v11114_v62  ;;  %v2090_v62 = vpop.f32.mrb[17].mxu0 }
 0x61f   : > { %11119 = vmatprep.subr.bf16.mxu1 %v11118_v2  ;;  %v14129_v0 = vpop.f32.mrb[18].mxu0 }
 0x620   : > { %v2262_v1 = vpop.f32.mrb[19].mxu0 }
 0x622   : > { %11121 = vmatpush3.bf16.msra.mxu1 %v11118_v2  ;;  %v14131_v2 = vpop.f32.mrb[20].mxu0 }
 0x623   : > { %11123 = vmatprep.subr.bf16.mxu1 %v13661_v49 }
 0x6d8   : > { %v8642_v3 = vpop.f32.mrb[12].mxu1 }
 0x6d9   : > { %v1574_v4 = vpop.f32.mrb[13].mxu1 }
 0x6da   : > { %8675 = vmatprep.mubr.f32.mxu1 %v1574_v4 }
 0x6db   : > { %8676 = vmatmul.mubr.f32.vlgmr.msra.gmra.mrb[4].mxu1 %v8642_v3  ;;  %v14133_v3 = vpop.f32.mrb[21].mxu0 }
 0x6dc   : > { %11125 = vmatpush3.bf16.msra.mxu1 %v13661_v49  ;;  %8710 = vmatprep.mubr.f32.mxu1 %v1678_v5  ;;  %v14135_v4 = vpop.f32.mrb[22].mxu0  ;;  %v2102_v5 = vld [vmem:[#allocation8 + $0x410] sm:$0xff] }
 0x6dd   : > { %11127 = vmatprep.subr.bf16.mxu1 %v13669_v56  ;;  %v11286_v11 = vpack.c.bf16 %v2103_v7, %v2102_v5  ;;  %v2450_v7 = vld [vmem:[#allocation8 + $0x530] sm:$0xff] }
 0x6e0   : > { %11129 = vmatpush3.bf16.msra.mxu1 %v13669_v56 }
 0x6e1   : > { %11131 = vmatprep.subr.bf16.mxu1 %v13677_v63 }
 0x6e4   : > { %11133 = vmatpush3.bf16.msra.mxu1 %v13677_v63 }
 0x6e5   : > { %11135 = vmatprep.subr.bf16.mxu1 %v13685_v6 }
 0x6e8   : > { %11137 = vmatpush3.bf16.msra.mxu1 %v13685_v6 }
 0x6e9   : > { %11139 = vmatprep.subr.bf16.mxu1 %v13693_v13 }
 0x6ec   : > { %11141 = vmatpush3.bf16.msra.mxu1 %v13693_v13 }
 0x6ed   : > { %11143 = vmatprep.subr.bf16.mxu1 %v13701_v20 }
 0x6f0   : > { %11145 = vmatpush3.bf16.msra.mxu1 %v13701_v20 }
 0x6f1   : > { %11147 = vmatprep.subr.bf16.mxu1 %v13709_v27 }
 0x6f4   : > { %11149 = vmatpush3.bf16.msra.mxu1 %v13709_v27 }
 0x6f5   : > { %11151 = vmatprep.subr.bf16.mxu1 %v13716_v31 }
 0x6f8   : > { %11153 = vmatpush3.bf16.msra.mxu1 %v13716_v31 }
 0x6f9   : > { %11155 = vmatprep.subr.bf16.mxu1 %v11154_v9 }
 0x6fb   : > { %8711 = vmatmul.mubr.f32.vlgmr.msra.gmra.mrb[14].mxu1 %v1679_v12  ;;  %v2104_v12 = vld [vmem:[#allocation8 + $0x420] sm:$0xff] }
 0x6fc   : > { %11157 = vmatpush3.bf16.msra.mxu1 %v11154_v9  ;;  %v14137_v9 = vpop.f32.mrb[23].mxu0 }
 0x6fd   : > { %11159 = vmatprep.subr.bf16.mxu1 %v11158_v14 }
 0x700   : > { %11161 = vmatpush3.bf16.msra.mxu1 %v11158_v14  ;;  %v2105_v14 = vld [vmem:[#allocation8 + $0x428] sm:$0xff] }
 0x701   : > { %11163 = vmatprep.subr.bf16.mxu1 %v11162_v17  ;;  %v11290_v15 = vpack.c.bf16 %v2105_v14, %v2104_v12  ;;  %v2453_v12 = vld [vmem:[#allocation8 + $0x548] sm:$0xff] }
 0x704   : > { %11165 = vmatpush3.bf16.msra.mxu1 %v11162_v17  ;;  %v2107_v17 = vld [vmem:[#allocation8 + $0x438] sm:$0xff] }
 0x705   : > { %11167 = vmatprep.subr.bf16.mxu1 %v11166_v21  ;;  %v11294_v18 = vpack.c.bf16 %v2107_v17, %v2106_v16  ;;  %v2455_v16 = vld [vmem:[#allocation8 + $0x558] sm:$0xff]  ;;  %v2456_v17 = vld [vmem:[#allocation8 + $0x560] sm:$0xff] }
 0x708   : > { %11169 = vmatpush3.bf16.msra.mxu1 %v11166_v21  ;;  %v2109_v21 = vld [vmem:[#allocation8 + $0x448] sm:$0xff] }
 0x709   : > { %11171 = vmatprep.subr.bf16.mxu1 %v11170_v24  ;;  %v11298_v22 = vpack.c.bf16 %v2109_v21, %v2108_v19  ;;  %v2458_v19 = vld [vmem:[#allocation8 + $0x570] sm:$0xff]  ;;  %v2459_v21 = vld [vmem:[#allocation8 + $0x578] sm:$0xff] }
 0x70c   : > { %11173 = vmatpush3.bf16.msra.mxu1 %v11170_v24  ;;  %v2111_v24 = vld [vmem:[#allocation8 + $0x458] sm:$0xff] }
 0x70d   : > { %11175 = vmatprep.subr.bf16.mxu1 %v11174_v28  ;;  %v11302_v25 = vpack.c.bf16 %v2111_v24, %v2110_v23  ;;  %v2616_v23 = vld [vmem:[#allocation8 + $0x580] sm:$0xff]  ;;  %v2617_v24 = vld [vmem:[#allocation8 + $0x588] sm:$0xff] }
 0x710   : > { %11177 = vmatpush3.bf16.msra.mxu1 %v11174_v28  ;;  %v2113_v28 = vld [vmem:[#allocation8 + $0x468] sm:$0xff] }
 0x711   : > { %11179 = vmatprep.subr.bf16.mxu1 %v11178_v32  ;;  %v11306_v29 = vpack.c.bf16 %v2113_v28, %v2112_v26  ;;  %v2618_v28 = vld [vmem:[#allocation8 + $0x590] sm:$0xff] }
 0x714   : > { %11181 = vmatpush3.bf16.msra.mxu1 %v11178_v32  ;;  %v2115_v32 = vld [vmem:[#allocation8 + $0x478] sm:$0xff] }
 0x715   : > { %11183 = vmatprep.subr.bf16.mxu1 %v11182_v35  ;;  %v11310_v33 = vpack.c.bf16 %v2115_v32, %v2114_v30 }
 0x718   : > { %11185 = vmatpush3.bf16.msra.mxu1 %v11182_v35  ;;  %v2273_v35 = vld [vmem:[#allocation8 + $0x488] sm:$0xff] }
 0x719   : > { %11187 = vmatprep.subr.bf16.mxu1 %v13661_v49 }
 0x7ce   : > { %v8712_v36 = vpop.f32.mrb[14].mxu1 }
 0x7cf   : > { %v1746_v37 = vpop.f32.mrb[15].mxu1 }
 0x7d0   : > { %8745 = vmatprep.mubr.f32.mxu1 %v1746_v37  ;;  %v14139_v37 = vpop.f32.mrb[24].mxu0 }
 0x7d1   : > { %8746 = vmatmul.mubr.f32.vlgmr.msra.gmra.mrb[4].mxu1 %v8712_v36  ;;  %v11346_v36 = vpack.c.bf16 %v2273_v35, %v2272_v34  ;;  %v2621_v34 = vld [vmem:[#allocation8 + $0x5a8] sm:$0xff] }
 0x7d2   : > { %11189 = vmatpush3.bf16.msra.mxu1 %v13661_v49  ;;  %8780 = vmatprep.mubr.f32.mxu1 %v1850_v38  ;;  %v1928_v49 = vld [vmem:[#allocation8 + $0x380] sm:$0xff]  ;;  %v2274_v38 = vld [vmem:[#allocation8 + $0x490] sm:$0xff] }
 0x7d3   : > { %11191 = vmatprep.subr.bf16.mxu1 %v13669_v56 }
 0x7d6   : > { %11193 = vmatpush3.bf16.msra.mxu1 %v13669_v56  ;;  %v1929_v56 = vld [vmem:[#allocation8 + $0x388] sm:$0xff] }
 0x7d7   : > { %11195 = vmatprep.subr.bf16.mxu1 %v13677_v63 }
 0x7da   : > { %11197 = vmatpush3.bf16.msra.mxu1 %v13677_v63  ;;  %v11218_v63 = vpack.c.bf16 %v1929_v56, %v1928_v49  ;;  %v2275_v49 = vld [vmem:[#allocation8 + $0x498] sm:$0xff]  ;;  %v14141_v56 = vpop.f32.mrb[25].mxu0 }
 0x7db   : > { %11199 = vmatprep.subr.bf16.mxu1 %v13685_v6 }
 0x7de   : > { %11201 = vmatpush3.bf16.msra.mxu1 %v13685_v6  ;;  %v1851_v6 = vld [vmem:[#allocation7 + $0x78] sm:$0xff] }
 0x7df   : > { %11203 = vmatprep.subr.bf16.mxu1 %v13693_v13 }
 0x7e2   : > { %11205 = vmatpush3.bf16.msra.mxu1 %v13693_v13  ;;  %v11222_v13 = vpack.c.bf16 %v1931_v40, %v1930_v39  ;;  %v2276_v39 = vld [vmem:[#allocation8 + $0x4a0] sm:$0xff]  ;;  %v2277_v40 = vld [vmem:[#allocation8 + $0x4a8] sm:$0xff] }
 0x7e3   : > { %11207 = vmatprep.subr.bf16.mxu1 %v13701_v20 }
 0x7e6   : > { %11209 = vmatpush3.bf16.msra.mxu1 %v13701_v20  ;;  %v11226_v20 = vpack.c.bf16 %v1933_v42, %v1932_v41  ;;  %v2279_v41 = vld [vmem:[#allocation8 + $0x4b8] sm:$0xff] }
 0x7e7   : > { %11211 = vmatprep.subr.bf16.mxu1 %v13709_v27 }
 0x7ea   : > { %11213 = vmatpush3.bf16.msra.mxu1 %v13709_v27  ;;  %v11230_v27 = vpack.c.bf16 %v1935_v44, %v1934_v43  ;;  %v2281_v43 = vld [vmem:[#allocation8 + $0x4c8] sm:$0xff] }
 0x7eb   : > { %11215 = vmatprep.subr.bf16.mxu1 %v13716_v31 }
 0x7ee   : > { %11217 = vmatpush3.bf16.msra.mxu1 %v13716_v31  ;;  %v1938_v31 = vld [vmem:[#allocation8 + $0x3d0] sm:$0xff] }
 0x7ef   : > { %11219 = vmatprep.subr.bf16.mxu1 %v11218_v63  ;;  %v11238_v50 = vpack.c.bf16 %v1939_v48, %v1938_v31  ;;  %v2285_v31 = vld [vmem:[#allocation8 + $0x4e8] sm:$0xff] }
 0x7f1   : > { %8781 = vmatmul.mubr.f32.vlgmr.msra.gmra.mrb[16].mxu1 %v1851_v6  ;;  %v11354_v6 = vpack.c.bf16 %v2277_v40, %v2276_v39  ;;  %v2625_v39 = vld [vmem:[#allocation8 + $0x5c8] sm:$0xff] }
 0x7f2   : > { %11221 = vmatpush3.bf16.msra.mxu1 %v11218_v63  ;;  %v11350_v63 = vpack.c.bf16 %v2275_v49, %v2274_v38  ;;  %v2623_v38 = vld [vmem:[#allocation8 + $0x5b8] sm:$0xff] }
 0x7f3   : > { %11223 = vmatprep.subr.bf16.mxu1 %v11222_v13 }
 0x7f6   : > { %11225 = vmatpush3.bf16.msra.mxu1 %v11222_v13  ;;  %v2278_v13 = vld [vmem:[#allocation8 + $0x4b0] sm:$0xff] }
 0x7f7   : > { %11227 = vmatprep.subr.bf16.mxu1 %v11226_v20  ;;  %v11358_v42 = vpack.c.bf16 %v2279_v41, %v2278_v13  ;;  %v2627_v13 = vld [vmem:[#allocation8 + $0x5d8] sm:$0xff]  ;;  %v2628_v41 = vld [vmem:[#allocation8 + $0x5e0] sm:$0xff] }
 0x7fa   : > { %11229 = vmatpush3.bf16.msra.mxu1 %v11226_v20  ;;  %v2280_v20 = vld [vmem:[#allocation8 + $0x4c0] sm:$0xff] }
 0x7fb   : > { %11231 = vmatprep.subr.bf16.mxu1 %v11230_v27  ;;  %v11362_v44 = vpack.c.bf16 %v2281_v43, %v2280_v20  ;;  %v2630_v20 = vld [vmem:[#allocation8 + $0x5f0] sm:$0xff]  ;;  %v2631_v43 = vld [vmem:[#allocation8 + $0x5f8] sm:$0xff] }
 0x7fe   : > { %11233 = vmatpush3.bf16.msra.mxu1 %v11230_v27  ;;  %v2282_v27 = vld [vmem:[#allocation8 + $0x4d0] sm:$0xff] }
 0x7ff   : > { %11235 = vmatprep.subr.bf16.mxu1 %v11234_v47  ;;  %v11366_v46 = vpack.c.bf16 %v2283_v45, %v2282_v27  ;;  %v2788_v27 = vld [vmem:[#allocation8 + $0x600] sm:$0xff]  ;;  %v2789_v45 = vld [vmem:[#allocation8 + $0x608] sm:$0xff] }
 0x802   : > { %11237 = vmatpush3.bf16.msra.mxu1 %v11234_v47  ;;  %v2284_v47 = vld [vmem:[#allocation8 + $0x4e0] sm:$0xff] }
 0x803   : > { %11239 = vmatprep.subr.bf16.mxu1 %v11238_v50  ;;  %v11370_v48 = vpack.c.bf16 %v2285_v31, %v2284_v47  ;;  %v2790_v31 = vld [vmem:[#allocation8 + $0x610] sm:$0xff] }
 0x806   : > { %11241 = vmatpush3.bf16.msra.mxu1 %v11238_v50  ;;  %v2286_v50 = vld [vmem:[#allocation8 + $0x4f0] sm:$0xff] }
 0x807   : > { %11243 = vmatprep.subr.bf16.mxu1 %v11242_v53  ;;  %v11374_v52 = vpack.c.bf16 %v2287_v51, %v2286_v50 }
 0x80a   : > { %11245 = vmatpush3.bf16.msra.mxu1 %v11242_v53  ;;  %v2444_v53 = vld [vmem:[#allocation8 + $0x500] sm:$0xff] }
 0x80b   : > { %11247 = vmatprep.subr.bf16.mxu1 %v11246_v57  ;;  %v11410_v55 = vpack.c.bf16 %v2445_v54, %v2444_v53  ;;  %v2793_v53 = vld [vmem:[#allocation8 + $0x628] sm:$0xff] }
 0x80e   : > { %11249 = vmatpush3.bf16.msra.mxu1 %v11246_v57  ;;  %v14143_v57 = vpop.f32.mrb[26].mxu0 }
 0x80f   : > { %11283 = vmatprep.subr.bf16.mxu1 %v11282_v60 }
 0x8c4   : > { %v8782_v8 = vpop.f32.mrb[16].mxu1 }
 0x8c5   : > { %v1918_v10 = vpop.f32.mrb[17].mxu1 }
 0x8c6   : > { %8815 = vmatprep.mubr.f32.mxu1 %v1918_v10 }
 0x8c7   : > { %8816 = vmatmul.mubr.f32.vlgmr.msra.gmra.mrb[4].mxu1 %v8782_v8  ;;  %v2451_v8 = vld [vmem:[#allocation8 + $0x538] sm:$0xff] }
 0x8c8   : > { %11285 = vmatpush3.bf16.msra.mxu1 %v11282_v60  ;;  %8885 = vmatprep.mubr.f32.mxu1 %v2090_v62  ;;  %v14145_v60 = vpop.f32.mrb[27].mxu0  ;;  %v2448_v62 = vld [vmem:[#allocation8 + $0x520] sm:$0xff]  ;;  %v11422_v10 = vpack.c.bf16 %v2451_v8, %v2450_v7  ;;  %v2799_v7 = vld [vmem:[#allocation8 + $0x658] sm:$0xff] }
 0x8c9   : > { %11287 = vmatprep.subr.bf16.mxu1 %v11286_v11  ;;  %v14149_v26 = vpop.f32.mrb[28].mxu0  ;;  %v2800_v8 = vld [vmem:[#allocation8 + $0x660] sm:$0xff] }
 0x8ca   : > { %v14151_v30 = vpop.f32.mrb[29].mxu0 }
 0x8cb   : > { %v14155_v47 = vpop.f32.mrb[30].mxu0 }
 0x8cc   : > { %11289 = vmatpush3.bf16.msra.mxu1 %v11286_v11  ;;  %v2452_v11 = vld [vmem:[#allocation8 + $0x540] sm:$0xff]  ;;  %v14157_v50 = vpop.f32.mrb[31].mxu0 }
 0x8cd   : > { %11291 = vmatprep.subr.bf16.mxu1 %v11290_v15  ;;  %v11426_v14 = vpack.c.bf16 %v2453_v12, %v2452_v11  ;;  %v2802_v11 = vld [vmem:[#allocation8 + $0x670] sm:$0xff]  ;;  %v2803_v12 = vld [vmem:[#allocation8 + $0x678] sm:$0xff] }
 0x8d0   : > { %11293 = vmatpush3.bf16.msra.mxu1 %v11290_v15  ;;  %v2454_v15 = vld [vmem:[#allocation8 + $0x550] sm:$0xff] }
 0x8d1   : > { %11295 = vmatprep.subr.bf16.mxu1 %v11294_v18 }
 0x8d4   : > { %11297 = vmatpush3.bf16.msra.mxu1 %v11294_v18  ;;  %v2457_v18 = vld [vmem:[#allocation8 + $0x568] sm:$0xff] }
 0x8d5   : > { %11299 = vmatprep.subr.bf16.mxu1 %v11298_v22 }
 0x8d8   : > { %11301 = vmatpush3.bf16.msra.mxu1 %v11298_v22  ;;  %v11438_v22 = vpack.c.bf16 %v2459_v21, %v2458_v19 }
 0x8d9   : > { %11303 = vmatprep.subr.bf16.mxu1 %v11302_v25 }
 0x8dc   : > { %11305 = vmatpush3.bf16.msra.mxu1 %v11302_v25  ;;  %v11474_v25 = vpack.c.bf16 %v2617_v24, %v2616_v23  ;;  %v2965_v23 = vld [vmem:[#allocation8 + $0x6a8] sm:$0xff] }
 0x8dd   : > { %11307 = vmatprep.subr.bf16.mxu1 %v11306_v29 }
 0x8e0   : > { %11309 = vmatpush3.bf16.msra.mxu1 %v11306_v29  ;;  %v2619_v29 = vld [vmem:[#allocation8 + $0x598] sm:$0xff] }
 0x8e1   : > { %11311 = vmatprep.subr.bf16.mxu1 %v11310_v33  ;;  %v11478_v32 = vpack.c.bf16 %v2619_v29, %v2618_v28  ;;  %v2967_v28 = vld [vmem:[#allocation8 + $0x6b8] sm:$0xff] }
 0x8e4   : > { %11313 = vmatpush3.bf16.msra.mxu1 %v11310_v33  ;;  %v2620_v33 = vld [vmem:[#allocation8 + $0x5a0] sm:$0xff] }
 0x8e5   : > { %11347 = vmatprep.subr.bf16.mxu1 %v11346_v36  ;;  %v11482_v35 = vpack.c.bf16 %v2621_v34, %v2620_v33  ;;  %v2969_v33 = vld [vmem:[#allocation8 + $0x6c8] sm:$0xff] }
 0x8e7   : > { %8886 = vmatmul.mubr.f32.vlgmr.msra.gmra.mrb[4].mxu1 %v8852_v61  ;;  %v11414_v61 = vpack.c.bf16 %v2447_v59, %v2446_v58  ;;  %v2795_v58 = vld [vmem:[#allocation8 + $0x638] sm:$0xff] }
 0x8e8   : > { %11349 = vmatpush3.bf16.msra.mxu1 %v11346_v36  ;;  %8955 = vmatprep.mubr.f32.mxu1 %v2262_v1  ;;  %v2449_v1 = vld [vmem:[#allocation8 + $0x528] sm:$0xff]  ;;  %v2622_v36 = vld [vmem:[#allocation8 + $0x5b0] sm:$0xff] }
 0x8e9   : > { %11351 = vmatprep.subr.bf16.mxu1 %v11350_v63  ;;  %v11418_v5 = vpack.c.bf16 %v2449_v1, %v2448_v62  ;;  %v11486_v49 = vpack.c.bf16 %v2623_v38, %v2622_v36  ;;  %v2797_v62 = vld [vmem:[#allocation8 + $0x648] sm:$0xff]  ;;  %v2971_v36 = vld [vmem:[#allocation8 + $0x6d8] sm:$0xff]  ;;  %v2972_v38 = vld [vmem:[#allocation8 + $0x6e0] sm:$0xff] }
 0x8ec   : > { %11353 = vmatpush3.bf16.msra.mxu1 %v11350_v63  ;;  %v2624_v63 = vld [vmem:[#allocation8 + $0x5c0] sm:$0xff] }
 0x8ed   : > { %11355 = vmatprep.subr.bf16.mxu1 %v11354_v6  ;;  %v11490_v40 = vpack.c.bf16 %v2625_v39, %v2624_v63  ;;  %v2974_v63 = vld [vmem:[#allocation8 + $0x6f0] sm:$0xff]  ;;  %v2975_v39 = vld [vmem:[#allocation8 + $0x6f8] sm:$0xff] }
 0x8f0   : > { %11357 = vmatpush3.bf16.msra.mxu1 %v11354_v6  ;;  %v2626_v6 = vld [vmem:[#allocation8 + $0x5d0] sm:$0xff] }
 0x8f1   : > { %11359 = vmatprep.subr.bf16.mxu1 %v11358_v42 }
 0x8f4   : > { %11361 = vmatpush3.bf16.msra.mxu1 %v11358_v42  ;;  %v2629_v42 = vld [vmem:[#allocation8 + $0x5e8] sm:$0xff] }
 0x8f5   : > { %11363 = vmatprep.subr.bf16.mxu1 %v11362_v44 }
 0x8f8   : > { %11365 = vmatpush3.bf16.msra.mxu1 %v11362_v44  ;;  %v11502_v44 = vpack.c.bf16 %v2631_v43, %v2630_v20 }
 0x8f9   : > { %11367 = vmatprep.subr.bf16.mxu1 %v11366_v46 }
 0x8fc   : > { %11369 = vmatpush3.bf16.msra.mxu1 %v11366_v46  ;;  %v11538_v46 = vpack.c.bf16 %v2789_v45, %v2788_v27  ;;  %v3137_v27 = vld [vmem:[#allocation8 + $0x728] sm:$0xff] }
 0x8fd   : > { %11371 = vmatprep.subr.bf16.mxu1 %v11370_v48 }
 0x900   : > { %11373 = vmatpush3.bf16.msra.mxu1 %v11370_v48  ;;  %v2791_v48 = vld [vmem:[#allocation8 + $0x618] sm:$0xff] }
 0x901   : > { %11375 = vmatprep.subr.bf16.mxu1 %v11374_v52  ;;  %v11542_v51 = vpack.c.bf16 %v2791_v48, %v2790_v31  ;;  %v3139_v31 = vld [vmem:[#allocation8 + $0x738] sm:$0xff] }
 0x904   : > { %11377 = vmatpush3.bf16.msra.mxu1 %v11374_v52  ;;  %v2792_v52 = vld [vmem:[#allocation8 + $0x620] sm:$0xff] }
 0x905   : > { %11411 = vmatprep.subr.bf16.mxu1 %v11410_v55  ;;  %v11546_v54 = vpack.c.bf16 %v2793_v53, %v2792_v52  ;;  %v3141_v52 = vld [vmem:[#allocation8 + $0x748] sm:$0xff] }
 0x907   : > { %8956 = vmatmul.mubr.f32.vlgmr.msra.gmra.mrb[4].mxu1 %v14129_v0  ;;  %v11430_v0 = vpack.c.bf16 %v2455_v16, %v2454_v15  ;;  %v2960_v15 = vld [vmem:[#allocation8 + $0x680] sm:$0xff]  ;;  %v2961_v16 = vld [vmem:[#allocation8 + $0x688] sm:$0xff] }
 0x908   : > { %11413 = vmatpush3.bf16.msra.mxu1 %v11410_v55  ;;  %9025 = vmatprep.mubr.f32.mxu1 %v14133_v3  ;;  %v11434_v3 = vpack.c.bf16 %v2457_v18, %v2456_v17  ;;  %v2794_v55 = vld [vmem:[#allocation8 + $0x630] sm:$0xff]  ;;  %v14161_v17 = vpop.f32.mrb[32].mxu0 }
 0x909   : > { %11415 = vmatprep.subr.bf16.mxu1 %v11414_v61  ;;  %v11550_v59 = vpack.c.bf16 %v2795_v58, %v2794_v55  ;;  %v2962_v18 = vld [vmem:[#allocation8 + $0x690] sm:$0xff]  ;;  %v14163_v19 = vpop.f32.mrb[33].mxu0  ;;  %v3143_v55 = vld [vmem:[#allocation8 + $0x758] sm:$0xff]  ;;  %v3144_v58 = vld [vmem:[#allocation8 + $0x760] sm:$0xff] }
 0x90c   : > { %11417 = vmatpush3.bf16.msra.mxu1 %v11414_v61  ;;  %v2796_v61 = vld [vmem:[#allocation8 + $0x640] sm:$0xff] }
 0x90d   : > { %11419 = vmatprep.subr.bf16.mxu1 %v11418_v5  ;;  %v11554_v1 = vpack.c.bf16 %v2797_v62, %v2796_v61  ;;  %v3146_v61 = vld [vmem:[#allocation8 + $0x770] sm:$0xff]  ;;  %v3147_v62 = vld [vmem:[#allocation8 + $0x778] sm:$0xff] }
 0x910   : > { %11421 = vmatpush3.bf16.msra.mxu1 %v11418_v5  ;;  %v2798_v5 = vld [vmem:[#allocation8 + $0x650] sm:$0xff] }
 0x911   : > { %11423 = vmatprep.subr.bf16.mxu1 %v11422_v10 }
 0x914   : > { %11425 = vmatpush3.bf16.msra.mxu1 %v11422_v10  ;;  %v2801_v10 = vld [vmem:[#allocation8 + $0x668] sm:$0xff] }
 0x915   : > { %11427 = vmatprep.subr.bf16.mxu1 %v11426_v14 }
 0x918   : > { %11429 = vmatpush3.bf16.msra.mxu1 %v11426_v14  ;;  %v11566_v14 = vpack.c.bf16 %v2803_v12, %v2802_v11 }
 0x919   : > { %11431 = vmatprep.subr.bf16.mxu1 %v11430_v0 }
 0x91c   : > { %11433 = vmatpush3.bf16.msra.mxu1 %v11430_v0  ;;  %v11602_v0 = vpack.c.bf16 %v2961_v16, %v2960_v15  ;;  %v3309_v15 = vld [vmem:[#allocation8 + $0x7a8] sm:$0xff] }
 0x91d   : > { %11435 = vmatprep.subr.bf16.mxu1 %v11434_v3 }
 0x920   : > { %11437 = vmatpush3.bf16.msra.mxu1 %v11434_v3  ;;  %v2963_v3 = vld [vmem:[#allocation8 + $0x698] sm:$0xff] }
 0x921   : > { %11439 = vmatprep.subr.bf16.mxu1 %v11438_v22  ;;  %v11606_v21 = vpack.c.bf16 %v2963_v3, %v2962_v18  ;;  %v3311_v18 = vld [vmem:[#allocation8 + $0x7b8] sm:$0xff] }
 0x924   : > { %11441 = vmatpush3.bf16.msra.mxu1 %v11438_v22  ;;  %v2964_v22 = vld [vmem:[#allocation8 + $0x6a0] sm:$0xff] }
 0x925   : > { %11475 = vmatprep.subr.bf16.mxu1 %v11474_v25  ;;  %v11610_v24 = vpack.c.bf16 %v2965_v23, %v2964_v22  ;;  %v3313_v22 = vld [vmem:[#allocation8 + $0x7c8] sm:$0xff] }
 0x927   : > { %9026 = vmatmul.mubr.f32.vlgmr.msra.gmra.mrb[4].mxu1 %v14131_v2  ;;  %v11494_v2 = vpack.c.bf16 %v2627_v13, %v2626_v6  ;;  %v3132_v6 = vld [vmem:[#allocation8 + $0x700] sm:$0xff]  ;;  %v3133_v13 = vld [vmem:[#allocation8 + $0x708] sm:$0xff] }
 0x928   : > { %11477 = vmatpush3.bf16.msra.mxu1 %v11474_v25  ;;  %9095 = vmatprep.mubr.f32.mxu1 %v14137_v9  ;;  %v11498_v9 = vpack.c.bf16 %v2629_v42, %v2628_v41  ;;  %v2966_v25 = vld [vmem:[#allocation8 + $0x6b0] sm:$0xff]  ;;  %v14167_v41 = vpop.f32.mrb[34].mxu0 }
 0x929   : > { %11479 = vmatprep.subr.bf16.mxu1 %v11478_v32  ;;  %v11614_v29 = vpack.c.bf16 %v2967_v28, %v2966_v25  ;;  %v3134_v42 = vld [vmem:[#allocation8 + $0x710] sm:$0xff]  ;;  %v14169_v20 = vpop.f32.mrb[35].mxu0  ;;  %v3315_v25 = vld [vmem:[#allocation8 + $0x7d8] sm:$0xff]  ;;  %v3316_v28 = vld [vmem:[#allocation8 + $0x7e0] sm:$0xff] }
 0x92c   : > { %11481 = vmatpush3.bf16.msra.mxu1 %v11478_v32  ;;  %v2968_v32 = vld [vmem:[#allocation8 + $0x6c0] sm:$0xff] }
 0x92d   : > { %11483 = vmatprep.subr.bf16.mxu1 %v11482_v35  ;;  %v11618_v34 = vpack.c.bf16 %v2969_v33, %v2968_v32  ;;  %v3318_v32 = vld [vmem:[#allocation8 + $0x7f0] sm:$0xff]  ;;  %v3319_v33 = vld [vmem:[#allocation8 + $0x7f8] sm:$0xff] }
 0x930   : > { %11485 = vmatpush3.bf16.msra.mxu1 %v11482_v35  ;;  %v2970_v35 = vld [vmem:[#allocation8 + $0x6d0] sm:$0xff] }
 0x931   : > { %11487 = vmatprep.subr.bf16.mxu1 %v11486_v49 }
 0x934   : > { %11489 = vmatpush3.bf16.msra.mxu1 %v11486_v49  ;;  %v2973_v49 = vld [vmem:[#allocation8 + $0x6e8] sm:$0xff] }
 0x935   : > { %11491 = vmatprep.subr.bf16.mxu1 %v11490_v40 }
 0x938   : > { %11493 = vmatpush3.bf16.msra.mxu1 %v11490_v40  ;;  %v11630_v40 = vpack.c.bf16 %v2975_v39, %v2974_v63 }
 0x939   : > { %11495 = vmatprep.subr.bf16.mxu1 %v11494_v2 }
 0x93c   : > { %11497 = vmatpush3.bf16.msra.mxu1 %v11494_v2  ;;  %v11666_v2 = vpack.c.bf16 %v3133_v13, %v3132_v6  ;;  %v3481_v6 = vld [vmem:[#allocation8 + $0x828] sm:$0xff] }
 0x93d   : > { %11499 = vmatprep.subr.bf16.mxu1 %v11498_v9 }
 0x940   : > { %11501 = vmatpush3.bf16.msra.mxu1 %v11498_v9  ;;  %v3135_v9 = vld [vmem:[#allocation8 + $0x718] sm:$0xff] }
 0x941   : > { %11503 = vmatprep.subr.bf16.mxu1 %v11502_v44  ;;  %v11670_v43 = vpack.c.bf16 %v3135_v9, %v3134_v42  ;;  %v3483_v42 = vld [vmem:[#allocation8 + $0x838] sm:$0xff] }
 0x944   : > { %11505 = vmatpush3.bf16.msra.mxu1 %v11502_v44  ;;  %v3136_v44 = vld [vmem:[#allocation8 + $0x720] sm:$0xff] }
 0x945   : > { %11539 = vmatprep.subr.bf16.mxu1 %v11538_v46  ;;  %v11674_v45 = vpack.c.bf16 %v3137_v27, %v3136_v44  ;;  %v3484_v44 = vld [vmem:[#allocation8 + $0x840] sm:$0xff]  ;;  %v3485_v27 = vld [vmem:[#allocation8 + $0x848] sm:$0xff] }
 0x947   : > { %9096 = vmatmul.mubr.f32.vlgmr.msra.gmra.mrb[4].mxu1 %v14135_v4  ;;  %v11558_v4 = vpack.c.bf16 %v2799_v7, %v2798_v5  ;;  %v3304_v5 = vld [vmem:[#allocation8 + $0x780] sm:$0xff]  ;;  %v3305_v7 = vld [vmem:[#allocation8 + $0x788] sm:$0xff] }
 0x948   : > { %11541 = vmatpush3.bf16.msra.mxu1 %v11538_v46  ;;  %9165 = vmatprep.mubr.f32.mxu1 %v14141_v56  ;;  %v11562_v56 = vpack.c.bf16 %v2801_v10, %v2800_v8  ;;  %v3138_v46 = vld [vmem:[#allocation8 + $0x730] sm:$0xff]  ;;  %v14173_v8 = vpop.f32.mrb[36].mxu0 }
 0x949   : > { %11543 = vmatprep.subr.bf16.mxu1 %v11542_v51  ;;  %v11678_v48 = vpack.c.bf16 %v3139_v31, %v3138_v46  ;;  %v3306_v10 = vld [vmem:[#allocation8 + $0x790] sm:$0xff]  ;;  %v14175_v11 = vpop.f32.mrb[37].mxu0  ;;  %v11810_v46 = vpack.c.bf16 %v3485_v27, %v3484_v44  ;;  %v3487_v31 = vld [vmem:[#allocation8 + $0x858] sm:$0xff]  ;;  %v3833_v44 = vld [vmem:[#allocation8 + $0x968] sm:$0xff] }
 0x94a   : > { %v3834_v27 = vld [vmem:[#allocation8 + $0x970] sm:$0xff] }
 0x94c   : > { %11545 = vmatpush3.bf16.msra.mxu1 %v11542_v51  ;;  %v3140_v51 = vld [vmem:[#allocation8 + $0x740] sm:$0xff] }
 0x94d   : > { %11547 = vmatprep.subr.bf16.mxu1 %v11546_v54  ;;  %v11682_v53 = vpack.c.bf16 %v3141_v52, %v3140_v51  ;;  %v3489_v51 = vld [vmem:[#allocation8 + $0x868] sm:$0xff] }
 0x950   : > { %11549 = vmatpush3.bf16.msra.mxu1 %v11546_v54  ;;  %v3142_v54 = vld [vmem:[#allocation8 + $0x750] sm:$0xff] }
 0x951   : > { %11551 = vmatprep.subr.bf16.mxu1 %v11550_v59 }
 0x954   : > { %11553 = vmatpush3.bf16.msra.mxu1 %v11550_v59  ;;  %v3145_v59 = vld [vmem:[#allocation8 + $0x768] sm:$0xff] }
 0x955   : > { %11555 = vmatprep.subr.bf16.mxu1 %v11554_v1 }
 0x958   : > { %11557 = vmatpush3.bf16.msra.mxu1 %v11554_v1  ;;  %v11694_v1 = vpack.c.bf16 %v3147_v62, %v3146_v61  ;;  %v3650_v61 = vld [vmem:[#allocation8 + $0x890] sm:$0xff]  ;;  %v3651_v62 = vld [vmem:[#allocation8 + $0x898] sm:$0xff] }
 0x959   : > { %11559 = vmatprep.subr.bf16.mxu1 %v11558_v4 }
 0x95c   : > { %11561 = vmatpush3.bf16.msra.mxu1 %v11558_v4  ;;  %v11730_v4 = vpack.c.bf16 %v3305_v7, %v3304_v5  ;;  %v11862_v5 = vpack.c.bf16 %v3651_v62, %v3650_v61  ;;  %v3652_v7 = vld [vmem:[#allocation8 + $0x8a0] sm:$0xff]  ;;  %v3999_v61 = vld [vmem:[#allocation8 + $0x9b8] sm:$0xff] }
 0x95d   : > { %11563 = vmatprep.subr.bf16.mxu1 %v11562_v56 }
 0x960   : > { %11565 = vmatpush3.bf16.msra.mxu1 %v11562_v56  ;;  %v3307_v56 = vld [vmem:[#allocation8 + $0x798] sm:$0xff] }
 0x961   : > { %11567 = vmatprep.subr.bf16.mxu1 %v11566_v14  ;;  %v11734_v12 = vpack.c.bf16 %v3307_v56, %v3306_v10  ;;  %v3654_v56 = vld [vmem:[#allocation8 + $0x8b0] sm:$0xff] }
 0x964   : > { %11569 = vmatpush3.bf16.msra.mxu1 %v11566_v14  ;;  %v3308_v14 = vld [vmem:[#allocation8 + $0x7a0] sm:$0xff] }
 0x965   : > { %11603 = vmatprep.subr.bf16.mxu1 %v11602_v0  ;;  %v11738_v16 = vpack.c.bf16 %v3309_v15, %v3308_v14  ;;  %v3656_v15 = vld [vmem:[#allocation8 + $0x8c0] sm:$0xff] }
 0x967   : > { %9166 = vmatmul.mubr.f32.vlgmr.msra.gmra.mrb[4].mxu1 %v14139_v37  ;;  %v11622_v37 = vpack.c.bf16 %v2971_v36, %v2970_v35  ;;  %v3476_v35 = vld [vmem:[#allocation8 + $0x800] sm:$0xff]  ;;  %v3477_v36 = vld [vmem:[#allocation8 + $0x808] sm:$0xff] }
 0x968   : > { %11605 = vmatpush3.bf16.msra.mxu1 %v11602_v0  ;;  %9235 = vmatprep.mubr.f32.mxu1 %v14145_v60  ;;  %v11626_v60 = vpack.c.bf16 %v2973_v49, %v2972_v38  ;;  %v3310_v0 = vld [vmem:[#allocation8 + $0x7b0] sm:$0xff]  ;;  %v14179_v38 = vpop.f32.mrb[38].mxu0 }
 0x969   : > { %11607 = vmatprep.subr.bf16.mxu1 %v11606_v21  ;;  %v11742_v3 = vpack.c.bf16 %v3311_v18, %v3310_v0  ;;  %v3478_v49 = vld [vmem:[#allocation8 + $0x810] sm:$0xff]  ;;  %v14181_v63 = vpop.f32.mrb[39].mxu0 }
 0x96a   : > { %v3658_v18 = vld [vmem:[#allocation8 + $0x8d0] sm:$0xff] }
 0x96c   : > { %11609 = vmatpush3.bf16.msra.mxu1 %v11606_v21  ;;  %v3312_v21 = vld [vmem:[#allocation8 + $0x7c0] sm:$0xff] }
 0x96d   : > { %11611 = vmatprep.subr.bf16.mxu1 %v11610_v24  ;;  %v11746_v23 = vpack.c.bf16 %v3313_v22, %v3312_v21  ;;  %v3660_v21 = vld [vmem:[#allocation8 + $0x8e0] sm:$0xff]  ;;  %v3661_v22 = vld [vmem:[#allocation8 + $0x8e8] sm:$0xff] }
 0x970   : > { %11613 = vmatpush3.bf16.msra.mxu1 %v11610_v24  ;;  %v3314_v24 = vld [vmem:[#allocation8 + $0x7d0] sm:$0xff] }
 0x971   : > { %11615 = vmatprep.subr.bf16.mxu1 %v11614_v29 }
 0x974   : > { %11617 = vmatpush3.bf16.msra.mxu1 %v11614_v29  ;;  %v3317_v29 = vld [vmem:[#allocation8 + $0x7e8] sm:$0xff] }
 0x975   : > { %11619 = vmatprep.subr.bf16.mxu1 %v11618_v34 }
 0x978   : > { %11621 = vmatpush3.bf16.msra.mxu1 %v11618_v34  ;;  %v11758_v34 = vpack.c.bf16 %v3319_v33, %v3318_v32  ;;  %v3822_v32 = vld [vmem:[#allocation8 + $0x910] sm:$0xff]  ;;  %v3823_v33 = vld [vmem:[#allocation8 + $0x918] sm:$0xff] }
 0x979   : > { %11623 = vmatprep.subr.bf16.mxu1 %v11622_v37 }
 0x97c   : > { %11625 = vmatpush3.bf16.msra.mxu1 %v11622_v37  ;;  %v11794_v37 = vpack.c.bf16 %v3477_v36, %v3476_v35  ;;  %v11926_v35 = vpack.c.bf16 %v3823_v33, %v3822_v32  ;;  %v3824_v36 = vld [vmem:[#allocation8 + $0x920] sm:$0xff]  ;;  %v4171_v32 = vld [vmem:[#allocation8 + $0xa38] sm:$0xff] }
 0x97d   : > { %11627 = vmatprep.subr.bf16.mxu1 %v11626_v60 }
 0x980   : > { %11629 = vmatpush3.bf16.msra.mxu1 %v11626_v60  ;;  %v3479_v60 = vld [vmem:[#allocation8 + $0x818] sm:$0xff] }
 0x981   : > { %11631 = vmatprep.subr.bf16.mxu1 %v11630_v40  ;;  %v11798_v39 = vpack.c.bf16 %v3479_v60, %v3478_v49  ;;  %v3826_v60 = vld [vmem:[#allocation8 + $0x930] sm:$0xff] }
 0x984   : > { %11633 = vmatpush3.bf16.msra.mxu1 %v11630_v40  ;;  %v3480_v40 = vld [vmem:[#allocation8 + $0x820] sm:$0xff] }
 0x985   : > { %11667 = vmatprep.subr.bf16.mxu1 %v11666_v2  ;;  %v11802_v13 = vpack.c.bf16 %v3481_v6, %v3480_v40  ;;  %v3828_v6 = vld [vmem:[#allocation8 + $0x940] sm:$0xff] }
 0x987   : > { %9236 = vmatmul.mubr.f32.vlgmr.msra.gmra.mrb[4].mxu1 %v14143_v57  ;;  %v11686_v57 = vpack.c.bf16 %v3143_v55, %v3142_v54  ;;  %v3491_v54 = vld [vmem:[#allocation8 + $0x878] sm:$0xff] }
 0x988   : > { %11669 = vmatpush3.bf16.msra.mxu1 %v11666_v2  ;;  %9305 = vmatprep.mubr.f32.mxu1 %v14151_v30  ;;  %v11690_v30 = vpack.c.bf16 %v3145_v59, %v3144_v58  ;;  %v3482_v2 = vld [vmem:[#allocation8 + $0x830] sm:$0xff]  ;;  %v3649_v58 = vld [vmem:[#allocation8 + $0x888] sm:$0xff] }
 0x989   : > { %11671 = vmatprep.subr.bf16.mxu1 %v11670_v43  ;;  %v11806_v9 = vpack.c.bf16 %v3483_v42, %v3482_v2  ;;  %v3830_v42 = vld [vmem:[#allocation8 + $0x950] sm:$0xff] }
 0x98c   : > { %11673 = vmatpush3.bf16.msra.mxu1 %v11670_v43  ;;  %v5118_v43 = vld [vmem:[#allocation7 + $0x1a0] sm:$0xff] }
 0x98d   : > { %11675 = vmatprep.subr.bf16.mxu1 %v11674_v45  ;;  %10110 = vmatprep.mubr.f32.mxu0 %v5118_v43  ;;  %v3832_v43 = vld [vmem:[#allocation8 + $0x960] sm:$0xff] }
 0x990   : > { %11677 = vmatpush3.bf16.msra.mxu1 %v11674_v45  ;;  %v5119_v45 = vld [vmem:[#allocation7 + $0x1a8] sm:$0xff] }
 0x991   : > { %11679 = vmatprep.subr.bf16.mxu1 %v11678_v48  ;;  %10111 = vmatmul.mubr.f32.vlgmr.msra.gmra.mrb[52].mxu0 %v5119_v45  ;;  %v3835_v45 = vld [vmem:[#allocation8 + $0x978] sm:$0xff] }
 0x994   : > { %11681 = vmatpush3.bf16.msra.mxu1 %v11678_v48  ;;  %v3488_v48 = vld [vmem:[#allocation8 + $0x860] sm:$0xff] }
 0x995   : > { %11683 = vmatprep.subr.bf16.mxu1 %v11682_v53  ;;  %v11818_v52 = vpack.c.bf16 %v3489_v51, %v3488_v48  ;;  %v3994_v51 = vld [vmem:[#allocation8 + $0x990] sm:$0xff] }
 0x998   : > { %11685 = vmatpush3.bf16.msra.mxu1 %v11682_v53  ;;  %v3490_v53 = vld [vmem:[#allocation8 + $0x870] sm:$0xff] }
 0x999   : > { %11687 = vmatprep.subr.bf16.mxu1 %v11686_v57  ;;  %v11822_v55 = vpack.c.bf16 %v3491_v54, %v3490_v53 }
 0x99c   : > { %11689 = vmatpush3.bf16.msra.mxu1 %v11686_v57  ;;  %v3648_v57 = vld [vmem:[#allocation8 + $0x880] sm:$0xff] }
 0x99d   : > { %11691 = vmatprep.subr.bf16.mxu1 %v11690_v30  ;;  %v11858_v59 = vpack.c.bf16 %v3649_v58, %v3648_v57  ;;  %v3997_v57 = vld [vmem:[#allocation8 + $0x9a8] sm:$0xff] }
 0x9a0   : > { %11693 = vmatpush3.bf16.msra.mxu1 %v11690_v30  ;;  %v14185_v30 = vpop.f32.mrb[40].mxu0 }
 0x9a1   : > { %11695 = vmatprep.subr.bf16.mxu1 %v11694_v1 }
 0x9a4   : > { %11697 = vmatpush3.bf16.msra.mxu1 %v11694_v1  ;;  %v14187_v1 = vpop.f32.mrb[41].mxu0 }
 0x9a5   : > { %11731 = vmatprep.subr.bf16.mxu1 %v11730_v4 }
 0x9a7   : > { %9306 = vmatmul.mubr.f32.vlgmr.msra.gmra.mrb[4].mxu1 %v14149_v26  ;;  %v11750_v26 = vpack.c.bf16 %v3315_v25, %v3314_v24  ;;  %v3663_v24 = vld [vmem:[#allocation8 + $0x8f8] sm:$0xff] }
 0x9a8   : > { %11733 = vmatpush3.bf16.msra.mxu1 %v11730_v4  ;;  %9375 = vmatprep.mubr.f32.mxu1 %v14157_v50  ;;  %v11754_v50 = vpack.c.bf16 %v3317_v29, %v3316_v28  ;;  %v3653_v4 = vld [vmem:[#allocation8 + $0x8a8] sm:$0xff] }
 0x9a9   : > { %11735 = vmatprep.subr.bf16.mxu1 %v11734_v12  ;;  %v11866_v10 = vpack.c.bf16 %v3653_v4, %v3652_v7  ;;  %v3821_v28 = vld [vmem:[#allocation8 + $0x908] sm:$0xff] }
 0x9aa   : > { %v4001_v7 = vld [vmem:[#allocation8 + $0x9c8] sm:$0xff] }
 0x9ac   : > { %11737 = vmatpush3.bf16.msra.mxu1 %v11734_v12  ;;  %v3655_v12 = vld [vmem:[#allocation8 + $0x8b8] sm:$0xff] }
 0x9ad   : > { %11739 = vmatprep.subr.bf16.mxu1 %v11738_v16  ;;  %v11870_v14 = vpack.c.bf16 %v3655_v12, %v3654_v56  ;;  %v4003_v56 = vld [vmem:[#allocation8 + $0x9d8] sm:$0xff]  ;;  %v4004_v12 = vld [vmem:[#allocation8 + $0x9e0] sm:$0xff] }
 0x9b0   : > { %11741 = vmatpush3.bf16.msra.mxu1 %v11738_v16  ;;  %v3657_v16 = vld [vmem:[#allocation8 + $0x8c8] sm:$0xff] }
 0x9b1   : > { %11743 = vmatprep.subr.bf16.mxu1 %v11742_v3  ;;  %v11874_v0 = vpack.c.bf16 %v3657_v16, %v3656_v15  ;;  %v4006_v15 = vld [vmem:[#allocation8 + $0x9f0] sm:$0xff]  ;;  %v4007_v16 = vld [vmem:[#allocation8 + $0x9f8] sm:$0xff] }
 0x9b4   : > { %11745 = vmatpush3.bf16.msra.mxu1 %v11742_v3  ;;  %v3659_v3 = vld [vmem:[#allocation8 + $0x8d8] sm:$0xff] }
 0x9b5   : > { %11747 = vmatprep.subr.bf16.mxu1 %v11746_v23 }
 0x9b8   : > { %11749 = vmatpush3.bf16.msra.mxu1 %v11746_v23  ;;  %v3662_v23 = vld [vmem:[#allocation8 + $0x8f0] sm:$0xff] }
 0x9b9   : > { %11751 = vmatprep.subr.bf16.mxu1 %v11750_v26  ;;  %v11886_v25 = vpack.c.bf16 %v3663_v24, %v3662_v23 }
 0x9bc   : > { %11753 = vmatpush3.bf16.msra.mxu1 %v11750_v26  ;;  %v3820_v26 = vld [vmem:[#allocation8 + $0x900] sm:$0xff] }
 0x9bd   : > { %11755 = vmatprep.subr.bf16.mxu1 %v11754_v50  ;;  %v11922_v29 = vpack.c.bf16 %v3821_v28, %v3820_v26  ;;  %v4169_v26 = vld [vmem:[#allocation8 + $0xa28] sm:$0xff] }
 0x9c0   : > { %11757 = vmatpush3.bf16.msra.mxu1 %v11754_v50  ;;  %v14191_v50 = vpop.f32.mrb[42].mxu0 }
 0x9c1   : > { %11759 = vmatprep.subr.bf16.mxu1 %v11758_v34 }
 0x9c4   : > { %11761 = vmatpush3.bf16.msra.mxu1 %v11758_v34  ;;  %v14193_v34 = vpop.f32.mrb[43].mxu0 }
 0x9c5   : > { %11795 = vmatprep.subr.bf16.mxu1 %v11794_v37  ;;  %v14197_v48 = vpop.f32.mrb[44].mxu0 }
 0x9c6   : > { %v14199_v53 = vpop.f32.mrb[45].mxu0 }
 0x9c7   : > { %9376 = vmatmul.mubr.f32.vlgmr.msra.gmra.mrb[4].mxu1 %v14155_v47  ;;  %v3486_v47 = vld [vmem:[#allocation8 + $0x850] sm:$0xff] }
 0x9c8   : > { %11797 = vmatpush3.bf16.msra.mxu1 %v11794_v37  ;;  %9445 = vmatprep.mubr.f32.mxu1 %v14163_v19  ;;  %v11814_v19 = vpack.c.bf16 %v3487_v31, %v3486_v47  ;;  %v3825_v37 = vld [vmem:[#allocation8 + $0x928] sm:$0xff]  ;;  %v3992_v47 = vld [vmem:[#allocation8 + $0x980] sm:$0xff] }
 0x9c9   : > { %11799 = vmatprep.subr.bf16.mxu1 %v11798_v39  ;;  %v11930_v49 = vpack.c.bf16 %v3825_v37, %v3824_v36  ;;  %v3993_v31 = vld [vmem:[#allocation8 + $0x988] sm:$0xff] }
 0x9ca   : > { %v4173_v36 = vld [vmem:[#allocation8 + $0xa48] sm:$0xff] }
 0x9cc   : > { %11801 = vmatpush3.bf16.msra.mxu1 %v11798_v39  ;;  %v3827_v39 = vld [vmem:[#allocation8 + $0x938] sm:$0xff] }
 0x9cd   : > { %11803 = vmatprep.subr.bf16.mxu1 %v11802_v13  ;;  %v11934_v40 = vpack.c.bf16 %v3827_v39, %v3826_v60  ;;  %v4175_v60 = vld [vmem:[#allocation8 + $0xa58] sm:$0xff]  ;;  %v4176_v39 = vld [vmem:[#allocation8 + $0xa60] sm:$0xff] }
 0x9d0   : > { %11805 = vmatpush3.bf16.msra.mxu1 %v11802_v13  ;;  %v3829_v13 = vld [vmem:[#allocation8 + $0x948] sm:$0xff] }
 0x9d1   : > { %11807 = vmatprep.subr.bf16.mxu1 %v11806_v9  ;;  %v11938_v2 = vpack.c.bf16 %v3829_v13, %v3828_v6  ;;  %v4178_v6 = vld [vmem:[#allocation8 + $0xa70] sm:$0xff]  ;;  %v4179_v13 = vld [vmem:[#allocation8 + $0xa78] sm:$0xff] }
 0x9d4   : > { %11809 = vmatpush3.bf16.msra.mxu1 %v11806_v9  ;;  %v3831_v9 = vld [vmem:[#allocation8 + $0x958] sm:$0xff] }
 0x9d5   : > { %11811 = vmatprep.subr.bf16.mxu1 %v11810_v46 }
 0x9d8   : > { %11813 = vmatpush3.bf16.msra.mxu1 %v11810_v46  ;;  %v11950_v46 = vpack.c.bf16 %v3835_v45, %v3834_v27 }
 0x9d9   : > { %11815 = vmatprep.subr.bf16.mxu1 %v11814_v19 }
 0x9dc   : > { %11817 = vmatpush3.bf16.msra.mxu1 %v11814_v19  ;;  %v11986_v19 = vpack.c.bf16 %v3993_v31, %v3992_v47  ;;  %v4341_v47 = vld [vmem:[#allocation8 + $0xaa8] sm:$0xff] }
 0x9dd   : > { %11819 = vmatprep.subr.bf16.mxu1 %v11818_v52 }
 0x9e0   : > { %11821 = vmatpush3.bf16.msra.mxu1 %v11818_v52  ;;  %v3995_v52 = vld [vmem:[#allocation8 + $0x998] sm:$0xff] }
 0x9e1   : > { %11823 = vmatprep.subr.bf16.mxu1 %v11822_v55  ;;  %v11990_v54 = vpack.c.bf16 %v3995_v52, %v3994_v51  ;;  %v4343_v51 = vld [vmem:[#allocation8 + $0xab8] sm:$0xff] }
 0x9e4   : > { %11825 = vmatpush3.bf16.msra.mxu1 %v11822_v55  ;;  %v3996_v55 = vld [vmem:[#allocation8 + $0x9a0] sm:$0xff] }
 0x9e5   : > { %11859 = vmatprep.subr.bf16.mxu1 %v11858_v59  ;;  %v11994_v58 = vpack.c.bf16 %v3997_v57, %v3996_v55  ;;  %v4345_v55 = vld [vmem:[#allocation8 + $0xac8] sm:$0xff] }
 0x9e7   : > { %9446 = vmatmul.mubr.f32.vlgmr.msra.gmra.mrb[4].mxu1 %v14161_v17  ;;  %v11878_v17 = vpack.c.bf16 %v3659_v3, %v3658_v18  ;;  %v4164_v18 = vld [vmem:[#allocation8 + $0xa00] sm:$0xff]  ;;  %v4165_v3 = vld [vmem:[#allocation8 + $0xa08] sm:$0xff] }
 0x9e8   : > { %11861 = vmatpush3.bf16.msra.mxu1 %v11858_v59  ;;  %9515 = vmatprep.mubr.f32.mxu1 %v14169_v20  ;;  %v11882_v20 = vpack.c.bf16 %v3661_v22, %v3660_v21  ;;  %v3998_v59 = vld [vmem:[#allocation8 + $0x9b0] sm:$0xff]  ;;  %v14203_v21 = vpop.f32.mrb[46].mxu0 }
 0x9e9   : > { %11863 = vmatprep.subr.bf16.mxu1 %v11862_v5  ;;  %v11998_v62 = vpack.c.bf16 %v3999_v61, %v3998_v59  ;;  %v4166_v22 = vld [vmem:[#allocation8 + $0xa10] sm:$0xff]  ;;  %v14205_v23 = vpop.f32.mrb[47].mxu0  ;;  %v4347_v59 = vld [vmem:[#allocation8 + $0xad8] sm:$0xff]  ;;  %v4348_v61 = vld [vmem:[#allocation8 + $0xae0] sm:$0xff] }
 0x9ec   : > { %11865 = vmatpush3.bf16.msra.mxu1 %v11862_v5  ;;  %v4000_v5 = vld [vmem:[#allocation8 + $0x9c0] sm:$0xff] }
 0x9ed   : > { %11867 = vmatprep.subr.bf16.mxu1 %v11866_v10  ;;  %v12002_v4 = vpack.c.bf16 %v4001_v7, %v4000_v5  ;;  %v4350_v5 = vld [vmem:[#allocation8 + $0xaf0] sm:$0xff]  ;;  %v4351_v7 = vld [vmem:[#allocation8 + $0xaf8] sm:$0xff] }
 0x9f0   : > { %11869 = vmatpush3.bf16.msra.mxu1 %v11866_v10  ;;  %v4002_v10 = vld [vmem:[#allocation8 + $0x9d0] sm:$0xff] }
 0x9f1   : > { %11871 = vmatprep.subr.bf16.mxu1 %v11870_v14 }
 0x9f4   : > { %11873 = vmatpush3.bf16.msra.mxu1 %v11870_v14  ;;  %v4005_v14 = vld [vmem:[#allocation8 + $0x9e8] sm:$0xff] }
 0x9f5   : > { %11875 = vmatprep.subr.bf16.mxu1 %v11874_v0 }
 0x9f8   : > { %11877 = vmatpush3.bf16.msra.mxu1 %v11874_v0  ;;  %v12014_v0 = vpack.c.bf16 %v4007_v16, %v4006_v15 }
 0x9f9   : > { %11879 = vmatprep.subr.bf16.mxu1 %v11878_v17 }
 0x9fc   : > { %11881 = vmatpush3.bf16.msra.mxu1 %v11878_v17  ;;  %v12050_v17 = vpack.c.bf16 %v4165_v3, %v4164_v18  ;;  %v4513_v18 = vld [vmem:[#allocation8 + $0xb28] sm:$0xff] }
 0x9fd   : > { %11883 = vmatprep.subr.bf16.mxu1 %v11882_v20 }
 0xa00   : > { %11885 = vmatpush3.bf16.msra.mxu1 %v11882_v20  ;;  %v4167_v20 = vld [vmem:[#allocation8 + $0xa18] sm:$0xff] }
 0xa01   : > { %11887 = vmatprep.subr.bf16.mxu1 %v11886_v25  ;;  %v12054_v24 = vpack.c.bf16 %v4167_v20, %v4166_v22  ;;  %v4515_v22 = vld [vmem:[#allocation8 + $0xb38] sm:$0xff] }
 0xa04   : > { %11889 = vmatpush3.bf16.msra.mxu1 %v11886_v25  ;;  %v4168_v25 = vld [vmem:[#allocation8 + $0xa20] sm:$0xff] }
 0xa05   : > { %11923 = vmatprep.subr.bf16.mxu1 %v11922_v29  ;;  %v12058_v28 = vpack.c.bf16 %v4169_v26, %v4168_v25  ;;  %v4517_v25 = vld [vmem:[#allocation8 + $0xb48] sm:$0xff] }
 0xa07   : > { %9516 = vmatmul.mubr.f32.vlgmr.msra.gmra.mrb[4].mxu1 %v14167_v41  ;;  %v11942_v41 = vpack.c.bf16 %v3831_v9, %v3830_v42  ;;  %v4336_v42 = vld [vmem:[#allocation8 + $0xa80] sm:$0xff]  ;;  %v4337_v9 = vld [vmem:[#allocation8 + $0xa88] sm:$0xff] }
 0xa08   : > { %11925 = vmatpush3.bf16.msra.mxu1 %v11922_v29  ;;  %9585 = vmatprep.mubr.f32.mxu1 %v14175_v11  ;;  %v11946_v11 = vpack.c.bf16 %v3833_v44, %v3832_v43  ;;  %v4170_v29 = vld [vmem:[#allocation8 + $0xa30] sm:$0xff]  ;;  %v14209_v43 = vpop.f32.mrb[48].mxu0 }
 0xa09   : > { %11927 = vmatprep.subr.bf16.mxu1 %v11926_v35  ;;  %v12062_v33 = vpack.c.bf16 %v4171_v32, %v4170_v29  ;;  %v4338_v44 = vld [vmem:[#allocation8 + $0xa90] sm:$0xff]  ;;  %v14211_v27 = vpop.f32.mrb[49].mxu0  ;;  %v4519_v29 = vld [vmem:[#allocation8 + $0xb58] sm:$0xff]  ;;  %v4520_v32 = vld [vmem:[#allocation8 + $0xb60] sm:$0xff] }
 0xa0c   : > { %11929 = vmatpush3.bf16.msra.mxu1 %v11926_v35  ;;  %v4172_v35 = vld [vmem:[#allocation8 + $0xa40] sm:$0xff] }
 0xa0d   : > { %11931 = vmatprep.subr.bf16.mxu1 %v11930_v49  ;;  %v12066_v37 = vpack.c.bf16 %v4173_v36, %v4172_v35  ;;  %v4522_v35 = vld [vmem:[#allocation8 + $0xb70] sm:$0xff]  ;;  %v4523_v36 = vld [vmem:[#allocation8 + $0xb78] sm:$0xff] }
 0xa10   : > { %11933 = vmatpush3.bf16.msra.mxu1 %v11930_v49  ;;  %v4174_v49 = vld [vmem:[#allocation8 + $0xa50] sm:$0xff] }
 0xa11   : > { %11935 = vmatprep.subr.bf16.mxu1 %v11934_v40 }
 0xa14   : > { %11937 = vmatpush3.bf16.msra.mxu1 %v11934_v40  ;;  %v4177_v40 = vld [vmem:[#allocation8 + $0xa68] sm:$0xff] }
 0xa15   : > { %11939 = vmatprep.subr.bf16.mxu1 %v11938_v2 }
 0xa18   : > { %11941 = vmatpush3.bf16.msra.mxu1 %v11938_v2  ;;  %v12078_v2 = vpack.c.bf16 %v4179_v13, %v4178_v6 }
 0xa19   : > { %11943 = vmatprep.subr.bf16.mxu1 %v11942_v41 }
 0xa1c   : > { %11945 = vmatpush3.bf16.msra.mxu1 %v11942_v41  ;;  %v12114_v41 = vpack.c.bf16 %v4337_v9, %v4336_v42  ;;  %v4685_v42 = vld [vmem:[#allocation8 + $0xba8] sm:$0xff] }
 0xa1d   : > { %11947 = vmatprep.subr.bf16.mxu1 %v11946_v11  ;;  %v5301_v9 = vld [vmem:[#allocation11] sm:$0xff] }
 0xa20   : > { %11949 = vmatpush3.bf16.msra.mxu1 %v11946_v11  ;;  %v4339_v11 = vld [vmem:[#allocation8 + $0xa98] sm:$0xff] }
 0xa21   : > { %11951 = vmatprep.subr.bf16.mxu1 %v11950_v46  ;;  %v12118_v45 = vpack.c.bf16 %v4339_v11, %v4338_v44  ;;  %v5303_v44 = vld [vmem:[#allocation11 + $0x10] sm:$0xff] }
 0xa24   : > { %11953 = vmatpush3.bf16.msra.mxu1 %v11950_v46  ;;  %v4340_v46 = vld [vmem:[#allocation8 + $0xaa0] sm:$0xff] }
 0xa25   : > { %11987 = vmatprep.subr.bf16.mxu1 %v11986_v19  ;;  %v12122_v31 = vpack.c.bf16 %v4341_v47, %v4340_v46  ;;  %v13335_v47 = vmov 0.0|0.0  }
 0xa26   : > { %12466 = vmatprep.subr.bf16.mxu0 %v13335_v47 }
 0xa27   : > { %9586 = vmatmul.mubr.f32.vlgmr.msra.gmra.mrb[4].mxu1 %v14173_v8  ;;  %v12006_v8 = vpack.c.bf16 %v4003_v56, %v4002_v10  ;;  %v4508_v10 = vld [vmem:[#allocation8 + $0xb00] sm:$0xff]  ;;  %v4509_v56 = vld [vmem:[#allocation8 + $0xb08] sm:$0xff] }
 0xa28   : > { %11989 = vmatpush3.bf16.msra.mxu1 %v11986_v19  ;;  %9655 = vmatprep.mubr.f32.mxu1 %v14181_v63  ;;  %v12010_v63 = vpack.c.bf16 %v4005_v14, %v4004_v12  ;;  %v4342_v19 = vld [vmem:[#allocation8 + $0xab0] sm:$0xff]  ;;  %v14215_v12 = vpop.f32.mrb[50].mxu0 }
 0xa29   : > { %11991 = vmatprep.subr.bf16.mxu1 %v11990_v54  ;;  %v12126_v52 = vpack.c.bf16 %v4343_v51, %v4342_v19  ;;  %v4510_v14 = vld [vmem:[#allocation8 + $0xb10] sm:$0xff]  ;;  %v14217_v15 = vpop.f32.mrb[51].mxu0  ;;  %v4687_v19 = vld [vmem:[#allocation8 + $0xbb8] sm:$0xff] }
 0xa2c   : > { %11993 = vmatpush3.bf16.msra.mxu1 %v11990_v54  ;;  %v4344_v54 = vld [vmem:[#allocation8 + $0xac0] sm:$0xff] }
 0xa2d   : > { %11995 = vmatprep.subr.bf16.mxu1 %v11994_v58  ;;  %v12130_v57 = vpack.c.bf16 %v4345_v55, %v4344_v54  ;;  %v4688_v55 = vld [vmem:[#allocation8 + $0xbc0] sm:$0xff] }
 0xa30   : > { %11997 = vmatpush3.bf16.msra.mxu1 %v11994_v58  ;;  %v4346_v58 = vld [vmem:[#allocation8 + $0xad0] sm:$0xff] }
 0xa31   : > { %11999 = vmatprep.subr.bf16.mxu1 %v11998_v62 }
 0xa34   : > { %12001 = vmatpush3.bf16.msra.mxu1 %v11998_v62  ;;  %v4349_v62 = vld [vmem:[#allocation8 + $0xae8] sm:$0xff] }
 0xa35   : > { %12003 = vmatprep.subr.bf16.mxu1 %v12002_v4 }
 0xa38   : > { %12005 = vmatpush3.bf16.msra.mxu1 %v12002_v4  ;;  %v12142_v4 = vpack.c.bf16 %v4351_v7, %v4350_v5  ;;  %v5309_v5 = vld [vmem:[#allocation11 + $0x40] sm:$0xff]  ;;  %v5310_v7 = vld [vmem:[#allocation11 + $0x48] sm:$0xff] }
 0xa39   : > { %12007 = vmatprep.subr.bf16.mxu1 %v12006_v8 }
 0xa3c   : > { %12009 = vmatpush3.bf16.msra.mxu1 %v12006_v8  ;;  %v12178_v8 = vpack.c.bf16 %v4509_v56, %v4508_v10  ;;  %v4692_v10 = vld [vmem:[#allocation8 + $0xbe0] sm:$0xff]  ;;  %v4693_v56 = vld [vmem:[#allocation8 + $0xbe8] sm:$0xff] }
 0xa3d   : > { %12011 = vmatprep.subr.bf16.mxu1 %v12010_v63 }
 0xa40   : > { %12013 = vmatpush3.bf16.msra.mxu1 %v12010_v63  ;;  %v4511_v63 = vld [vmem:[#allocation8 + $0xb18] sm:$0xff] }
 0xa41   : > { %12015 = vmatprep.subr.bf16.mxu1 %v12014_v0  ;;  %v12182_v16 = vpack.c.bf16 %v4511_v63, %v4510_v14  ;;  %v5311_v14 = vld [vmem:[#allocation11 + $0x50] sm:$0xff]  ;;  %v5312_v63 = vld [vmem:[#allocation11 + $0x58] sm:$0xff] }
 0xa44   : > { %12017 = vmatpush3.bf16.msra.mxu1 %v12014_v0  ;;  %v4512_v0 = vld [vmem:[#allocation8 + $0xb20] sm:$0xff] }
 0xa45   : > { %12051 = vmatprep.subr.bf16.mxu1 %v12050_v17  ;;  %v12186_v3 = vpack.c.bf16 %v4513_v18, %v4512_v0  ;;  %v4694_v0 = vld [vmem:[#allocation8 + $0xbf0] sm:$0xff]  ;;  %v4695_v18 = vld [vmem:[#allocation8 + $0xbf8] sm:$0xff] }
 0xa47   : > { %9656 = vmatmul.mubr.f32.vlgmr.msra.gmra.mrb[4].mxu1 %v14179_v38  ;;  %v12070_v38 = vpack.c.bf16 %v4175_v60, %v4174_v49  ;;  %v4680_v49 = vld [vmem:[#allocation8 + $0xb80] sm:$0xff]  ;;  %v4681_v60 = vld [vmem:[#allocation8 + $0xb88] sm:$0xff] }
 0xa48   : > { %12053 = vmatpush3.bf16.msra.mxu1 %v12050_v17  ;;  %9725 = vmatprep.mubr.f32.mxu1 %v14187_v1  ;;  %v12074_v1 = vpack.c.bf16 %v4177_v40, %v4176_v39  ;;  %v4514_v17 = vld [vmem:[#allocation8 + $0xb30] sm:$0xff]  ;;  %v4683_v40 = vld [vmem:[#allocation8 + $0xb98] sm:$0xff] }
 0xa49   : > { %12055 = vmatprep.subr.bf16.mxu1 %v12054_v24  ;;  %v12190_v20 = vpack.c.bf16 %v4515_v22, %v4514_v17  ;;  %v4682_v39 = vld [vmem:[#allocation8 + $0xb90] sm:$0xff]  ;;  %v5313_v17 = vld [vmem:[#allocation11 + $0x60] sm:$0xff] }
 0xa4a   : > { %v12246_v13 = vpack.c.bf16 %v4683_v40, %v4682_v39  ;;  %v5314_v22 = vld [vmem:[#allocation11 + $0x68] sm:$0xff] }
 0xa4b   : > { %v4862_v40 = vld [vmem:[#allocation8 + $0xc50] sm:$0xff] }
 0xa4c   : > { %12057 = vmatpush3.bf16.msra.mxu1 %v12054_v24  ;;  %v4516_v24 = vld [vmem:[#allocation8 + $0xb40] sm:$0xff] }
 0xa4d   : > { %12059 = vmatprep.subr.bf16.mxu1 %v12058_v28  ;;  %v12194_v26 = vpack.c.bf16 %v4517_v25, %v4516_v24  ;;  %v4852_v24 = vld [vmem:[#allocation8 + $0xc00] sm:$0xff]  ;;  %v4853_v25 = vld [vmem:[#allocation8 + $0xc08] sm:$0xff] }
 0xa50   : > { %12061 = vmatpush3.bf16.msra.mxu1 %v12058_v28  ;;  %v4518_v28 = vld [vmem:[#allocation8 + $0xb50] sm:$0xff] }
 0xa51   : > { %12063 = vmatprep.subr.bf16.mxu1 %v12062_v33 }
 0xa54   : > { %12065 = vmatpush3.bf16.msra.mxu1 %v12062_v33  ;;  %v4521_v33 = vld [vmem:[#allocation8 + $0xb68] sm:$0xff] }
 0xa55   : > { %12067 = vmatprep.subr.bf16.mxu1 %v12066_v37 }
 0xa58   : > { %12069 = vmatpush3.bf16.msra.mxu1 %v12066_v37  ;;  %v12206_v37 = vpack.c.bf16 %v4523_v36, %v4522_v35  ;;  %v4858_v36 = vld [vmem:[#allocation8 + $0xc30] sm:$0xff] }
 0xa59   : > { %12071 = vmatprep.subr.bf16.mxu1 %v12070_v38 }
 0xa5c   : > { %12073 = vmatpush3.bf16.msra.mxu1 %v12070_v38  ;;  %v12242_v38 = vpack.c.bf16 %v4681_v60, %v4680_v49  ;;  %v4860_v60 = vld [vmem:[#allocation8 + $0xc40] sm:$0xff] }
 0xa5d   : > { %12075 = vmatprep.subr.bf16.mxu1 %v12074_v1 }
 0xa60   : > { %12077 = vmatpush3.bf16.msra.mxu1 %v12074_v1 }
 0xa61   : > { %12079 = vmatprep.subr.bf16.mxu1 %v12078_v2 }
 0xa64   : > { %12081 = vmatpush3.bf16.msra.mxu1 %v12078_v2  ;;  %v14221_v1 = vpop.f32.mrb[52].mxu0  ;;  %v4684_v2 = vld [vmem:[#allocation8 + $0xba0] sm:$0xff] }
 0xa65   : > { %12115 = vmatprep.subr.bf16.mxu1 %v12114_v41  ;;  %v14223_v6 = vpop.f32.mrb[53].mxu0  ;;  %v12250_v46 = vpack.c.bf16 %v4685_v42, %v4684_v2  ;;  %v4864_v2 = vld [vmem:[#allocation8 + $0xc60] sm:$0xff]  ;;  %v4865_v42 = vld [vmem:[#allocation8 + $0xc68] sm:$0xff] }
 0xa67   : > { %9726 = vmatmul.mubr.f32.vlgmr.msra.gmra.mrb[4].mxu1 %v14185_v30  ;;  %v12134_v30 = vpack.c.bf16 %v4347_v59, %v4346_v58  ;;  %v5307_v58 = vld [vmem:[#allocation11 + $0x30] sm:$0xff]  ;;  %v5308_v59 = vld [vmem:[#allocation11 + $0x38] sm:$0xff] }
 0xa68   : > { %12117 = vmatpush3.bf16.msra.mxu1 %v12114_v41  ;;  %9795 = vmatprep.mubr.f32.mxu1 %v14193_v34  ;;  %v12138_v34 = vpack.c.bf16 %v4349_v62, %v4348_v61  ;;  %v5302_v41 = vld [vmem:[#allocation11 + $0x8] sm:$0xff]  ;;  %v4691_v62 = vld [vmem:[#allocation8 + $0xbd8] sm:$0xff] }
 0xa69   : > { %12119 = vmatprep.subr.bf16.mxu1 %v12118_v45  ;;  %v12467_v11 = vpack.c.bf16 %v5302_v41, %v5301_v9  ;;  %v4690_v61 = vld [vmem:[#allocation8 + $0xbd0] sm:$0xff]  ;;  %v4867_v41 = vld [vmem:[#allocation8 + $0xc78] sm:$0xff] }
 0xa6a   : > { %v4866_v9 = vld [vmem:[#allocation8 + $0xc70] sm:$0xff] }
 0xa6b   : > { %12468 = vmatpush3.bf16.msra.mxu0 %v12467_v11  ;;  %v5024_v11 = vld [vmem:[#allocation8 + $0xc80] sm:$0xff] }
 0xa6c   : > { %12121 = vmatpush3.bf16.msra.mxu1 %v12118_v45  ;;  %v5304_v45 = vld [vmem:[#allocation11 + $0x18] sm:$0xff]  ;;  %12469 = vmatprep.subr.bf16.mxu0 %v13335_v47 }
 0xa6d   : > { %12123 = vmatprep.subr.bf16.mxu1 %v12122_v31  ;;  %v12470_v51 = vpack.c.bf16 %v5304_v45, %v5303_v44  ;;  %v12334_v44 = vpack.c.bf16 %v4867_v41, %v4866_v9  ;;  %v5025_v45 = vld [vmem:[#allocation8 + $0xc88] sm:$0xff]  ;;  %v5391_v41 = vld [vmem:[#allocation11 + $0x90] sm:$0xff] }
 0xa6f   : > { %12471 = vmatpush3.bf16.msra.mxu0 %v12470_v51 }
 0xa70   : > { %12125 = vmatpush3.bf16.msra.mxu1 %v12122_v31  ;;  %v4686_v31 = vld [vmem:[#allocation8 + $0xbb0] sm:$0xff]  ;;  %12472 = vmatprep.subr.bf16.mxu0 %v13335_v47 }
 0xa71   : > { %12127 = vmatprep.subr.bf16.mxu1 %v12126_v52  ;;  %v12254_v54 = vpack.c.bf16 %v4687_v19, %v4686_v31  ;;  %v5026_v31 = vld [vmem:[#allocation8 + $0xc90] sm:$0xff]  ;;  %v5027_v19 = vld [vmem:[#allocation8 + $0xc98] sm:$0xff] }
 0xa72   : > { %v12374_v51 = vpack.c.bf16 %v5027_v19, %v5026_v31  ;;  %v5395_v19 = vld [vmem:[#allocation11 + $0xb0] sm:$0xff] }
 0xa74   : > { %12129 = vmatpush3.bf16.msra.mxu1 %v12126_v52  ;;  %v5306_v52 = vld [vmem:[#allocation11 + $0x28] sm:$0xff] }
 0xa75   : > { %12131 = vmatprep.subr.bf16.mxu1 %v12130_v57 }
 0xa78   : > { %12133 = vmatpush3.bf16.msra.mxu1 %v12130_v57 }
 0xa79   : > { %12135 = vmatprep.subr.bf16.mxu1 %v12134_v30 }
 0xa7c   : > { %12137 = vmatpush3.bf16.msra.mxu1 %v12134_v30 }
 0xa7d   : > { %12139 = vmatprep.subr.bf16.mxu1 %v12138_v34 }
 0xa80   : > { %12141 = vmatpush3.bf16.msra.mxu1 %v12138_v34  ;;  %v12476_v34 = vpack.c.bf16 %v5308_v59, %v5307_v58  ;;  %v5032_v58 = vld [vmem:[#allocation8 + $0xcc0] sm:$0xff]  ;;  %v5033_v59 = vld [vmem:[#allocation8 + $0xcc8] sm:$0xff] }
 0xa81   : > { %12143 = vmatprep.subr.bf16.mxu1 %v12142_v4 }
 0xa84   : > { %12145 = vmatpush3.bf16.msra.mxu1 %v12142_v4  ;;  %v12262_v4 = vpack.c.bf16 %v4691_v62, %v4690_v61  ;;  %v5034_v61 = vld [vmem:[#allocation8 + $0xcd0] sm:$0xff]  ;;  %v5035_v62 = vld [vmem:[#allocation8 + $0xcd8] sm:$0xff] }
 0xa85   : > { %12179 = vmatprep.subr.bf16.mxu1 %v12178_v8 }
 0xa87   : > { %9796 = vmatmul.mubr.f32.vlgmr.msra.gmra.mrb[4].mxu1 %v14191_v50  ;;  %v12198_v50 = vpack.c.bf16 %v4519_v29, %v4518_v28  ;;  %v12306_v28 = vpack.c.bf16 %v4853_v25, %v4852_v24  ;;  %v4854_v29 = vld [vmem:[#allocation8 + $0xc10] sm:$0xff]  ;;  %v5204_v25 = vld [vmem:[#allocation8 + $0xd40] sm:$0xff] }
 0xa88   : > { %12181 = vmatpush3.bf16.msra.mxu1 %v12178_v8  ;;  %9865 = vmatprep.mubr.f32.mxu1 %v14199_v53  ;;  %v12202_v53 = vpack.c.bf16 %v4521_v33, %v4520_v32  ;;  %v12479_v8 = vpack.c.bf16 %v5310_v7, %v5309_v5  ;;  %v4856_v33 = vld [vmem:[#allocation8 + $0xc20] sm:$0xff]  ;;  %v5037_v5 = vld [vmem:[#allocation8 + $0xce8] sm:$0xff]  ;;  %v5038_v7 = vld [vmem:[#allocation8 + $0xcf0] sm:$0xff] }
 0xa89   : > { %12183 = vmatprep.subr.bf16.mxu1 %v12182_v16 }
 0xa8c   : > { %12185 = vmatpush3.bf16.msra.mxu1 %v12182_v16  ;;  %v12266_v16 = vpack.c.bf16 %v4693_v56, %v4692_v10  ;;  %v5196_v56 = vld [vmem:[#allocation8 + $0xd00] sm:$0xff] }
 0xa8d   : > { %12187 = vmatprep.subr.bf16.mxu1 %v12186_v3 }
 0xa90   : > { %12189 = vmatpush3.bf16.msra.mxu1 %v12186_v3  ;;  %v12482_v3 = vpack.c.bf16 %v5312_v63, %v5311_v14  ;;  %v5198_v63 = vld [vmem:[#allocation8 + $0xd10] sm:$0xff] }
 0xa91   : > { %12191 = vmatprep.subr.bf16.mxu1 %v12190_v20 }
 0xa94   : > { %12193 = vmatpush3.bf16.msra.mxu1 %v12190_v20  ;;  %v12270_v20 = vpack.c.bf16 %v4695_v18, %v4694_v0  ;;  %v5200_v18 = vld [vmem:[#allocation8 + $0xd20] sm:$0xff] }
 0xa95   : > { %12195 = vmatprep.subr.bf16.mxu1 %v12194_v26 }
 0xa98   : > { %12197 = vmatpush3.bf16.msra.mxu1 %v12194_v26  ;;  %v12485_v26 = vpack.c.bf16 %v5314_v22, %v5313_v17  ;;  %v5202_v22 = vld [vmem:[#allocation8 + $0xd30] sm:$0xff] }
 0xa99   : > { %12199 = vmatprep.subr.bf16.mxu1 %v12198_v50 }
 0xa9c   : > { %12201 = vmatpush3.bf16.msra.mxu1 %v12198_v50  ;;  %v4855_v50 = vld [vmem:[#allocation8 + $0xc18] sm:$0xff] }
 0xa9d   : > { %12203 = vmatprep.subr.bf16.mxu1 %v12202_v53  ;;  %v12310_v32 = vpack.c.bf16 %v4855_v50, %v4854_v29  ;;  %v5206_v29 = vld [vmem:[#allocation8 + $0xd50] sm:$0xff]  ;;  %v5207_v50 = vld [vmem:[#allocation8 + $0xd58] sm:$0xff] }
 0xaa0   : > { %12205 = vmatpush3.bf16.msra.mxu1 %v12202_v53  ;;  %v4857_v53 = vld [vmem:[#allocation8 + $0xc28] sm:$0xff] }
 0xaa1   : > { %12207 = vmatprep.subr.bf16.mxu1 %v12206_v37  ;;  %v12314_v35 = vpack.c.bf16 %v4857_v53, %v4856_v33  ;;  %v5209_v33 = vld [vmem:[#allocation8 + $0xd68] sm:$0xff]  ;;  %v5210_v53 = vld [vmem:[#allocation8 + $0xd70] sm:$0xff] }
 0xaa4   : > { %12209 = vmatpush3.bf16.msra.mxu1 %v12206_v37  ;;  %v4859_v37 = vld [vmem:[#allocation8 + $0xc38] sm:$0xff] }
 0xaa5   : > { %12243 = vmatprep.subr.bf16.mxu1 %v12242_v38  ;;  %v12318_v49 = vpack.c.bf16 %v4859_v37, %v4858_v36  ;;  %v5315_v37 = vld [vmem:[#allocation11 + $0x70] sm:$0xff] }
 0xaa7   : > { %9866 = vmatmul.mubr.f32.vlgmr.msra.gmra.mrb[4].mxu1 %v14197_v48  ;;  %v5305_v48 = vld [vmem:[#allocation11 + $0x20] sm:$0xff] }
 0xaa8   : > { %12245 = vmatpush3.bf16.msra.mxu1 %v12242_v38  ;;  %9935 = vmatprep.mubr.f32.mxu1 %v14205_v23  ;;  %v4689_v23 = vld [vmem:[#allocation8 + $0xbc8] sm:$0xff]  ;;  %v12473_v57 = vpack.c.bf16 %v5306_v52, %v5305_v48  ;;  %v5028_v48 = vld [vmem:[#allocation8 + $0xca0] sm:$0xff] }
 0xaa9   : > { %12247 = vmatprep.subr.bf16.mxu1 %v12246_v13  ;;  %v12258_v30 = vpack.c.bf16 %v4689_v23, %v4688_v55  ;;  %v4861_v38 = vld [vmem:[#allocation8 + $0xc48] sm:$0xff]  ;;  %v5030_v55 = vld [vmem:[#allocation8 + $0xcb0] sm:$0xff]  ;;  %v5031_v23 = vld [vmem:[#allocation8 + $0xcb8] sm:$0xff] }
 0xaaa   : > { %12474 = vmatpush3.bf16.msra.mxu0 %v12473_v57  ;;  %v12322_v39 = vpack.c.bf16 %v4861_v38, %v4860_v60  ;;  %v5029_v52 = vld [vmem:[#allocation8 + $0xca8] sm:$0xff]  ;;  %v12382_v57 = vpack.c.bf16 %v5031_v23, %v5030_v55  ;;  %v13337_v38 = vmov 0.0   ;;  %v5399_v23 = vld [vmem:[#allocation11 + $0xd0] sm:$0xff] }
 0xaab   : > { %12475 = vmatprep.subr.bf16.mxu0 %v13335_v47  ;;  %10180 = vmatprep.mubr.msk.f32.mxu0 %vm13336_vm4, %v13337_v38 }
 0xaac   : > { %12249 = vmatpush3.bf16.msra.mxu1 %v12246_v13  ;;  %v4863_v13 = vld [vmem:[#allocation8 + $0xc58] sm:$0xff] }
 0xaad   : > { %12251 = vmatprep.subr.bf16.mxu1 %v12250_v46 }
 0xaae   : > { %12477 = vmatpush3.bf16.msra.mxu0 %v12476_v34  ;;  %v5036_v34 = vld [vmem:[#allocation8 + $0xce0] sm:$0xff] }
 0xaaf   : > { %12478 = vmatprep.subr.bf16.mxu0 %v13335_v47 }
 0xab0   : > { %12253 = vmatpush3.bf16.msra.mxu1 %v12250_v46  ;;  %v12370_v46 = vpack.c.bf16 %v5025_v45, %v5024_v11  ;;  %v5393_v45 = vld [vmem:[#allocation11 + $0xa0] sm:$0xff] }
 0xab1   : > { %12255 = vmatprep.subr.bf16.mxu1 %v12254_v54 }
 0xab2   : > { %12480 = vmatpush3.bf16.msra.mxu0 %v12479_v8  ;;  %v5197_v8 = vld [vmem:[#allocation8 + $0xd08] sm:$0xff] }
 0xab3   : > { %12481 = vmatprep.subr.bf16.mxu0 %v13335_v47  ;;  %v12434_v14 = vpack.c.bf16 %v5197_v8, %v5196_v56  ;;  %v5483_v56 = vld [vmem:[#allocation11 + $0x118] sm:$0xff] }
 0xab4   : > { %12257 = vmatpush3.bf16.msra.mxu1 %v12254_v54  ;;  %v12378_v54 = vpack.c.bf16 %v5029_v52, %v5028_v48  ;;  %v5397_v52 = vld [vmem:[#allocation11 + $0xc0] sm:$0xff] }
 0xab5   : > { %12259 = vmatprep.subr.bf16.mxu1 %v12258_v30 }
 0xab6   : > { %12483 = vmatpush3.bf16.msra.mxu0 %v12482_v3  ;;  %v5201_v3 = vld [vmem:[#allocation8 + $0xd28] sm:$0xff] }
 0xab7   : > { %12484 = vmatprep.subr.bf16.mxu0 %v13335_v47  ;;  %v12442_v17 = vpack.c.bf16 %v5201_v3, %v5200_v18  ;;  %v5487_v18 = vld [vmem:[#allocation11 + $0x138] sm:$0xff] }
 0xab8   : > { %12261 = vmatpush3.bf16.msra.mxu1 %v12258_v30  ;;  %v12386_v30 = vpack.c.bf16 %v5033_v59, %v5032_v58  ;;  %v5401_v59 = vld [vmem:[#allocation11 + $0xe0] sm:$0xff] }
 0xab9   : > { %12263 = vmatprep.subr.bf16.mxu1 %v12262_v4 }
 0xaba   : > { %12486 = vmatpush3.bf16.msra.mxu0 %v12485_v26  ;;  %v5205_v26 = vld [vmem:[#allocation8 + $0xd48] sm:$0xff] }
 0xabb   : > { %12487 = vmatprep.subr.bf16.mxu0 %v13335_v47 }
 0xabc   : > { %12265 = vmatpush3.bf16.msra.mxu1 %v12262_v4  ;;  %v5039_v4 = vld [vmem:[#allocation8 + $0xcf8] sm:$0xff] }
 0xabd   : > { %12267 = vmatprep.subr.bf16.mxu1 %v12266_v16  ;;  %v12398_v10 = vpack.c.bf16 %v5039_v4, %v5038_v7 }
 0xac0   : > { %12269 = vmatpush3.bf16.msra.mxu1 %v12266_v16  ;;  %v5199_v16 = vld [vmem:[#allocation8 + $0xd18] sm:$0xff] }
 0xac1   : > { %12271 = vmatprep.subr.bf16.mxu1 %v12270_v20  ;;  %v12438_v0 = vpack.c.bf16 %v5199_v16, %v5198_v63  ;;  %v5485_v63 = vld [vmem:[#allocation11 + $0x128] sm:$0xff] }
 0xac4   : > { %12273 = vmatpush3.bf16.msra.mxu1 %v12270_v20  ;;  %v5203_v20 = vld [vmem:[#allocation8 + $0xd38] sm:$0xff] }
 0xac5   : > { %12307 = vmatprep.subr.bf16.mxu1 %v12306_v28  ;;  %v12446_v24 = vpack.c.bf16 %v5203_v20, %v5202_v22  ;;  %v5489_v22 = vld [vmem:[#allocation11 + $0x148] sm:$0xff] }
 0xac7   : > { %9936 = vmatmul.mubr.f32.vlgmr.msra.gmra.mrb[4].mxu1 %v14203_v21  ;;  %v12326_v21 = vpack.c.bf16 %v4863_v13, %v4862_v40  ;;  %v5389_v13 = vld [vmem:[#allocation11 + $0x80] sm:$0xff] }
 0xac8   : > { %12309 = vmatpush3.bf16.msra.mxu1 %v12306_v28  ;;  %10005 = vmatprep.mubr.f32.mxu1 %v14211_v27  ;;  %v12330_v27 = vpack.c.bf16 %v4865_v42, %v4864_v2  ;;  %v12450_v28 = vpack.c.bf16 %v5205_v26, %v5204_v25  ;;  %v5491_v25 = vld [vmem:[#allocation11 + $0x158] sm:$0xff] }
 0xac9   : > { %12311 = vmatprep.subr.bf16.mxu1 %v12310_v32 }
 0xacc   : > { %12313 = vmatpush3.bf16.msra.mxu1 %v12310_v32  ;;  %v5208_v32 = vld [vmem:[#allocation8 + $0xd60] sm:$0xff] }
 0xacd   : > { %12315 = vmatprep.subr.bf16.mxu1 %v12314_v35 }
 0xad0   : > { %12317 = vmatpush3.bf16.msra.mxu1 %v12314_v35  ;;  %v5211_v35 = vld [vmem:[#allocation8 + $0xd78] sm:$0xff] }
 0xad1   : > { %12319 = vmatprep.subr.bf16.mxu1 %v12318_v49  ;;  %v12462_v36 = vpack.c.bf16 %v5211_v35, %v5210_v53  ;;  %v5571_v53 = vld [vmem:[#allocation11 + $0x188] sm:$0xff] }
 0xad4   : > { %12321 = vmatpush3.bf16.msra.mxu1 %v12318_v49  ;;  %v5316_v49 = vld [vmem:[#allocation11 + $0x78] sm:$0xff] }
 0xad5   : > { %12323 = vmatprep.subr.bf16.mxu1 %v12322_v39  ;;  %v12488_v60 = vpack.c.bf16 %v5316_v49, %v5315_v37  ;;  %v5572_v37 = vld [vmem:[#allocation11 + $0x190] sm:$0xff]  ;;  %v5573_v49 = vld [vmem:[#allocation11 + $0x198] sm:$0xff] }
 0xad7   : > { %12489 = vmatpush3.bf16.msra.mxu0 %v12488_v60  ;;  %v12542_v60 = vpack.c.bf16 %v5573_v49, %v5572_v37  ;;  %v5759_v37 = vld [vmem:[#allocation11 + $0x2c8] sm:$0xff] }
 0xad8   : > { %12325 = vmatpush3.bf16.msra.mxu1 %v12322_v39  ;;  %12490 = vmatprep.subr.bf16.mxu0 %v13335_v47  ;;  %v6926_v39 = vld [vmem:[#allocation10] ss:$0 sm:$0xff] }
 0xad9   : > { %12327 = vmatprep.subr.bf16.mxu1 %v12326_v21 }
 0xadc   : > { %12329 = vmatpush3.bf16.msra.mxu1 %v12326_v21  ;;  %v5390_v21 = vld [vmem:[#allocation11 + $0x88] sm:$0xff] }
 0xadd   : > { %12331 = vmatprep.subr.bf16.mxu1 %v12330_v27 }
 0xae0   : > { %12333 = vmatpush3.bf16.msra.mxu1 %v12330_v27 }
 0xae1   : > { %12335 = vmatprep.subr.bf16.mxu1 %v12334_v44 }
 0xae4   : > { %12337 = vmatpush3.bf16.msra.mxu1 %v12334_v44  ;;  %v5392_v44 = vld [vmem:[#allocation11 + $0x98] sm:$0xff] }
 0xae5   : > { %12371 = vmatprep.subr.bf16.mxu1 %v12370_v46  ;;  %v12494_v11 = vpack.c.bf16 %v5392_v44, %v5391_v41  ;;  %v5579_v41 = vld [vmem:[#allocation11 + $0x1c8] sm:$0xff] }
 0xae7   : > { %10006 = vmatmul.mubr.f32.vlgmr.msra.gmra.mrb[4].mxu1 %v14209_v43  ;;  %v12390_v43 = vpack.c.bf16 %v5035_v62, %v5034_v61  ;;  %v5403_v62 = vld [vmem:[#allocation11 + $0xf0] sm:$0xff] }
 0xae8   : > { %12373 = vmatpush3.bf16.msra.mxu1 %v12370_v46  ;;  %10075 = vmatprep.mubr.f32.mxu1 %v14217_v15  ;;  %v12394_v15 = vpack.c.bf16 %v5037_v5, %v5036_v34  ;;  %v5394_v46 = vld [vmem:[#allocation11 + $0xa8] sm:$0xff]  ;;  %v5480_v5 = vld [vmem:[#allocation11 + $0x100] sm:$0xff] }
 0xae9   : > { %12375 = vmatprep.subr.bf16.mxu1 %v12374_v51  ;;  %v12497_v31 = vpack.c.bf16 %v5394_v46, %v5393_v45  ;;  %v5581_v45 = vld [vmem:[#allocation11 + $0x1d8] sm:$0xff] }
 0xaec   : > { %12377 = vmatpush3.bf16.msra.mxu1 %v12374_v51  ;;  %v5396_v51 = vld [vmem:[#allocation11 + $0xb8] sm:$0xff] }
 0xaed   : > { %12379 = vmatprep.subr.bf16.mxu1 %v12378_v54  ;;  %v12500_v48 = vpack.c.bf16 %v5396_v51, %v5395_v19  ;;  %v5583_v19 = vld [vmem:[#allocation11 + $0x1e8] sm:$0xff] }
 0xaf0   : > { %12381 = vmatpush3.bf16.msra.mxu1 %v12378_v54  ;;  %v5398_v54 = vld [vmem:[#allocation11 + $0xc8] sm:$0xff] }
 0xaf1   : > { %12383 = vmatprep.subr.bf16.mxu1 %v12382_v57  ;;  %v12503_v55 = vpack.c.bf16 %v5398_v54, %v5397_v52  ;;  %v5585_v52 = vld [vmem:[#allocation11 + $0x1f8] sm:$0xff] }
 0xaf4   : > { %12385 = vmatpush3.bf16.msra.mxu1 %v12382_v57  ;;  %v5400_v57 = vld [vmem:[#allocation11 + $0xd8] sm:$0xff] }
 0xaf5   : > { %12387 = vmatprep.subr.bf16.mxu1 %v12386_v30  ;;  %v12506_v58 = vpack.c.bf16 %v5400_v57, %v5399_v23  ;;  %v5661_v23 = vld [vmem:[#allocation11 + $0x208] sm:$0xff] }
 0xaf8   : > { %12389 = vmatpush3.bf16.msra.mxu1 %v12386_v30  ;;  %v5402_v30 = vld [vmem:[#allocation11 + $0xe8] sm:$0xff] }
 0xaf9   : > { %12391 = vmatprep.subr.bf16.mxu1 %v12390_v43  ;;  %v12509_v61 = vpack.c.bf16 %v5402_v30, %v5401_v59  ;;  %v5662_v59 = vld [vmem:[#allocation11 + $0x210] sm:$0xff]  ;;  %v5663_v30 = vld [vmem:[#allocation11 + $0x218] sm:$0xff] }
 0xafc   : > { %12393 = vmatpush3.bf16.msra.mxu1 %v12390_v43  ;;  %v5404_v43 = vld [vmem:[#allocation11 + $0xf8] sm:$0xff] }
 0xafd   : > { %12395 = vmatprep.subr.bf16.mxu1 %v12394_v15  ;;  %v12512_v34 = vpack.c.bf16 %v5404_v43, %v5403_v62  ;;  %v5664_v62 = vld [vmem:[#allocation11 + $0x220] sm:$0xff]  ;;  %v5665_v43 = vld [vmem:[#allocation11 + $0x228] sm:$0xff] }
 0xb00   : > { %12397 = vmatpush3.bf16.msra.mxu1 %v12394_v15  ;;  %v5481_v15 = vld [vmem:[#allocation11 + $0x108] sm:$0xff] }
 0xb01   : > { %12399 = vmatprep.subr.bf16.mxu1 %v12398_v10  ;;  %v12515_v7 = vpack.c.bf16 %v5481_v15, %v5480_v5  ;;  %v5666_v5 = vld [vmem:[#allocation11 + $0x230] sm:$0xff]  ;;  %v5667_v15 = vld [vmem:[#allocation11 + $0x238] sm:$0xff] }
 0xb04   : > { %12401 = vmatpush3.bf16.msra.mxu1 %v12398_v10  ;;  %v5482_v10 = vld [vmem:[#allocation11 + $0x110] sm:$0xff] }
 0xb05   : > { %12435 = vmatprep.subr.bf16.mxu1 %v12434_v14  ;;  %v12518_v8 = vpack.c.bf16 %v5483_v56, %v5482_v10  ;;  %v5669_v10 = vld [vmem:[#allocation11 + $0x248] sm:$0xff] }
 0xb07   : > { %10076 = vmatmul.mubr.f32.vlgmr.msra.gmra.mrb[4].mxu1 %v14215_v12  ;;  %v12454_v12 = vpack.c.bf16 %v5207_v50, %v5206_v29  ;;  %v5493_v29 = vld [vmem:[#allocation11 + $0x168] sm:$0xff] }
 0xb08   : > { %12437 = vmatpush3.bf16.msra.mxu1 %v12434_v14  ;;  %10145 = vmatprep.mubr.f32.mxu1 %v14223_v6  ;;  %v12458_v6 = vpack.c.bf16 %v5209_v33, %v5208_v32  ;;  %v5484_v14 = vld [vmem:[#allocation11 + $0x120] sm:$0xff]  ;;  %v5495_v32 = vld [vmem:[#allocation11 + $0x178] sm:$0xff] }
 0xb09   : > { %12439 = vmatprep.subr.bf16.mxu1 %v12438_v0  ;;  %v12521_v16 = vpack.c.bf16 %v5485_v63, %v5484_v14  ;;  %v5671_v14 = vld [vmem:[#allocation11 + $0x258] sm:$0xff] }
 0xb0c   : > { %12441 = vmatpush3.bf16.msra.mxu1 %v12438_v0  ;;  %v5486_v0 = vld [vmem:[#allocation11 + $0x130] sm:$0xff] }
 0xb0d   : > { %12443 = vmatprep.subr.bf16.mxu1 %v12442_v17  ;;  %v12524_v3 = vpack.c.bf16 %v5487_v18, %v5486_v0  ;;  %v5673_v0 = vld [vmem:[#allocation11 + $0x268] sm:$0xff] }
 0xb10   : > { %12445 = vmatpush3.bf16.msra.mxu1 %v12442_v17  ;;  %v5488_v17 = vld [vmem:[#allocation11 + $0x140] sm:$0xff] }
 0xb11   : > { %12447 = vmatprep.subr.bf16.mxu1 %v12446_v24  ;;  %v12527_v20 = vpack.c.bf16 %v5489_v22, %v5488_v17  ;;  %v5675_v17 = vld [vmem:[#allocation11 + $0x278] sm:$0xff] }
 0xb14   : > { %12449 = vmatpush3.bf16.msra.mxu1 %v12446_v24  ;;  %v5490_v24 = vld [vmem:[#allocation11 + $0x150] sm:$0xff] }
 0xb15   : > { %12451 = vmatprep.subr.bf16.mxu1 %v12450_v28  ;;  %v12530_v26 = vpack.c.bf16 %v5491_v25, %v5490_v24  ;;  %v5751_v24 = vld [vmem:[#allocation11 + $0x288] sm:$0xff] }
 0xb18   : > { %12453 = vmatpush3.bf16.msra.mxu1 %v12450_v28  ;;  %v5492_v28 = vld [vmem:[#allocation11 + $0x160] sm:$0xff] }
 0xb19   : > { %12455 = vmatprep.subr.bf16.mxu1 %v12454_v12  ;;  %v12533_v50 = vpack.c.bf16 %v5493_v29, %v5492_v28  ;;  %v5752_v28 = vld [vmem:[#allocation11 + $0x290] sm:$0xff]  ;;  %v5753_v29 = vld [vmem:[#allocation11 + $0x298] sm:$0xff] }
 0xb1c   : > { %12457 = vmatpush3.bf16.msra.mxu1 %v12454_v12  ;;  %v5494_v12 = vld [vmem:[#allocation11 + $0x170] sm:$0xff] }
 0xb1d   : > { %12459 = vmatprep.subr.bf16.mxu1 %v12458_v6  ;;  %v12536_v33 = vpack.c.bf16 %v5495_v32, %v5494_v12  ;;  %v5754_v12 = vld [vmem:[#allocation11 + $0x2a0] sm:$0xff]  ;;  %v5755_v32 = vld [vmem:[#allocation11 + $0x2a8] sm:$0xff] }
 0xb20   : > { %12461 = vmatpush3.bf16.msra.mxu1 %v12458_v6  ;;  %v5570_v6 = vld [vmem:[#allocation11 + $0x180] sm:$0xff] }
 0xb21   : > { %12463 = vmatprep.subr.bf16.mxu1 %v12462_v36  ;;  %v12539_v35 = vpack.c.bf16 %v5571_v53, %v5570_v6  ;;  %v5756_v6 = vld [vmem:[#allocation11 + $0x2b0] sm:$0xff]  ;;  %v5757_v53 = vld [vmem:[#allocation11 + $0x2b8] sm:$0xff] }
 0xb24   : > { %12465 = vmatpush3.bf16.msra.mxu1 %v12462_v36 }
 0xb27   : > { %10146 = vmatmul.mubr.f32.vlgmr.msra.gmra.mrb[4].mxu1 %v14221_v1  ;;  %v12491_v1 = vpack.c.bf16 %v5390_v21, %v5389_v13  ;;  %v5576_v21 = vld [vmem:[#allocation11 + $0x1b0] sm:$0xff] }
 0xbfa   : > { %v10147_v40 = vpop.f32.mrb[4].mxu1 }
 0xbfb   : > { %v14245_v2 = vadd.f32 %v10147_v40, %v6926_v39  ;;  %v5278_v42 = vpop.f32.mrb[5].mxu1  ;;  %v5575_v40 = vld [vmem:[#allocation11 + $0x1a8] sm:$0xff] }
 0xbfc   : > { %v5296_v27 = vadd.f32 %v6926_v39, %v5278_v42  ;;  %v5574_v39 = vld [vmem:[#allocation11 + $0x1a0] sm:$0xff]  ;;  %v5577_v42 = vld [vmem:[#allocation11 + $0x1b8] sm:$0xff] }
 0xbfd   : > { %v12545_v13 = vpack.c.bf16 %v5575_v40, %v5574_v39  ;;  %v5761_v39 = vld [vmem:[#allocation11 + $0x2d8] sm:$0xff] }
 0xbfe   : > { %v14247_v9 = vmax.f32 %v5296_v27, 0.0  ;;  %v12548_v27 = vpack.c.bf16 %v5577_v42, %v5576_v21  ;;  %v5763_v21 = vld [vmem:[#allocation11 + $0x2e8] sm:$0xff] }
 0xc00   : > { %10181 = vmatmul.mubr.f32.vlgmr.msra.gmra.mrb[54].mxu0 %v14247_v9  ;;  %v5406_v4 = vrot.slane %v14247_v9, 1  ;;  %v5496_v36 = vrot.slane %v14247_v9, 2 }
 0xc01   : > { %12492 = vmatpush3.bf16.msra.mxu0 %v12491_v1  ;;  %10215 = vmatprep.mubr.msk.f32.mxu0 %vm13336_vm4, %v13337_v38  ;;  %v5578_v1 = vld [vmem:[#allocation11 + $0x1c0] sm:$0xff] }
 0xc02   : > { %12493 = vmatprep.subr.bf16.mxu0 %v13335_v47  ;;  %v12551_v44 = vpack.c.bf16 %v5579_v41, %v5578_v1  ;;  %v5765_v1 = vld [vmem:[#allocation11 + $0x2f8] sm:$0xff] }
 0xc05   : > { %12495 = vmatpush3.bf16.msra.mxu0 %v12494_v11  ;;  %v5580_v11 = vld [vmem:[#allocation11 + $0x1d0] sm:$0xff] }
 0xc06   : > { %12496 = vmatprep.subr.bf16.mxu0 %v13335_v47  ;;  %v12554_v46 = vpack.c.bf16 %v5581_v45, %v5580_v11  ;;  %v5841_v11 = vld [vmem:[#allocation11 + $0x308] sm:$0xff] }
 0xc09   : > { %12498 = vmatpush3.bf16.msra.mxu0 %v12497_v31  ;;  %v5582_v31 = vld [vmem:[#allocation11 + $0x1e0] sm:$0xff] }
 0xc0a   : > { %12499 = vmatprep.subr.bf16.mxu0 %v13335_v47  ;;  %v12557_v51 = vpack.c.bf16 %v5583_v19, %v5582_v31  ;;  %v5842_v31 = vld [vmem:[#allocation11 + $0x310] sm:$0xff]  ;;  %v5843_v19 = vld [vmem:[#allocation11 + $0x318] sm:$0xff] }
 0xc0d   : > { %12501 = vmatpush3.bf16.msra.mxu0 %v12500_v48  ;;  %v5584_v48 = vld [vmem:[#allocation11 + $0x1f0] sm:$0xff] }
 0xc0e   : > { %12502 = vmatprep.subr.bf16.mxu0 %v13335_v47  ;;  %v12560_v54 = vpack.c.bf16 %v5585_v52, %v5584_v48  ;;  %v5844_v48 = vld [vmem:[#allocation11 + $0x320] sm:$0xff]  ;;  %v5845_v52 = vld [vmem:[#allocation11 + $0x328] sm:$0xff] }
 0xc11   : > { %12504 = vmatpush3.bf16.msra.mxu0 %v12503_v55  ;;  %v5660_v55 = vld [vmem:[#allocation11 + $0x200] sm:$0xff] }
 0xc12   : > { %12505 = vmatprep.subr.bf16.mxu0 %v13335_v47  ;;  %v12563_v57 = vpack.c.bf16 %v5661_v23, %v5660_v55  ;;  %v5846_v55 = vld [vmem:[#allocation11 + $0x330] sm:$0xff]  ;;  %v5847_v23 = vld [vmem:[#allocation11 + $0x338] sm:$0xff] }
 0xc15   : > { %12507 = vmatpush3.bf16.msra.mxu0 %v12506_v58  ;;  %v5586_v58 = vrot.slane %v14247_v9, 3 }
 0xc16   : > { %12508 = vmatprep.subr.bf16.mxu0 %v13335_v47 }
 0xc19   : > { %12510 = vmatpush3.bf16.msra.mxu0 %v12509_v61  ;;  %v12566_v61 = vpack.c.bf16 %v5663_v30, %v5662_v59  ;;  %v5849_v59 = vld [vmem:[#allocation11 + $0x348] sm:$0xff] }
 0xc1a   : > { %12511 = vmatprep.subr.bf16.mxu0 %v13335_v47 }
 0xc1d   : > { %12513 = vmatpush3.bf16.msra.mxu0 %v12512_v34  ;;  %v12569_v34 = vpack.c.bf16 %v5665_v43, %v5664_v62  ;;  %v5851_v62 = vld [vmem:[#allocation11 + $0x358] sm:$0xff] }
 0xc1e   : > { %12514 = vmatprep.subr.bf16.mxu0 %v13335_v47 }
 0xc20   : > { %10216 = vmatmul.mubr.f32.vlgmr.msra.gmra.mrb[54].mxu0 %v5406_v4  ;;  %v5668_v4 = vld [vmem:[#allocation11 + $0x240] sm:$0xff] }
 0xc21   : > { %12516 = vmatpush3.bf16.msra.mxu0 %v12515_v7  ;;  %10250 = vmatprep.mubr.msk.f32.mxu0 %vm13336_vm4, %v13337_v38  ;;  %v12572_v7 = vpack.c.bf16 %v5667_v15, %v5666_v5  ;;  %v12575_v56 = vpack.c.bf16 %v5669_v10, %v5668_v4  ;;  %v5853_v5 = vld [vmem:[#allocation11 + $0x368] sm:$0xff]  ;;  %v5855_v4 = vld [vmem:[#allocation11 + $0x378] sm:$0xff] }
 0xc22   : > { %12517 = vmatprep.subr.bf16.mxu0 %v13335_v47 }
 0xc25   : > { %12519 = vmatpush3.bf16.msra.mxu0 %v12518_v8  ;;  %v5670_v8 = vld [vmem:[#allocation11 + $0x250] sm:$0xff] }
 0xc26   : > { %12520 = vmatprep.subr.bf16.mxu0 %v13335_v47  ;;  %v12578_v63 = vpack.c.bf16 %v5671_v14, %v5670_v8  ;;  %v5931_v8 = vld [vmem:[#allocation11 + $0x388] sm:$0xff] }
 0xc29   : > { %12522 = vmatpush3.bf16.msra.mxu0 %v12521_v16  ;;  %v5672_v16 = vld [vmem:[#allocation11 + $0x260] sm:$0xff] }
 0xc2a   : > { %12523 = vmatprep.subr.bf16.mxu0 %v13335_v47  ;;  %v12581_v18 = vpack.c.bf16 %v5673_v0, %v5672_v16  ;;  %v5932_v16 = vld [vmem:[#allocation11 + $0x390] sm:$0xff]  ;;  %v5933_v0 = vld [vmem:[#allocation11 + $0x398] sm:$0xff] }
 0xc2d   : > { %12525 = vmatpush3.bf16.msra.mxu0 %v12524_v3  ;;  %v5674_v3 = vld [vmem:[#allocation11 + $0x270] sm:$0xff] }
 0xc2e   : > { %12526 = vmatprep.subr.bf16.mxu0 %v13335_v47  ;;  %v12584_v22 = vpack.c.bf16 %v5675_v17, %v5674_v3  ;;  %v5934_v3 = vld [vmem:[#allocation11 + $0x3a0] sm:$0xff]  ;;  %v5935_v17 = vld [vmem:[#allocation11 + $0x3a8] sm:$0xff] }
 0xc31   : > { %12528 = vmatpush3.bf16.msra.mxu0 %v12527_v20  ;;  %v5750_v20 = vld [vmem:[#allocation11 + $0x280] sm:$0xff] }
 0xc32   : > { %12529 = vmatprep.subr.bf16.mxu0 %v13335_v47  ;;  %v12587_v25 = vpack.c.bf16 %v5751_v24, %v5750_v20  ;;  %v5936_v20 = vld [vmem:[#allocation11 + $0x3b0] sm:$0xff]  ;;  %v5937_v24 = vld [vmem:[#allocation11 + $0x3b8] sm:$0xff] }
 0xc35   : > { %12531 = vmatpush3.bf16.msra.mxu0 %v12530_v26  ;;  %v5676_v26 = vrot.slane %v14247_v9, 4 }
 0xc36   : > { %12532 = vmatprep.subr.bf16.mxu0 %v13335_v47 }
 0xc39   : > { %12534 = vmatpush3.bf16.msra.mxu0 %v12533_v50  ;;  %v12590_v50 = vpack.c.bf16 %v5753_v29, %v5752_v28  ;;  %v5939_v28 = vld [vmem:[#allocation11 + $0x3c8] sm:$0xff] }
 0xc3a   : > { %12535 = vmatprep.subr.bf16.mxu0 %v13335_v47 }
 0xc3d   : > { %12537 = vmatpush3.bf16.msra.mxu0 %v12536_v33  ;;  %v12593_v33 = vpack.c.bf16 %v5755_v32, %v5754_v12  ;;  %v5941_v12 = vld [vmem:[#allocation11 + $0x3d8] sm:$0xff] }
 0xc3e   : > { %12538 = vmatprep.subr.bf16.mxu0 %v13335_v47 }
 0xc40   : > { %10251 = vmatmul.mubr.f32.vlgmr.msra.gmra.mrb[54].mxu0 %v5496_v36  ;;  %v5758_v36 = vld [vmem:[#allocation11 + $0x2c0] sm:$0xff] }
 0xc41   : > { %12540 = vmatpush3.bf16.msra.mxu0 %v12539_v35  ;;  %10285 = vmatprep.mubr.msk.f32.mxu0 %vm13336_vm4, %v13337_v38  ;;  %v12596_v35 = vpack.c.bf16 %v5757_v53, %v5756_v6  ;;  %v12599_v49 = vpack.c.bf16 %v5759_v37, %v5758_v36  ;;  %v5943_v6 = vld [vmem:[#allocation11 + $0x3e8] sm:$0xff]  ;;  %v5945_v36 = vld [vmem:[#allocation11 + $0x3f8] sm:$0xff] }
 0xc42   : > { %12541 = vmatprep.subr.bf16.mxu0 %v13335_v47 }
 0xc45   : > { %12543 = vmatpush3.bf16.msra.mxu0 %v12542_v60  ;;  %v5760_v60 = vld [vmem:[#allocation11 + $0x2d0] sm:$0xff] }
 0xc46   : > { %12544 = vmatprep.subr.bf16.mxu0 %v13335_v47  ;;  %v12602_v40 = vpack.c.bf16 %v5761_v39, %v5760_v60  ;;  %v6021_v60 = vld [vmem:[#allocation11 + $0x408] sm:$0xff] }
 0xc49   : > { %12546 = vmatpush3.bf16.msra.mxu0 %v12545_v13  ;;  %v5762_v13 = vld [vmem:[#allocation11 + $0x2e0] sm:$0xff] }
 0xc4a   : > { %12547 = vmatprep.subr.bf16.mxu0 %v13335_v47  ;;  %v12605_v42 = vpack.c.bf16 %v5763_v21, %v5762_v13  ;;  %v6022_v13 = vld [vmem:[#allocation11 + $0x410] sm:$0xff]  ;;  %v6023_v21 = vld [vmem:[#allocation11 + $0x418] sm:$0xff] }
 0xc4d   : > { %12549 = vmatpush3.bf16.msra.mxu0 %v12548_v27  ;;  %v5764_v27 = vld [vmem:[#allocation11 + $0x2f0] sm:$0xff] }
 0xc4e   : > { %12550 = vmatprep.subr.bf16.mxu0 %v13335_v47  ;;  %v12608_v41 = vpack.c.bf16 %v5765_v1, %v5764_v27  ;;  %v6024_v27 = vld [vmem:[#allocation11 + $0x420] sm:$0xff]  ;;  %v6025_v1 = vld [vmem:[#allocation11 + $0x428] sm:$0xff] }
 0xc51   : > { %12552 = vmatpush3.bf16.msra.mxu0 %v12551_v44  ;;  %v5840_v44 = vld [vmem:[#allocation11 + $0x300] sm:$0xff] }
 0xc52   : > { %12553 = vmatprep.subr.bf16.mxu0 %v13335_v47  ;;  %v12611_v45 = vpack.c.bf16 %v5841_v11, %v5840_v44  ;;  %v6026_v44 = vld [vmem:[#allocation11 + $0x430] sm:$0xff] }
 0xc55   : > { %12555 = vmatpush3.bf16.msra.mxu0 %v12554_v46  ;;  %v5766_v46 = vrot.slane %v14247_v9, 5 }
 0xc56   : > { %12556 = vmatprep.subr.bf16.mxu0 %v13335_v47 }
 0xc59   : > { %12558 = vmatpush3.bf16.msra.mxu0 %v12557_v51  ;;  %v12614_v51 = vpack.c.bf16 %v5843_v19, %v5842_v31  ;;  %v6030_v19 = vld [vmem:[#allocation11 + $0x450] sm:$0xff] }
 0xc5a   : > { %12559 = vmatprep.subr.bf16.mxu0 %v13335_v47 }
 0xc5d   : > { %12561 = vmatpush3.bf16.msra.mxu0 %v12560_v54  ;;  %v12617_v54 = vpack.c.bf16 %v5845_v52, %v5844_v48  ;;  %v6032_v52 = vld [vmem:[#allocation11 + $0x460] sm:$0xff] }
 0xc5e   : > { %12562 = vmatprep.subr.bf16.mxu0 %v13335_v47 }
 0xc60   : > { %10286 = vmatmul.mubr.f32.vlgmr.msra.gmra.mrb[54].mxu0 %v5586_v58  ;;  %v5848_v58 = vld [vmem:[#allocation11 + $0x340] sm:$0xff] }
 0xc61   : > { %12564 = vmatpush3.bf16.msra.mxu0 %v12563_v57  ;;  %10320 = vmatprep.mubr.msk.f32.mxu0 %vm13336_vm4, %v13337_v38  ;;  %v12620_v57 = vpack.c.bf16 %v5847_v23, %v5846_v55  ;;  %v12623_v30 = vpack.c.bf16 %v5849_v59, %v5848_v58  ;;  %v6034_v23 = vld [vmem:[#allocation11 + $0x470] sm:$0xff]  ;;  %v6108_v59 = vld [vmem:[#allocation11 + $0x480] sm:$0xff] }
 0xc62   : > { %12565 = vmatprep.subr.bf16.mxu0 %v13335_v47 }
 0xc65   : > { %12567 = vmatpush3.bf16.msra.mxu0 %v12566_v61  ;;  %v5850_v61 = vld [vmem:[#allocation11 + $0x350] sm:$0xff] }
 0xc66   : > { %12568 = vmatprep.subr.bf16.mxu0 %v13335_v47  ;;  %v12626_v43 = vpack.c.bf16 %v5851_v62, %v5850_v61  ;;  %v14337_v62 = vmax.f32 %v14245_v2, 0.0  ;;  %v6114_v2 = vld [vmem:[#allocation11 + $0x4b0] sm:$0xff] }
 0xc69   : > { %12570 = vmatpush3.bf16.msra.mxu0 %v12569_v34  ;;  %v5852_v34 = vld [vmem:[#allocation11 + $0x360] sm:$0xff] }
 0xc6a   : > { %12571 = vmatprep.subr.bf16.mxu0 %v13335_v47  ;;  %v12629_v15 = vpack.c.bf16 %v5853_v5, %v5852_v34  ;;  %v6111_v34 = vld [vmem:[#allocation11 + $0x498] sm:$0xff] }
 0xc6d   : > { %12573 = vmatpush3.bf16.msra.mxu0 %v12572_v7  ;;  %v5854_v7 = vld [vmem:[#allocation11 + $0x370] sm:$0xff] }
 0xc6e   : > { %12574 = vmatprep.subr.bf16.mxu0 %v13335_v47  ;;  %v12632_v10 = vpack.c.bf16 %v5855_v4, %v5854_v7  ;;  %v6113_v7 = vld [vmem:[#allocation11 + $0x4a8] sm:$0xff] }
 0xc71   : > { %12576 = vmatpush3.bf16.msra.mxu0 %v12575_v56  ;;  %v5930_v56 = vld [vmem:[#allocation11 + $0x380] sm:$0xff] }
 0xc72   : > { %12577 = vmatprep.subr.bf16.mxu0 %v13335_v47  ;;  %v12635_v14 = vpack.c.bf16 %v5931_v8, %v5930_v56  ;;  %v6116_v8 = vld [vmem:[#allocation11 + $0x4c0] sm:$0xff] }
 0xc75   : > { %12579 = vmatpush3.bf16.msra.mxu0 %v12578_v63  ;;  %v5856_v63 = vrot.slane %v14247_v9, 6 }
 0xc76   : > { %12580 = vmatprep.subr.bf16.mxu0 %v13335_v47 }
 0xc79   : > { %12582 = vmatpush3.bf16.msra.mxu0 %v12581_v18  ;;  %v12638_v18 = vpack.c.bf16 %v5933_v0, %v5932_v16  ;;  %v6118_v16 = vld [vmem:[#allocation11 + $0x4d0] sm:$0xff]  ;;  %v6119_v0 = vld [vmem:[#allocation11 + $0x4d8] sm:$0xff] }
 0xc7a   : > { %12583 = vmatprep.subr.bf16.mxu0 %v13335_v47 }
 0xc7d   : > { %12585 = vmatpush3.bf16.msra.mxu0 %v12584_v22  ;;  %v12641_v22 = vpack.c.bf16 %v5935_v17, %v5934_v3  ;;  %v6120_v3 = vld [vmem:[#allocation11 + $0x4e0] sm:$0xff]  ;;  %v6121_v17 = vld [vmem:[#allocation11 + $0x4e8] sm:$0xff] }
 0xc7e   : > { %12586 = vmatprep.subr.bf16.mxu0 %v13335_v47 }
 0xc80   : > { %10321 = vmatmul.mubr.f32.vlgmr.msra.gmra.mrb[54].mxu0 %v5676_v26  ;;  %v5938_v26 = vld [vmem:[#allocation11 + $0x3c0] sm:$0xff] }
 0xc81   : > { %12588 = vmatpush3.bf16.msra.mxu0 %v12587_v25  ;;  %10355 = vmatprep.mubr.msk.f32.mxu0 %vm13336_vm4, %v13337_v38  ;;  %v12644_v25 = vpack.c.bf16 %v5937_v24, %v5936_v20  ;;  %v12647_v29 = vpack.c.bf16 %v5939_v28, %v5938_v26  ;;  %v6122_v20 = vld [vmem:[#allocation11 + $0x4f0] sm:$0xff]  ;;  %v6123_v24 = vld [vmem:[#allocation11 + $0x4f8] sm:$0xff]  ;;  %v6199_v26 = vld [vmem:[#allocation11 + $0x500] sm:$0xff] }
 0xc82   : > { %12589 = vmatprep.subr.bf16.mxu0 %v13335_v47  ;;  %v6200_v28 = vld [vmem:[#allocation11 + $0x508] sm:$0xff] }
 0xc85   : > { %12591 = vmatpush3.bf16.msra.mxu0 %v12590_v50  ;;  %v5940_v50 = vld [vmem:[#allocation11 + $0x3d0] sm:$0xff] }
 0xc86   : > { %12592 = vmatprep.subr.bf16.mxu0 %v13335_v47  ;;  %v12650_v32 = vpack.c.bf16 %v5941_v12, %v5940_v50  ;;  %v6125_v50 = vrot.slane %v14337_v62, 1  ;;  %v6201_v12 = vld [vmem:[#allocation11 + $0x510] sm:$0xff] }
 0xc89   : > { %12594 = vmatpush3.bf16.msra.mxu0 %v12593_v33  ;;  %v5942_v33 = vld [vmem:[#allocation11 + $0x3e0] sm:$0xff] }
 0xc8a   : > { %12595 = vmatprep.subr.bf16.mxu0 %v13335_v47  ;;  %v12653_v53 = vpack.c.bf16 %v5943_v6, %v5942_v33  ;;  %v6203_v6 = vld [vmem:[#allocation11 + $0x520] sm:$0xff] }
 0xc8d   : > { %12597 = vmatpush3.bf16.msra.mxu0 %v12596_v35  ;;  %v5944_v35 = vld [vmem:[#allocation11 + $0x3f0] sm:$0xff] }
 0xc8e   : > { %12598 = vmatprep.subr.bf16.mxu0 %v13335_v47  ;;  %v12656_v37 = vpack.c.bf16 %v5945_v36, %v5944_v35  ;;  %v6205_v36 = vld [vmem:[#allocation11 + $0x530] sm:$0xff] }
 0xc91   : > { %12600 = vmatpush3.bf16.msra.mxu0 %v12599_v49  ;;  %v6020_v49 = vld [vmem:[#allocation11 + $0x400] sm:$0xff] }
 0xc92   : > { %12601 = vmatprep.subr.bf16.mxu0 %v13335_v47  ;;  %v12659_v39 = vpack.c.bf16 %v6021_v60, %v6020_v49  ;;  %v6207_v60 = vld [vmem:[#allocation11 + $0x540] sm:$0xff] }
 0xc95   : > { %12603 = vmatpush3.bf16.msra.mxu0 %v12602_v40  ;;  %v5946_v40 = vrot.slane %v14247_v9, 7  ;;  %v6027_v9 = vld [vmem:[#allocation11 + $0x438] sm:$0xff] }
 0xc96   : > { %12604 = vmatprep.subr.bf16.mxu0 %v13335_v47  ;;  %v12668_v11 = vpack.c.bf16 %v6027_v9, %v6026_v44  ;;  %v6213_v44 = vld [vmem:[#allocation11 + $0x570] sm:$0xff]  ;;  %v6214_v9 = vld [vmem:[#allocation11 + $0x578] sm:$0xff] }
 0xc99   : > { %12606 = vmatpush3.bf16.msra.mxu0 %v12605_v42  ;;  %v12662_v42 = vpack.c.bf16 %v6023_v21, %v6022_v13  ;;  %v6209_v13 = vld [vmem:[#allocation11 + $0x550] sm:$0xff]  ;;  %v6210_v21 = vld [vmem:[#allocation11 + $0x558] sm:$0xff] }
 0xc9a   : > { %12607 = vmatprep.subr.bf16.mxu0 %v13335_v47 }
 0xc9d   : > { %12609 = vmatpush3.bf16.msra.mxu0 %v12608_v41  ;;  %v12665_v41 = vpack.c.bf16 %v6025_v1, %v6024_v27  ;;  %v6211_v27 = vld [vmem:[#allocation11 + $0x560] sm:$0xff]  ;;  %v6212_v1 = vld [vmem:[#allocation11 + $0x568] sm:$0xff] }
 0xc9e   : > { %12610 = vmatprep.subr.bf16.mxu0 %v13335_v47 }
 0xca0   : > { %10356 = vmatmul.mubr.f32.vlgmr.msra.gmra.mrb[54].mxu0 %v5766_v46  ;;  %v6029_v46 = vld [vmem:[#allocation11 + $0x448] sm:$0xff] }
 0xca1   : > { %12612 = vmatpush3.bf16.msra.mxu0 %v12611_v45  ;;  %10390 = vmatprep.mubr.msk.f32.mxu0 %vm13336_vm4, %v13337_v38  ;;  %v6028_v45 = vld [vmem:[#allocation11 + $0x440] sm:$0xff] }
 0xca2   : > { %12613 = vmatprep.subr.bf16.mxu0 %v13335_v47  ;;  %v12671_v31 = vpack.c.bf16 %v6029_v46, %v6028_v45  ;;  %v6289_v45 = vld [vmem:[#allocation11 + $0x580] sm:$0xff]  ;;  %v6290_v46 = vld [vmem:[#allocation11 + $0x588] sm:$0xff] }
 0xca5   : > { %12615 = vmatpush3.bf16.msra.mxu0 %v12614_v51  ;;  %v6031_v51 = vld [vmem:[#allocation11 + $0x458] sm:$0xff] }
 0xca6   : > { %12616 = vmatprep.subr.bf16.mxu0 %v13335_v47  ;;  %v12674_v48 = vpack.c.bf16 %v6031_v51, %v6030_v19  ;;  %v6215_v19 = vrot.slane %v14337_v62, 2  ;;  %v6291_v51 = vld [vmem:[#allocation11 + $0x590] sm:$0xff] }
 0xca9   : > { %12618 = vmatpush3.bf16.msra.mxu0 %v12617_v54  ;;  %v6033_v54 = vld [vmem:[#allocation11 + $0x468] sm:$0xff] }
 0xcaa   : > { %12619 = vmatprep.subr.bf16.mxu0 %v13335_v47  ;;  %v12677_v55 = vpack.c.bf16 %v6033_v54, %v6032_v52  ;;  %v6293_v54 = vld [vmem:[#allocation11 + $0x5a0] sm:$0xff] }
 0xcad   : > { %12621 = vmatpush3.bf16.msra.mxu0 %v12620_v57  ;;  %v6035_v57 = vld [vmem:[#allocation11 + $0x478] sm:$0xff] }
 0xcae   : > { %12622 = vmatprep.subr.bf16.mxu0 %v13335_v47  ;;  %v12680_v58 = vpack.c.bf16 %v6035_v57, %v6034_v23  ;;  %v6295_v57 = vld [vmem:[#allocation11 + $0x5b0] sm:$0xff] }
 0xcb1   : > { %12624 = vmatpush3.bf16.msra.mxu0 %v12623_v30  ;;  %v6109_v30 = vld [vmem:[#allocation11 + $0x488] sm:$0xff] }
 0xcb2   : > { %12625 = vmatprep.subr.bf16.mxu0 %v13335_v47  ;;  %v12683_v61 = vpack.c.bf16 %v6109_v30, %v6108_v59  ;;  %v6297_v30 = vld [vmem:[#allocation11 + $0x5c0] sm:$0xff] }
 0xcb5   : > { %12627 = vmatpush3.bf16.msra.mxu0 %v12626_v43  ;;  %v6110_v43 = vld [vmem:[#allocation11 + $0x490] sm:$0xff] }
 0xcb6   : > { %12628 = vmatprep.subr.bf16.mxu0 %v13335_v47  ;;  %v12686_v5 = vpack.c.bf16 %v6111_v34, %v6110_v43  ;;  %v6299_v34 = vld [vmem:[#allocation11 + $0x5d0] sm:$0xff] }
 0xcb9   : > { %12630 = vmatpush3.bf16.msra.mxu0 %v12629_v15  ;;  %v6112_v15 = vld [vmem:[#allocation11 + $0x4a0] sm:$0xff] }
 0xcba   : > { %12631 = vmatprep.subr.bf16.mxu0 %v13335_v47  ;;  %v12689_v4 = vpack.c.bf16 %v6113_v7, %v6112_v15  ;;  %v6301_v7 = vld [vmem:[#allocation11 + $0x5e0] sm:$0xff] }
 0xcbd   : > { %12633 = vmatpush3.bf16.msra.mxu0 %v12632_v10  ;;  %v6115_v10 = vld [vmem:[#allocation11 + $0x4b8] sm:$0xff] }
 0xcbe   : > { %12634 = vmatprep.subr.bf16.mxu0 %v13335_v47  ;;  %v12692_v56 = vpack.c.bf16 %v6115_v10, %v6114_v2  ;;  %v6303_v10 = vld [vmem:[#allocation11 + $0x5f0] sm:$0xff] }
 0xcc0   : > { %10391 = vmatmul.mubr.f32.vlgmr.msra.gmra.mrb[54].mxu0 %v5856_v63 }
 0xcc1   : > { %12636 = vmatpush3.bf16.msra.mxu0 %v12635_v14  ;;  %10425 = vmatprep.mubr.msk.f32.mxu0 %vm13336_vm4, %v13337_v38  ;;  %v6117_v14 = vld [vmem:[#allocation11 + $0x4c8] sm:$0xff] }
 0xcc2   : > { %12637 = vmatprep.subr.bf16.mxu0 %v13335_v47  ;;  %v12695_v63 = vpack.c.bf16 %v6117_v14, %v6116_v8  ;;  %v6379_v14 = vld [vmem:[#allocation11 + $0x600] sm:$0xff] }
 0xcc5   : > { %12639 = vmatpush3.bf16.msra.mxu0 %v12638_v18  ;;  %v12698_v18 = vpack.c.bf16 %v6119_v0, %v6118_v16  ;;  %v6305_v0 = vrot.slane %v14337_v62, 3 }
 0xcc6   : > { %12640 = vmatprep.subr.bf16.mxu0 %v13335_v47 }
 0xcc9   : > { %12642 = vmatpush3.bf16.msra.mxu0 %v12641_v22  ;;  %v12701_v22 = vpack.c.bf16 %v6121_v17, %v6120_v3  ;;  %v6382_v3 = vld [vmem:[#allocation11 + $0x618] sm:$0xff] }
 0xcca   : > { %12643 = vmatprep.subr.bf16.mxu0 %v13335_v47 }
 0xccd   : > { %12645 = vmatpush3.bf16.msra.mxu0 %v12644_v25  ;;  %v12704_v25 = vpack.c.bf16 %v6123_v24, %v6122_v20  ;;  %v6384_v20 = vld [vmem:[#allocation11 + $0x628] sm:$0xff] }
 0xcce   : > { %12646 = vmatprep.subr.bf16.mxu0 %v13335_v47 }
 0xcd1   : > { %12648 = vmatpush3.bf16.msra.mxu0 %v12647_v29  ;;  %v12707_v29 = vpack.c.bf16 %v6200_v28, %v6199_v26  ;;  %v6386_v26 = vld [vmem:[#allocation11 + $0x638] sm:$0xff] }
 0xcd2   : > { %12649 = vmatprep.subr.bf16.mxu0 %v13335_v47 }
 0xcd5   : > { %12651 = vmatpush3.bf16.msra.mxu0 %v12650_v32  ;;  %v6202_v32 = vld [vmem:[#allocation11 + $0x518] sm:$0xff] }
 0xcd6   : > { %12652 = vmatprep.subr.bf16.mxu0 %v13335_v47  ;;  %v12710_v33 = vpack.c.bf16 %v6202_v32, %v6201_v12  ;;  %v6389_v32 = vld [vmem:[#allocation11 + $0x650] sm:$0xff] }
 0xcd9   : > { %12654 = vmatpush3.bf16.msra.mxu0 %v12653_v53  ;;  %v6204_v53 = vld [vmem:[#allocation11 + $0x528] sm:$0xff] }
 0xcda   : > { %12655 = vmatprep.subr.bf16.mxu0 %v13335_v47  ;;  %v12713_v35 = vpack.c.bf16 %v6204_v53, %v6203_v6  ;;  %v6391_v53 = vld [vmem:[#allocation11 + $0x660] sm:$0xff] }
 0xcdd   : > { %12657 = vmatpush3.bf16.msra.mxu0 %v12656_v37  ;;  %v6206_v37 = vld [vmem:[#allocation11 + $0x538] sm:$0xff] }
 0xcde   : > { %12658 = vmatprep.subr.bf16.mxu0 %v13335_v47  ;;  %v12716_v49 = vpack.c.bf16 %v6206_v37, %v6205_v36  ;;  %v6393_v37 = vld [vmem:[#allocation11 + $0x670] sm:$0xff] }
 0xce0   : > { %10426 = vmatmul.mubr.f32.vlgmr.msra.gmra.mrb[54].mxu0 %v5946_v40 }
 0xce1   : > { %12660 = vmatpush3.bf16.msra.mxu0 %v12659_v39  ;;  %10460 = vmatprep.mubr.msk.f32.mxu0 %vm13336_vm4, %v13337_v38  ;;  %v6208_v39 = vld [vmem:[#allocation11 + $0x548] sm:$0xff] }
 0xce2   : > { %12661 = vmatprep.subr.bf16.mxu0 %v13335_v47  ;;  %v12719_v40 = vpack.c.bf16 %v6208_v39, %v6207_v60  ;;  %v6469_v39 = vld [vmem:[#allocation11 + $0x680] sm:$0xff] }
 0xce5   : > { %12663 = vmatpush3.bf16.msra.mxu0 %v12662_v42  ;;  %v12722_v42 = vpack.c.bf16 %v6210_v21, %v6209_v13  ;;  %v6395_v21 = vrot.slane %v14337_v62, 4 }
 0xce6   : > { %12664 = vmatprep.subr.bf16.mxu0 %v13335_v47 }
 0xce9   : > { %12666 = vmatpush3.bf16.msra.mxu0 %v12665_v41  ;;  %v12725_v41 = vpack.c.bf16 %v6212_v1, %v6211_v27  ;;  %v6472_v27 = vld [vmem:[#allocation11 + $0x698] sm:$0xff] }
 0xcea   : > { %12667 = vmatprep.subr.bf16.mxu0 %v13335_v47 }
 0xced   : > { %12669 = vmatpush3.bf16.msra.mxu0 %v12668_v11  ;;  %v12728_v11 = vpack.c.bf16 %v6214_v9, %v6213_v44  ;;  %v6474_v44 = vld [vmem:[#allocation11 + $0x6a8] sm:$0xff] }
 0xcee   : > { %12670 = vmatprep.subr.bf16.mxu0 %v13335_v47 }
 0xcf1   : > { %12672 = vmatpush3.bf16.msra.mxu0 %v12671_v31  ;;  %v12731_v31 = vpack.c.bf16 %v6290_v46, %v6289_v45  ;;  %v6476_v45 = vld [vmem:[#allocation11 + $0x6b8] sm:$0xff] }
 0xcf2   : > { %12673 = vmatprep.subr.bf16.mxu0 %v13335_v47 }
 0xcf5   : > { %12675 = vmatpush3.bf16.msra.mxu0 %v12674_v48  ;;  %v6292_v48 = vld [vmem:[#allocation11 + $0x598] sm:$0xff] }
 0xcf6   : > { %12676 = vmatprep.subr.bf16.mxu0 %v13335_v47  ;;  %v12734_v52 = vpack.c.bf16 %v6292_v48, %v6291_v51  ;;  %v6479_v48 = vld [vmem:[#allocation11 + $0x6d0] sm:$0xff] }
 0xcf9   : > { %12678 = vmatpush3.bf16.msra.mxu0 %v12677_v55  ;;  %v6294_v55 = vld [vmem:[#allocation11 + $0x5a8] sm:$0xff] }
 0xcfa   : > { %12679 = vmatprep.subr.bf16.mxu0 %v13335_v47  ;;  %v12737_v23 = vpack.c.bf16 %v6294_v55, %v6293_v54  ;;  %v6481_v55 = vld [vmem:[#allocation11 + $0x6e0] sm:$0xff] }
 0xcfd   : > { %12681 = vmatpush3.bf16.msra.mxu0 %v12680_v58  ;;  %v6296_v58 = vld [vmem:[#allocation11 + $0x5b8] sm:$0xff] }
 0xcfe   : > { %12682 = vmatprep.subr.bf16.mxu0 %v13335_v47  ;;  %v12740_v59 = vpack.c.bf16 %v6296_v58, %v6295_v57  ;;  %v6483_v58 = vld [vmem:[#allocation11 + $0x6f0] sm:$0xff] }
 0xd00   : > { %10461 = vmatmul.mubr.f32.vlgmr.msra.gmra.mrb[54].mxu0 %v14337_v62 }
 0xd01   : > { %12684 = vmatpush3.bf16.msra.mxu0 %v12683_v61  ;;  %10495 = vmatprep.mubr.msk.f32.mxu0 %vm13336_vm4, %v13337_v38  ;;  %v6298_v61 = vld [vmem:[#allocation11 + $0x5c8] sm:$0xff] }
 0xd02   : > { %12685 = vmatprep.subr.bf16.mxu0 %v13335_v47  ;;  %v12743_v43 = vpack.c.bf16 %v6298_v61, %v6297_v30  ;;  %v6559_v61 = vld [vmem:[#allocation11 + $0x700] sm:$0xff] }
 0xd05   : > { %12687 = vmatpush3.bf16.msra.mxu0 %v12686_v5  ;;  %v6300_v5 = vld [vmem:[#allocation11 + $0x5d8] sm:$0xff] }
 0xd06   : > { %12688 = vmatprep.subr.bf16.mxu0 %v13335_v47  ;;  %v12746_v15 = vpack.c.bf16 %v6300_v5, %v6299_v34  ;;  %v6485_v5 = vrot.slane %v14337_v62, 5 }
 0xd09   : > { %12690 = vmatpush3.bf16.msra.mxu0 %v12689_v4  ;;  %v6302_v4 = vld [vmem:[#allocation11 + $0x5e8] sm:$0xff] }
 0xd0a   : > { %12691 = vmatprep.subr.bf16.mxu0 %v13335_v47  ;;  %v12749_v2 = vpack.c.bf16 %v6302_v4, %v6301_v7  ;;  %v6562_v7 = vld [vmem:[#allocation11 + $0x718] sm:$0xff] }
 0xd0d   : > { %12693 = vmatpush3.bf16.msra.mxu0 %v12692_v56  ;;  %v6304_v56 = vld [vmem:[#allocation11 + $0x5f8] sm:$0xff] }
 0xd0e   : > { %12694 = vmatprep.subr.bf16.mxu0 %v13335_v47  ;;  %v12752_v8 = vpack.c.bf16 %v6304_v56, %v6303_v10  ;;  %v6564_v10 = vld [vmem:[#allocation11 + $0x728] sm:$0xff] }
 0xd11   : > { %12696 = vmatpush3.bf16.msra.mxu0 %v12695_v63  ;;  %v6380_v63 = vld [vmem:[#allocation11 + $0x608] sm:$0xff] }
 0xd12   : > { %12697 = vmatprep.subr.bf16.mxu0 %v13335_v47  ;;  %v12755_v16 = vpack.c.bf16 %v6380_v63, %v6379_v14  ;;  %v6566_v14 = vld [vmem:[#allocation11 + $0x738] sm:$0xff] }
 0xd15   : > { %12699 = vmatpush3.bf16.msra.mxu0 %v12698_v18  ;;  %v6381_v18 = vld [vmem:[#allocation11 + $0x610] sm:$0xff] }
 0xd16   : > { %12700 = vmatprep.subr.bf16.mxu0 %v13335_v47  ;;  %v12758_v17 = vpack.c.bf16 %v6382_v3, %v6381_v18  ;;  %v6569_v3 = vld [vmem:[#allocation11 + $0x750] sm:$0xff] }
 0xd19   : > { %12702 = vmatpush3.bf16.msra.mxu0 %v12701_v22  ;;  %v6383_v22 = vld [vmem:[#allocation11 + $0x620] sm:$0xff] }
 0xd1a   : > { %12703 = vmatprep.subr.bf16.mxu0 %v13335_v47  ;;  %v12761_v24 = vpack.c.bf16 %v6384_v20, %v6383_v22  ;;  %v6571_v20 = vld [vmem:[#allocation11 + $0x760] sm:$0xff] }
 0xd1d   : > { %12705 = vmatpush3.bf16.msra.mxu0 %v12704_v25  ;;  %v6385_v25 = vld [vmem:[#allocation11 + $0x630] sm:$0xff] }
 0xd1e   : > { %12706 = vmatprep.subr.bf16.mxu0 %v13335_v47  ;;  %v12764_v28 = vpack.c.bf16 %v6386_v26, %v6385_v25  ;;  %v6573_v26 = vld [vmem:[#allocation11 + $0x770] sm:$0xff] }
 0xd20   : > { %10496 = vmatmul.mubr.f32.vlgmr.msra.gmra.mrb[54].mxu0 %v6125_v50  ;;  %v6388_v50 = vld [vmem:[#allocation11 + $0x648] sm:$0xff] }
 0xd21   : > { %12708 = vmatpush3.bf16.msra.mxu0 %v12707_v29  ;;  %10530 = vmatprep.mubr.msk.f32.mxu0 %vm13336_vm4, %v13337_v38  ;;  %v6387_v29 = vld [vmem:[#allocation11 + $0x640] sm:$0xff] }
 0xd22   : > { %12709 = vmatprep.subr.bf16.mxu0 %v13335_v47  ;;  %v12767_v12 = vpack.c.bf16 %v6388_v50, %v6387_v29  ;;  %v6649_v50 = vld [vmem:[#allocation11 + $0x780] sm:$0xff] }
 0xd25   : > { %12711 = vmatpush3.bf16.msra.mxu0 %v12710_v33  ;;  %v6390_v33 = vld [vmem:[#allocation11 + $0x658] sm:$0xff] }
 0xd26   : > { %12712 = vmatprep.subr.bf16.mxu0 %v13335_v47  ;;  %v12770_v6 = vpack.c.bf16 %v6390_v33, %v6389_v32  ;;  %v6575_v33 = vrot.slane %v14337_v62, 6 }
 0xd29   : > { %12714 = vmatpush3.bf16.msra.mxu0 %v12713_v35  ;;  %v6392_v35 = vld [vmem:[#allocation11 + $0x668] sm:$0xff] }
 0xd2a   : > { %12715 = vmatprep.subr.bf16.mxu0 %v13335_v47  ;;  %v12773_v36 = vpack.c.bf16 %v6392_v35, %v6391_v53  ;;  %v6652_v53 = vld [vmem:[#allocation11 + $0x798] sm:$0xff] }
 0xd2d   : > { %12717 = vmatpush3.bf16.msra.mxu0 %v12716_v49  ;;  %v6394_v49 = vld [vmem:[#allocation11 + $0x678] sm:$0xff] }
 0xd2e   : > { %12718 = vmatprep.subr.bf16.mxu0 %v13335_v47  ;;  %v12776_v60 = vpack.c.bf16 %v6394_v49, %v6393_v37  ;;  %v6654_v37 = vld [vmem:[#allocation11 + $0x7a8] sm:$0xff] }
 0xd31   : > { %12720 = vmatpush3.bf16.msra.mxu0 %v12719_v40  ;;  %v6470_v40 = vld [vmem:[#allocation11 + $0x688] sm:$0xff] }
 0xd32   : > { %12721 = vmatprep.subr.bf16.mxu0 %v13335_v47  ;;  %v12779_v13 = vpack.c.bf16 %v6470_v40, %v6469_v39  ;;  %v6656_v39 = vld [vmem:[#allocation11 + $0x7b8] sm:$0xff] }
 0xd35   : > { %12723 = vmatpush3.bf16.msra.mxu0 %v12722_v42  ;;  %v6471_v42 = vld [vmem:[#allocation11 + $0x690] sm:$0xff] }
 0xd36   : > { %12724 = vmatprep.subr.bf16.mxu0 %v13335_v47  ;;  %v12782_v1 = vpack.c.bf16 %v6472_v27, %v6471_v42  ;;  %v6660_v27 = vld [vmem:[#allocation11 + $0x7d8] sm:$0xff] }
 0xd39   : > { %12726 = vmatpush3.bf16.msra.mxu0 %v12725_v41  ;;  %v6473_v41 = vld [vmem:[#allocation11 + $0x6a0] sm:$0xff] }
 0xd3a   : > { %12727 = vmatprep.subr.bf16.mxu0 %v13335_v47  ;;  %v12785_v9 = vpack.c.bf16 %v6474_v44, %v6473_v41  ;;  %v6661_v41 = vld [vmem:[#allocation11 + $0x7e0] sm:$0xff]  ;;  %v6662_v44 = vld [vmem:[#allocation11 + $0x7e8] sm:$0xff] }
 0xd3d   : > { %12729 = vmatpush3.bf16.msra.mxu0 %v12728_v11  ;;  %v6475_v11 = vld [vmem:[#allocation11 + $0x6b0] sm:$0xff] }
 0xd3e   : > { %12730 = vmatprep.subr.bf16.mxu0 %v13335_v47  ;;  %v12788_v46 = vpack.c.bf16 %v6476_v45, %v6475_v11  ;;  %v6663_v11 = vld [vmem:[#allocation11 + $0x7f0] sm:$0xff]  ;;  %v6664_v45 = vld [vmem:[#allocation11 + $0x7f8] sm:$0xff] }
 0xd40   : > { %10531 = vmatmul.mubr.f32.vlgmr.msra.gmra.mrb[54].mxu0 %v6215_v19  ;;  %v6478_v19 = vld [vmem:[#allocation11 + $0x6c8] sm:$0xff] }
 0xd41   : > { %12732 = vmatpush3.bf16.msra.mxu0 %v12731_v31  ;;  %10565 = vmatprep.mubr.msk.f32.mxu0 %vm13336_vm4, %v13337_v38  ;;  %v6477_v31 = vld [vmem:[#allocation11 + $0x6c0] sm:$0xff] }
 0xd42   : > { %12733 = vmatprep.subr.bf16.mxu0 %v13335_v47  ;;  %v12791_v51 = vpack.c.bf16 %v6478_v19, %v6477_v31  ;;  %v6665_v31 = vrot.slane %v14337_v62, 7  ;;  %v6739_v19 = vlaneseq }
 0xd45   : > { %12735 = vmatpush3.bf16.msra.mxu0 %v12734_v52  ;;  %v6480_v52 = vld [vmem:[#allocation11 + $0x6d8] sm:$0xff] }
 0xd46   : > { %12736 = vmatprep.subr.bf16.mxu0 %v13335_v47  ;;  %v12794_v54 = vpack.c.bf16 %v6480_v52, %v6479_v48  ;;  %v5300_v48 = vld [vmem:[#allocation13] sm:$0x1] }
 0xd49   : > { %12738 = vmatpush3.bf16.msra.mxu0 %v12737_v23  ;;  %v6482_v23 = vld [vmem:[#allocation11 + $0x6e8] sm:$0xff] }
 0xd4a   : > { %12739 = vmatprep.subr.bf16.mxu0 %v13335_v47  ;;  %v12797_v57 = vpack.c.bf16 %v6482_v23, %v6481_v55 }
 0xd4d   : > { %12741 = vmatpush3.bf16.msra.mxu0 %v12740_v59  ;;  %v6484_v59 = vld [vmem:[#allocation11 + $0x6f8] sm:$0xff] }
 0xd4e   : > { %12742 = vmatprep.subr.bf16.mxu0 %v13335_v47  ;;  %v12800_v30 = vpack.c.bf16 %v6484_v59, %v6483_v58 }
 0xd51   : > { %12744 = vmatpush3.bf16.msra.mxu0 %v12743_v43  ;;  %v6560_v43 = vld [vmem:[#allocation11 + $0x708] sm:$0xff] }
 0xd52   : > { %12745 = vmatprep.subr.bf16.mxu0 %v13335_v47  ;;  %v12803_v34 = vpack.c.bf16 %v6560_v43, %v6559_v61 }
 0xd55   : > { %12747 = vmatpush3.bf16.msra.mxu0 %v12746_v15  ;;  %v6561_v15 = vld [vmem:[#allocation11 + $0x710] sm:$0xff] }
 0xd56   : > { %12748 = vmatprep.subr.bf16.mxu0 %v13335_v47  ;;  %v12806_v4 = vpack.c.bf16 %v6562_v7, %v6561_v15 }
 0xd59   : > { %12750 = vmatpush3.bf16.msra.mxu0 %v12749_v2  ;;  %v6563_v2 = vld [vmem:[#allocation11 + $0x720] sm:$0xff] }
 0xd5a   : > { %12751 = vmatprep.subr.bf16.mxu0 %v13335_v47  ;;  %v12809_v56 = vpack.c.bf16 %v6564_v10, %v6563_v2 }
 0xd5d   : > { %12753 = vmatpush3.bf16.msra.mxu0 %v12752_v8  ;;  %v6565_v8 = vld [vmem:[#allocation11 + $0x730] sm:$0xff] }
 0xd5e   : > { %12754 = vmatprep.subr.bf16.mxu0 %v13335_v47  ;;  %v12812_v63 = vpack.c.bf16 %v6566_v14, %v6565_v8 }
 0xd60   : > { %10566 = vmatmul.mubr.f32.vlgmr.msra.gmra.mrb[54].mxu0 %v6305_v0  ;;  %v6568_v0 = vld [vmem:[#allocation11 + $0x748] sm:$0xff] }
 0xd61   : > { %12756 = vmatpush3.bf16.msra.mxu0 %v12755_v16  ;;  %10600 = vmatprep.mubr.msk.f32.mxu0 %vm13336_vm4, %v13337_v38  ;;  %v6567_v16 = vld [vmem:[#allocation11 + $0x740] sm:$0xff] }
 0xd62   : > { %12757 = vmatprep.subr.bf16.mxu0 %v13335_v47  ;;  %v12815_v18 = vpack.c.bf16 %v6568_v0, %v6567_v16 }
 0xd65   : > { %12759 = vmatpush3.bf16.msra.mxu0 %v12758_v17  ;;  %v6570_v17 = vld [vmem:[#allocation11 + $0x758] sm:$0xff] }
 0xd66   : > { %12760 = vmatprep.subr.bf16.mxu0 %v13335_v47  ;;  %v12818_v22 = vpack.c.bf16 %v6570_v17, %v6569_v3 }
 0xd69   : > { %12762 = vmatpush3.bf16.msra.mxu0 %v12761_v24  ;;  %v6572_v24 = vld [vmem:[#allocation11 + $0x768] sm:$0xff] }
 0xd6a   : > { %12763 = vmatprep.subr.bf16.mxu0 %v13335_v47  ;;  %v12821_v25 = vpack.c.bf16 %v6572_v24, %v6571_v20 }
 0xd6d   : > { %12765 = vmatpush3.bf16.msra.mxu0 %v12764_v28  ;;  %v6574_v28 = vld [vmem:[#allocation11 + $0x778] sm:$0xff] }
 0xd6e   : > { %12766 = vmatprep.subr.bf16.mxu0 %v13335_v47  ;;  %v12824_v29 = vpack.c.bf16 %v6574_v28, %v6573_v26 }
 0xd71   : > { %12768 = vmatpush3.bf16.msra.mxu0 %v12767_v12  ;;  %v6650_v12 = vld [vmem:[#allocation11 + $0x788] sm:$0xff] }
 0xd72   : > { %12769 = vmatprep.subr.bf16.mxu0 %v13335_v47  ;;  %v12827_v32 = vpack.c.bf16 %v6650_v12, %v6649_v50 }
 0xd75   : > { %12771 = vmatpush3.bf16.msra.mxu0 %v12770_v6  ;;  %v6651_v6 = vld [vmem:[#allocation11 + $0x790] sm:$0xff] }
 0xd76   : > { %12772 = vmatprep.subr.bf16.mxu0 %v13335_v47  ;;  %v12830_v35 = vpack.c.bf16 %v6652_v53, %v6651_v6 }
 0xd79   : > { %12774 = vmatpush3.bf16.msra.mxu0 %v12773_v36  ;;  %v6653_v36 = vld [vmem:[#allocation11 + $0x7a0] sm:$0xff] }
 0xd7a   : > { %12775 = vmatprep.subr.bf16.mxu0 %v13335_v47  ;;  %v12833_v49 = vpack.c.bf16 %v6654_v37, %v6653_v36 }
 0xd7d   : > { %12777 = vmatpush3.bf16.msra.mxu0 %v12776_v60  ;;  %v6655_v60 = vld [vmem:[#allocation11 + $0x7b0] sm:$0xff] }
 0xd7e   : > { %12778 = vmatprep.subr.bf16.mxu0 %v13335_v47  ;;  %v12836_v40 = vpack.c.bf16 %v6656_v39, %v6655_v60 }
 0xd80   : > { %10601 = vmatmul.mubr.f32.vlgmr.msra.gmra.mrb[54].mxu0 %v6395_v21  ;;  %v6658_v21 = vld [vmem:[#allocation11 + $0x7c8] sm:$0xff] }
 0xd81   : > { %12780 = vmatpush3.bf16.msra.mxu0 %v12779_v13  ;;  %10635 = vmatprep.mubr.msk.f32.mxu0 %vm13336_vm4, %v13337_v38  ;;  %v6657_v13 = vld [vmem:[#allocation11 + $0x7c0] sm:$0xff] }
 0xd82   : > { %12781 = vmatprep.subr.bf16.mxu0 %v13335_v47  ;;  %v12839_v42 = vpack.c.bf16 %v6658_v21, %v6657_v13 }
 0xd85   : > { %12783 = vmatpush3.bf16.msra.mxu0 %v12782_v1 }
 0xd86   : > { %12784 = vmatprep.subr.bf16.mxu0 %v13335_v47 }
 0xd89   : > { %12786 = vmatpush3.bf16.msra.mxu0 %v12785_v9  ;;  %v12845_v9 = vpack.c.bf16 %v6662_v44, %v6661_v41 }
 0xd8a   : > { %12787 = vmatprep.subr.bf16.mxu0 %v13335_v47 }
 0xd8d   : > { %12789 = vmatpush3.bf16.msra.mxu0 %v12788_v46  ;;  %v12848_v46 = vpack.c.bf16 %v6664_v45, %v6663_v11 }
 0xd8e   : > { %12790 = vmatprep.subr.bf16.mxu0 %v13335_v47 }
 0xd91   : > { %12792 = vmatpush3.bf16.msra.mxu0 %v12791_v51  ;;  %v6740_v51 = vshrl.u32 %v6739_v19, 7 }
 0xd92   : > { %12793 = vmatprep.subr.bf16.mxu0 %v13335_v47 }
 0xd93   : > { %v6741_v52 = vsub.s32 0, %v6740_v51 }
 0xd95   : > { %12795 = vmatpush3.bf16.msra.mxu0 %v12794_v54 }
 0xd96   : > { %12796 = vmatprep.subr.bf16.mxu0 %v13335_v47 }
 0xd99   : > { %12798 = vmatpush3.bf16.msra.mxu0 %v12797_v57 }
 0xd9a   : > { %12799 = vmatprep.subr.bf16.mxu0 %v13335_v47 }
 0xd9d   : > { %12801 = vmatpush3.bf16.msra.mxu0 %v12800_v30 }
 0xd9e   : > { %12802 = vmatprep.subr.bf16.mxu0 %v13335_v47 }
 0xda0   : > { %10636 = vmatmul.mubr.f32.vlgmr.msra.gmra.mrb[54].mxu0 %v6485_v5 }
 0xda1   : > { %12804 = vmatpush3.bf16.msra.mxu0 %v12803_v34  ;;  %10670 = vmatprep.mubr.msk.f32.mxu0 %vm13336_vm4, %v13337_v38 }
 0xda2   : > { %12805 = vmatprep.subr.bf16.mxu0 %v13335_v47 }
 0xda5   : > { %12807 = vmatpush3.bf16.msra.mxu0 %v12806_v4 }
 0xda6   : > { %12808 = vmatprep.subr.bf16.mxu0 %v13335_v47 }
 0xda9   : > { %12810 = vmatpush3.bf16.msra.mxu0 %v12809_v56 }
 0xdaa   : > { %12811 = vmatprep.subr.bf16.mxu0 %v13335_v47 }
 0xdad   : > { %12813 = vmatpush3.bf16.msra.mxu0 %v12812_v63 }
 0xdae   : > { %12814 = vmatprep.subr.bf16.mxu0 %v13335_v47 }
 0xdb1   : > { %12816 = vmatpush3.bf16.msra.mxu0 %v12815_v18 }
 0xdb2   : > { %12817 = vmatprep.subr.bf16.mxu0 %v13335_v47 }
 0xdb5   : > { %12819 = vmatpush3.bf16.msra.mxu0 %v12818_v22 }
 0xdb6   : > { %12820 = vmatprep.subr.bf16.mxu0 %v13335_v47 }
 0xdb9   : > { %12822 = vmatpush3.bf16.msra.mxu0 %v12821_v25 }
 0xdba   : > { %12823 = vmatprep.subr.bf16.mxu0 %v13335_v47 }
 0xdbd   : > { %12825 = vmatpush3.bf16.msra.mxu0 %v12824_v29 }
 0xdbe   : > { %12826 = vmatprep.subr.bf16.mxu0 %v13335_v47 }
 0xdc0   : > { %10671 = vmatmul.mubr.f32.vlgmr.msra.gmra.mrb[54].mxu0 %v6575_v33 }
 0xdc1   : > { %12828 = vmatpush3.bf16.msra.mxu0 %v12827_v32  ;;  %10705 = vmatprep.mubr.msk.f32.mxu0 %vm13336_vm4, %v13337_v38  ;;  %v6659_v38 = vld [vmem:[#allocation11 + $0x7d0] sm:$0xff] }
 0xdc2   : > { %12829 = vmatprep.subr.bf16.mxu0 %v13335_v47  ;;  %v12842_v1 = vpack.c.bf16 %v6660_v27, %v6659_v38 }
 0xdc5   : > { %12831 = vmatpush3.bf16.msra.mxu0 %v12830_v35 }
 0xdc6   : > { %12832 = vmatprep.subr.bf16.mxu0 %v13335_v47 }
 0xdc9   : > { %12834 = vmatpush3.bf16.msra.mxu0 %v12833_v49 }
 0xdca   : > { %12835 = vmatprep.subr.bf16.mxu0 %v13335_v47 }
 0xdcd   : > { %12837 = vmatpush3.bf16.msra.mxu0 %v12836_v40 }
 0xdce   : > { %12838 = vmatprep.subr.bf16.mxu0 %v13335_v47 }
 0xdd1   : > { %12840 = vmatpush3.bf16.msra.mxu0 %v12839_v42 }
 0xdd2   : > { %12841 = vmatprep.subr.bf16.mxu0 %v13335_v47 }
 0xdd5   : > { %12843 = vmatpush3.bf16.msra.mxu0 %v12842_v1 }
 0xdd6   : > { %12844 = vmatprep.subr.bf16.mxu0 %v13335_v47 }
 0xdd9   : > { %12846 = vmatpush3.bf16.msra.mxu0 %v12845_v9 }
 0xdda   : > { %12847 = vmatprep.subr.bf16.mxu0 %v13335_v47 }
 0xddd   : > { %12849 = vmatpush3.bf16.msra.mxu0 %v12848_v46 }
 0xde0   : > { %10706 = vmatmul.mubr.f32.vlgmr.msra.gmra.mrb[54].mxu0 %v6665_v31 }
 0xeb3   : > { %v6733_v54 = vpop.f32.mrb[54].mxu0 }
 0xeb4   : > { %v12850_v55 = vadd.f32 %v6733_v54, %v5300_v48  ;;  %v10707_v23 = vpop.f32.mrb[55].mxu0 }
 0xeb6   : > { %v6742_v57 = vrot.slane %v12850_v55, %v6741_v52 }
 0xeb8   : > { %6744 = vst [vmem:[%s394_s22] sm:$0xff] %v6742_v57 }
 0xeb9   : > { %13258 = shalt.err (!%p13255_p6)
}
 0xeba   : > { %s13259_s29 = scalar_lea.hbm %s14422_s19, 128  ;;  %s13263_s18 = scalar_lea.hbm %s14472_s8, 256 }
 0xebb   : > { %p13260_p5 = scmp.ne.s32.totalorder %s14422_s19, %s13259_s29  ;;  %p13264_p10 = scmp.lt.u32.totalorder %s14422_s19, %s14472_s8 }
 0xebc   : > { %p13265_p2 = scmp.lt.u32.totalorder %s13263_s18, %s13259_s29  ;;  %p13267_p4 = scmp.lt.u32.totalorder %s13259_s29, %s14422_s19 }
 0xebd   : > { %p13261_p9 = pnand %p13260_p5, %p14500_p7 }
 0xebe   : > { %p13266_p3 = por %p13265_p2, %p13264_p10 }
 0xebf   : > { %p13262_p12 = pneg %p13261_p9 }
 0xec0   : > { %p13268_p8 = por %p13267_p4, %p13266_p3 }
 0xec2   : > { %p13269_p11 = pnand %p13268_p8, %p13262_p12 }
 0xec4   : > { %13272 = shalt.err (!%p13269_p11)
}
 0xec5   : > { %12961 = dma.vmem_to_hbm [thread:$0]  (%p14500_p7), %s14424_s21, 128, %s14422_s19, %s6746_s12  }
 0xec6 PF: > { %p13003_p13 = scmp.ge.s32.totalorder %s13323_s30, 2  ;;  %s6771_s23 = sand.u32 1, %s13311_s27  }
 0xec7   : > { %p14501_p1 = scmp.ne.s32.totalorder %s14485_s16, 0  ;;  %s6772_s24 = scalar_lea.sflag [#allocation4], %s6771_s23 }
 0xec9   : > { %p12986_p0 = pnand %p13003_p13, %p14501_p1 }
 0xecb   : > { %13306 = dma.done.wait (!%p12986_p0), %s6772_s24, 128  }
 0xecc   : > { %13308 = vsyncadd (!%p12986_p0), %s6772_s24, 4294967168  ;;  %s14502_s30 = sld [smem:[#allocation21_spill]]  ;;  %s14503_s4 = sld [smem:[#allocation20_spill]] }
 0xecd   : > { %s14504_s29 = sld [smem:[#allocation22_spill]]  ;;  %s14505_s27 = smov %s13315_s28 }
 0xed2   : > { %p22_p6 = scmp.ge.s32.totalorder %s14502_s30, 4   ;;  %s14506_s28 = smov %s14503_s4 }
 0xed4   :  { %24 = sbr.rel (!%p22_p6) target bundleno = 10 (0xa), region = 183 }
 0xedb   :  { %6777 = vsyncpa [#allocation3], 1 }
 0xedc   :  { %6779 = vsyncpa [#allocation3 + $0x1], 1 }
 0xedd   :  { %6780 = vsyncpa [#allocation6], 1 }
 0xede   :  { %6781 = vsyncpa [#allocation9], 1 }
 0xedf   :  { %6782 = vsyncpa [#allocation12], 1 }
 0xee0   :  { %6783 = vsyncpa [#allocation4], 1 }
 0xee1   :  { %6785 = vsyncpa [#allocation4 + $0x1], 1 }

</bundles_post_ra>
